<compile_context>
chip_gen: v7x
topology: tpu7x:2x2x1
jax: 0.10.0
libtpu: 0.0.40
codegen_flags: <defaults>
</compile_context>

<pallas_src>
import numpy as np

import jax
import jax.numpy as jnp
from jax.experimental import pallas as pl
from jax.experimental.pallas import tpu as pltpu

TILE_B = 8      # images per grid step (sublane-aligned)
N_PAD = 128     # lane padding for all FC activations / logits


# ---------------------------------------------------------------------------
# Fused Pallas kernel: whole LeNet-5 forward for one batch tile
# ---------------------------------------------------------------------------
def lenet5_kernel(x_ref, wb1_ref, b1_ref, r1_ref, l1_ref,
                  wb2_ref, b2_ref, r2_ref, l2_ref,
                  w1p_ref, bf1_ref, w2_ref, bf2_ref, w3_ref, bf3_ref,
                  out_ref):
    tb = out_ref.shape[0]
    f32 = jnp.float32

    # ---- conv1 (1->6, 5x5, pad=2): 5 banded matmuls over the W axis --------
    # x_ref: (32*tb, 32), rows = (padded_row h, image b), lanes = padded width.
    acc1 = jnp.dot(x_ref[0:28 * tb, :], wb1_ref[0], preferred_element_type=f32)
    for di in range(1, 5):
        acc1 = acc1 + jnp.dot(x_ref[di * tb:(di + 28) * tb, :], wb1_ref[di],
                              preferred_element_type=f32)
    h1 = jax.nn.sigmoid(acc1 + b1_ref[...])              # (28*tb, 6*28)

    # ---- avg-pool 2x2: right matmul pools W, left matmul pools H -----------
    p1 = jnp.dot(l1_ref[...],
                 jnp.dot(h1, r1_ref[...], preferred_element_type=f32),
                 preferred_element_type=f32)              # (14*tb, 6*14)

    # ---- conv2 (6->16, 5x5, valid): 5 banded matmuls ------------------------
    acc2 = jnp.dot(p1[0:10 * tb, :], wb2_ref[0], preferred_element_type=f32)
    for di in range(1, 5):
        acc2 = acc2 + jnp.dot(p1[di * tb:(di + 10) * tb, :], wb2_ref[di],
                              preferred_element_type=f32)
    h2 = jax.nn.sigmoid(acc2 + b2_ref[...])               # (10*tb, 16*10)

    p2 = jnp.dot(l2_ref[...],
                 jnp.dot(h2, r2_ref[...], preferred_element_type=f32),
                 preferred_element_type=f32)              # (5*tb, 16*5)

    # ---- fc1 (400 -> 120, lane-padded to 128): 5 accumulated matmuls --------
    # p2 rows are (pooled_row hp, image b); weights already reordered so this
    # accumulation matches torch's NCHW flatten order exactly.
    f1 = jnp.dot(p2[0:tb, :], w1p_ref[0], preferred_element_type=f32)
    for hp in range(1, 5):
        f1 = f1 + jnp.dot(p2[hp * tb:(hp + 1) * tb, :], w1p_ref[hp],
                          preferred_element_type=f32)
    f1 = jax.nn.sigmoid(f1 + bf1_ref[...])                # (tb, 128)

    # ---- fc2, fc3 (padded rows of the weights are zero, so padded lanes of
    # the sigmoid activations contribute nothing) -----------------------------
    f2 = jax.nn.sigmoid(jnp.dot(f1, w2_ref[...], preferred_element_type=f32)
                        + bf2_ref[...])                   # (tb, 128)
    f3 = jnp.dot(f2, w3_ref[...], preferred_element_type=f32) + bf3_ref[...]
    out_ref[...] = f3.astype(out_ref.dtype)


# ---------------------------------------------------------------------------
# One-time weight layout preparation (hoisted out of the forward path)
# ---------------------------------------------------------------------------
def _conv_band(w, in_w, out_w):
    """(OC, IC, KH, KW) torch conv weight -> (KH, IC*in_w, OC*out_w) bands.

    band[di][ic*in_w + (ow+dj), oc*out_w + ow] = w[oc, ic, di, dj]
    so that sum_di (rows h+di of the activation) @ band[di] is the convolution.
    """
    w = np.asarray(w, np.float32)
    OC, IC, KH, KW = w.shape
    band = np.zeros((KH, IC * in_w, OC * out_w), np.float32)
    for di in range(KH):
        for oc in range(OC):
            for ic in range(IC):
                for ow in range(out_w):
                    for dj in range(KW):
                        wi = ow + dj
                        if wi < in_w:
                            band[di, ic * in_w + wi, oc * out_w + ow] = w[oc, ic, di, dj]
    return band


def _row_pool(tb, in_h):
    """(out_h*tb, in_h*tb): pools rows (h, b) -> (h//2, b), 0.5 per element."""
    out_h = in_h // 2
    L = np.zeros((out_h * tb, in_h * tb), np.float32)
    for i in range(out_h):
        for b in range(tb):
            L[i * tb + b, (2 * i) * tb + b] = 0.5
            L[i * tb + b, (2 * i + 1) * tb + b] = 0.5
    return L


def _col_pool(c, in_w):
    """(c*in_w, c*(in_w//2)): pools lanes (c, w) -> (c, w//2), 0.5 per element."""
    out_w = in_w // 2
    R = np.zeros((c * in_w, c * out_w), np.float32)
    for ci in range(c):
        for j in range(out_w):
            R[ci * in_w + 2 * j, ci * out_w + j] = 0.5
            R[ci * in_w + 2 * j + 1, ci * out_w + j] = 0.5
    return R


def _pad2(a, rows, cols):
    out = np.zeros((rows, cols), np.float32)
    out[:a.shape[0], :a.shape[1]] = a
    return out


def prepare_params(params, tile_b=TILE_B):
    p = {k: np.asarray(v, np.float32) for k, v in params.items()}

    # fc1 weight reordered so the per-pooled-row accumulation in the kernel
    # reproduces torch's NCHW flatten (index = c*25 + h*5 + w).
    fc1 = p["fc1_w"].reshape(120, 16, 5, 5).transpose(2, 1, 3, 0).reshape(5, 80, 120)
    w1p = np.zeros((5, 80, N_PAD), np.float32)
    w1p[:, :, :120] = fc1

    prep = dict(
        wband1=_conv_band(p["conv1_w"], 32, 28),                  # (5, 32, 168)
        b1big=np.repeat(p["conv1_b"], 28)[None, :],               # (1, 168)
        r1=_col_pool(6, 28),                                      # (168, 84)
        l1=_row_pool(tile_b, 28),                                 # (112, 224)
        wband2=_conv_band(p["conv2_w"], 14, 10),                  # (5, 84, 160)
        b2big=np.repeat(p["conv2_b"], 10)[None, :],               # (1, 160)
        r2=_col_pool(16, 10),                                     # (160, 80)
        l2=_row_pool(tile_b, 10),                                 # (40, 80)
        w1p=w1p,                                                  # (5, 80, 128)
        bf1=_pad2(p["fc1_b"][None, :], 1, N_PAD),                 # (1, 128)
        w2=_pad2(p["fc2_w"].T, N_PAD, N_PAD),                     # (128, 128)
        bf2=_pad2(p["fc2_b"][None, :], 1, N_PAD),                 # (1, 128)
        w3=_pad2(p["fc3_w"].T, N_PAD, N_PAD),                     # (128, 128)
        bf3=_pad2(p["fc3_b"][None, :], 1, N_PAD),                 # (1, 128)
    )
    return {k: jnp.asarray(v) for k, v in prep.items()}


# ---------------------------------------------------------------------------
# Forward pass (one fused pallas_call, gridded over batch tiles)
# ---------------------------------------------------------------------------
def lenet5_forward(prep, x, output_dim, tile_b=TILE_B):
    assert x.shape[-1] == 28 * 28, "Expected a square image 28 x 28"
    assert output_dim <= N_PAD
    lead = x.shape[:-1]
    xi = jnp.asarray(x, jnp.float32).reshape(-1, 28, 28)
    B = xi.shape[0]
    ntiles = max(1, -(-B // tile_b))
    bpad = ntiles * tile_b

    # Pad batch to a tile multiple and add the 2-px conv1 border; arrange rows
    # within each tile as (image_row, image) so the kernel only needs aligned
    # static 2-D slices.
    xp = jnp.pad(xi, ((0, bpad - B), (2, 2), (2, 2)))                       # (bpad,32,32)
    xp = xp.reshape(ntiles, tile_b, 32, 32).transpose(0, 2, 1, 3)
    xp = xp.reshape(ntiles * 32 * tile_b, 32)

    const3 = lambda i: (0, 0, 0)
    const2 = lambda i: (0, 0)
    grid_spec = pltpu.PrefetchScalarGridSpec(
        num_scalar_prefetch=0,
        grid=(ntiles,),
        in_specs=[
            pl.BlockSpec((32 * tile_b, 32), lambda i: (i, 0)),     # input tile
            pl.BlockSpec((5, 32, 168), const3),                    # conv1 bands
            pl.BlockSpec((1, 168), const2),                        # conv1 bias
            pl.BlockSpec((168, 84), const2),                       # pool1 (W)
            pl.BlockSpec((14 * tile_b, 28 * tile_b), const2),      # pool1 (H)
            pl.BlockSpec((5, 84, 160), const3),                    # conv2 bands
            pl.BlockSpec((1, 160), const2),                        # conv2 bias
            pl.BlockSpec((160, 80), const2),                       # pool2 (W)
            pl.BlockSpec((5 * tile_b, 10 * tile_b), const2),       # pool2 (H)
            pl.BlockSpec((5, 80, N_PAD), const3),                  # fc1 weights
            pl.BlockSpec((1, N_PAD), const2),                      # fc1 bias
            pl.BlockSpec((N_PAD, N_PAD), const2),                  # fc2 weights
            pl.BlockSpec((1, N_PAD), const2),                      # fc2 bias
            pl.BlockSpec((N_PAD, N_PAD), const2),                  # fc3 weights
            pl.BlockSpec((1, N_PAD), const2),                      # fc3 bias
        ],
        out_specs=pl.BlockSpec((tile_b, N_PAD), lambda i: (i, 0)),
    )

    out = pl.pallas_call(
        lenet5_kernel,
        grid_spec=grid_spec,
        out_shape=jax.ShapeDtypeStruct((bpad, N_PAD), jnp.float32),
        compiler_params=pltpu.CompilerParams(dimension_semantics=("parallel",)),
    )(xp, prep["wband1"], prep["b1big"], prep["r1"], prep["l1"],
      prep["wband2"], prep["b2big"], prep["r2"], prep["l2"],
      prep["w1p"], prep["bf1"], prep["w2"], prep["bf2"], prep["w3"], prep["bf3"])

    logits = out[:B, :output_dim]
    return logits.reshape(lead + (output_dim,))


# ---------------------------------------------------------------------------
# Parameters (deterministic, torch-like uniform init with fan_in bounds)
# ---------------------------------------------------------------------------
def init_params(key, output_dim):
    ks = jax.random.split(key, 10)

    def u(k, shape, fan_in):
        bound = 1.0 / (fan_in ** 0.5)
        return jax.random.uniform(k, shape, jnp.float32, -bound, bound)

    return {
        "conv1_w": u(ks[0], (6, 1, 5, 5), 1 * 25),
        "conv1_b": u(ks[1], (6,), 1 * 25),
        "conv2_w": u(ks[2], (16, 6, 5, 5), 6 * 25),
        "conv2_b": u(ks[3], (16,), 6 * 25),
        "fc1_w": u(ks[4], (120, 400), 400),
        "fc1_b": u(ks[5], (120,), 400),
        "fc2_w": u(ks[6], (84, 120), 120),
        "fc2_b": u(ks[7], (84,), 120),
        "fc3_w": u(ks[8], (output_dim, 84), 84),
        "fc3_b": u(ks[9], (output_dim,), 84),
    }


# Pure-JAX reference (mirrors the PyTorch module) for a correctness check.
def lenet5_reference(params, x, output_dim):
    lead = x.shape[:-1]
    h = x.reshape(-1, 1, 28, 28)
    h = jax.lax.conv_general_dilated(h, params["conv1_w"], (1, 1), ((2, 2), (2, 2)),
                                     dimension_numbers=("NCHW", "OIHW", "NCHW"))
    h = jax.nn.sigmoid(h + params["conv1_b"][None, :, None, None])
    h = h.reshape(h.shape[0], 6, 14, 2, 14, 2).mean(axis=(3, 5))
    h = jax.lax.conv_general_dilated(h, params["conv2_w"], (1, 1), ((0, 0), (0, 0)),
                                     dimension_numbers=("NCHW", "OIHW", "NCHW"))
    h = jax.nn.sigmoid(h + params["conv2_b"][None, :, None, None])
    h = h.reshape(h.shape[0], 16, 5, 2, 5, 2).mean(axis=(3, 5))
    h = h.reshape(h.shape[0], -1)
    h = jax.nn.sigmoid(h @ params["fc1_w"].T + params["fc1_b"])
    h = jax.nn.sigmoid(h @ params["fc2_w"].T + params["fc2_b"])
    h = h @ params["fc3_w"].T + params["fc3_b"]
    return h.reshape(lead + (output_dim,))


if __name__ == "__main__":
    output_dim = 10
    batch = 2

    key = jax.random.PRNGKey(0)
    pkey, xkey = jax.random.split(key)
    params = init_params(pkey, output_dim)
    prep = prepare_params(params, TILE_B)
    x = jax.random.normal(xkey, (batch, 28 * 28), dtype=jnp.float32)

    forward = jax.jit(lenet5_forward, static_argnames=("output_dim", "tile_b"))
    out = forward(prep, x, output_dim=output_dim)
    out = jax.block_until_ready(out)
    assert out.shape == (batch, output_dim)

    ref = jax.block_until_ready(lenet5_reference(params, x, output_dim))
    np.testing.assert_allclose(np.asarray(out), np.asarray(ref), atol=3e-3, rtol=3e-3)

    print("KERNEL_OK")
</pallas_src>

<mosaic_0001>
module attributes {stable_mosaic.version = 11 : i64} {
  func.func @lenet5_kernel(%arg0: i32, %arg1: memref<256x32xf32, #tpu.memory_space<vmem>>, %arg2: memref<5x32x168xf32, #tpu.memory_space<vmem>>, %arg3: memref<1x168xf32, #tpu.memory_space<vmem>>, %arg4: memref<168x84xf32, #tpu.memory_space<vmem>>, %arg5: memref<112x224xf32, #tpu.memory_space<vmem>>, %arg6: memref<5x84x160xf32, #tpu.memory_space<vmem>>, %arg7: memref<1x160xf32, #tpu.memory_space<vmem>>, %arg8: memref<160x80xf32, #tpu.memory_space<vmem>>, %arg9: memref<40x80xf32, #tpu.memory_space<vmem>>, %arg10: memref<5x80x128xf32, #tpu.memory_space<vmem>>, %arg11: memref<1x128xf32, #tpu.memory_space<vmem>>, %arg12: memref<128x128xf32, #tpu.memory_space<vmem>>, %arg13: memref<1x128xf32, #tpu.memory_space<vmem>>, %arg14: memref<128x128xf32, #tpu.memory_space<vmem>>, %arg15: memref<1x128xf32, #tpu.memory_space<vmem>>, %arg16: memref<8x128xf32, #tpu.memory_space<vmem>>) attributes {dimension_semantics = [#tpu.dimension_semantics<parallel>], iteration_bounds = array<i64: 1>, scalar_prefetch = 0 : i64, scratch_operands = 0 : i64, tpu.core_type = #tpu.core_type<tc>, window_params = [{transform_indices = @transform_0, window_bounds = array<i64: 256, 32>}, {pipeline_mode = #tpu.pipeline_mode<synchronous>, transform_indices = @transform_1, window_bounds = array<i64: 5, 32, 168>}, {pipeline_mode = #tpu.pipeline_mode<synchronous>, transform_indices = @transform_2, window_bounds = array<i64: 1, 168>}, {pipeline_mode = #tpu.pipeline_mode<synchronous>, transform_indices = @transform_3, window_bounds = array<i64: 168, 84>}, {pipeline_mode = #tpu.pipeline_mode<synchronous>, transform_indices = @transform_4, window_bounds = array<i64: 112, 224>}, {pipeline_mode = #tpu.pipeline_mode<synchronous>, transform_indices = @transform_5, window_bounds = array<i64: 5, 84, 160>}, {pipeline_mode = #tpu.pipeline_mode<synchronous>, transform_indices = @transform_6, window_bounds = array<i64: 1, 160>}, {pipeline_mode = #tpu.pipeline_mode<synchronous>, transform_indices = @transform_7, window_bounds = array<i64: 160, 80>}, {pipeline_mode = #tpu.pipeline_mode<synchronous>, transform_indices = @transform_8, window_bounds = array<i64: 40, 80>}, {pipeline_mode = #tpu.pipeline_mode<synchronous>, transform_indices = @transform_9, window_bounds = array<i64: 5, 80, 128>}, {pipeline_mode = #tpu.pipeline_mode<synchronous>, transform_indices = @transform_10, window_bounds = array<i64: 1, 128>}, {pipeline_mode = #tpu.pipeline_mode<synchronous>, transform_indices = @transform_11, window_bounds = array<i64: 128, 128>}, {pipeline_mode = #tpu.pipeline_mode<synchronous>, transform_indices = @transform_12, window_bounds = array<i64: 1, 128>}, {pipeline_mode = #tpu.pipeline_mode<synchronous>, transform_indices = @transform_13, window_bounds = array<i64: 128, 128>}, {pipeline_mode = #tpu.pipeline_mode<synchronous>, transform_indices = @transform_14, window_bounds = array<i64: 1, 128>}, {transform_indices = @transform_15, window_bounds = array<i64: 8, 128>}]} {
    %c0 = arith.constant 0 : index
    %c0_0 = arith.constant 0 : index
    %0 = vector.load %arg1[%c0, %c0_0] : memref<256x32xf32, #tpu.memory_space<vmem>>, vector<224x32xf32>
    %c0_1 = arith.constant 0 : index
    %c0_2 = arith.constant 0 : index
    %c0_3 = arith.constant 0 : index
    %1 = vector.load %arg2[%c0_1, %c0_2, %c0_3] : memref<5x32x168xf32, #tpu.memory_space<vmem>>, vector<1x32x168xf32>
    %2 = vector.shape_cast %1 : vector<1x32x168xf32> to vector<32x168xf32>
    %cst = arith.constant dense<0.000000e+00> : vector<224x168xf32>
    %3 = tpu.matmul %0, %2, %cst {dimension_numbers = #tpu.dot_dimension_numbers<[1], [0], [0], [1], [0, 0, 1, 1], [], []>} : vector<224x32xf32>, vector<32x168xf32>, vector<224x168xf32> -> vector<224x168xf32>
    %c8 = arith.constant 8 : index
    %c0_4 = arith.constant 0 : index
    %4 = vector.load %arg1[%c8, %c0_4] : memref<256x32xf32, #tpu.memory_space<vmem>>, vector<224x32xf32>
    %c1 = arith.constant 1 : index
    %c0_5 = arith.constant 0 : index
    %c0_6 = arith.constant 0 : index
    %5 = vector.load %arg2[%c1, %c0_5, %c0_6] : memref<5x32x168xf32, #tpu.memory_space<vmem>>, vector<1x32x168xf32>
    %6 = vector.shape_cast %5 : vector<1x32x168xf32> to vector<32x168xf32>
    %cst_7 = arith.constant dense<0.000000e+00> : vector<224x168xf32>
    %7 = tpu.matmul %4, %6, %cst_7 {dimension_numbers = #tpu.dot_dimension_numbers<[1], [0], [0], [1], [0, 0, 1, 1], [], []>} : vector<224x32xf32>, vector<32x168xf32>, vector<224x168xf32> -> vector<224x168xf32>
    %8 = arith.addf %3, %7 : vector<224x168xf32>
    %c16 = arith.constant 16 : index
    %c0_8 = arith.constant 0 : index
    %9 = vector.load %arg1[%c16, %c0_8] : memref<256x32xf32, #tpu.memory_space<vmem>>, vector<224x32xf32>
    %c2 = arith.constant 2 : index
    %c0_9 = arith.constant 0 : index
    %c0_10 = arith.constant 0 : index
    %10 = vector.load %arg2[%c2, %c0_9, %c0_10] : memref<5x32x168xf32, #tpu.memory_space<vmem>>, vector<1x32x168xf32>
    %11 = vector.shape_cast %10 : vector<1x32x168xf32> to vector<32x168xf32>
    %cst_11 = arith.constant dense<0.000000e+00> : vector<224x168xf32>
    %12 = tpu.matmul %9, %11, %cst_11 {dimension_numbers = #tpu.dot_dimension_numbers<[1], [0], [0], [1], [0, 0, 1, 1], [], []>} : vector<224x32xf32>, vector<32x168xf32>, vector<224x168xf32> -> vector<224x168xf32>
    %13 = arith.addf %8, %12 : vector<224x168xf32>
    %c24 = arith.constant 24 : index
    %c0_12 = arith.constant 0 : index
    %14 = vector.load %arg1[%c24, %c0_12] : memref<256x32xf32, #tpu.memory_space<vmem>>, vector<224x32xf32>
    %c3 = arith.constant 3 : index
    %c0_13 = arith.constant 0 : index
    %c0_14 = arith.constant 0 : index
    %15 = vector.load %arg2[%c3, %c0_13, %c0_14] : memref<5x32x168xf32, #tpu.memory_space<vmem>>, vector<1x32x168xf32>
    %16 = vector.shape_cast %15 : vector<1x32x168xf32> to vector<32x168xf32>
    %cst_15 = arith.constant dense<0.000000e+00> : vector<224x168xf32>
    %17 = tpu.matmul %14, %16, %cst_15 {dimension_numbers = #tpu.dot_dimension_numbers<[1], [0], [0], [1], [0, 0, 1, 1], [], []>} : vector<224x32xf32>, vector<32x168xf32>, vector<224x168xf32> -> vector<224x168xf32>
    %18 = arith.addf %13, %17 : vector<224x168xf32>
    %c32 = arith.constant 32 : index
    %c0_16 = arith.constant 0 : index
    %19 = vector.load %arg1[%c32, %c0_16] : memref<256x32xf32, #tpu.memory_space<vmem>>, vector<224x32xf32>
    %c4 = arith.constant 4 : index
    %c0_17 = arith.constant 0 : index
    %c0_18 = arith.constant 0 : index
    %20 = vector.load %arg2[%c4, %c0_17, %c0_18] : memref<5x32x168xf32, #tpu.memory_space<vmem>>, vector<1x32x168xf32>
    %21 = vector.shape_cast %20 : vector<1x32x168xf32> to vector<32x168xf32>
    %cst_19 = arith.constant dense<0.000000e+00> : vector<224x168xf32>
    %22 = tpu.matmul %19, %21, %cst_19 {dimension_numbers = #tpu.dot_dimension_numbers<[1], [0], [0], [1], [0, 0, 1, 1], [], []>} : vector<224x32xf32>, vector<32x168xf32>, vector<224x168xf32> -> vector<224x168xf32>
    %23 = arith.addf %18, %22 : vector<224x168xf32>
    %c0_20 = arith.constant 0 : index
    %c0_21 = arith.constant 0 : index
    %24 = vector.load %arg3[%c0_20, %c0_21] : memref<1x168xf32, #tpu.memory_space<vmem>>, vector<1x168xf32>
    %25 = vector.broadcast %24 : vector<1x168xf32> to vector<224x168xf32>
    %26 = arith.addf %23, %25 : vector<224x168xf32>
    %27 = arith.negf %26 : vector<224x168xf32>
    %28 = math.exp %27 : vector<224x168xf32>
    %cst_22 = arith.constant 1.000000e+00 : f32
    %29 = vector.broadcast %cst_22 : f32 to vector<224x168xf32>
    %30 = arith.addf %29, %28 : vector<224x168xf32>
    %31 = arith.divf %29, %30 : vector<224x168xf32>
    %c0_23 = arith.constant 0 : index
    %c0_24 = arith.constant 0 : index
    %32 = vector.load %arg5[%c0_23, %c0_24] : memref<112x224xf32, #tpu.memory_space<vmem>>, vector<112x224xf32>
    %c0_25 = arith.constant 0 : index
    %c0_26 = arith.constant 0 : index
    %33 = vector.load %arg4[%c0_25, %c0_26] : memref<168x84xf32, #tpu.memory_space<vmem>>, vector<168x84xf32>
    %cst_27 = arith.constant dense<0.000000e+00> : vector<224x84xf32>
    %34 = tpu.matmul %31, %33, %cst_27 {dimension_numbers = #tpu.dot_dimension_numbers<[1], [0], [0], [1], [0, 0, 1, 1], [], []>} : vector<224x168xf32>, vector<168x84xf32>, vector<224x84xf32> -> vector<224x84xf32>
    %cst_28 = arith.constant dense<0.000000e+00> : vector<112x84xf32>
    %35 = tpu.matmul %32, %34, %cst_28 {dimension_numbers = #tpu.dot_dimension_numbers<[1], [0], [0], [1], [0, 0, 1, 1], [], []>} : vector<112x224xf32>, vector<224x84xf32>, vector<112x84xf32> -> vector<112x84xf32>
    %36 = vector.extract_strided_slice %35 {offsets = [0, 0], sizes = [80, 84], strides = [1, 1]} : vector<112x84xf32> to vector<80x84xf32>
    %c0_29 = arith.constant 0 : index
    %c0_30 = arith.constant 0 : index
    %c0_31 = arith.constant 0 : index
    %37 = vector.load %arg6[%c0_29, %c0_30, %c0_31] : memref<5x84x160xf32, #tpu.memory_space<vmem>>, vector<1x84x160xf32>
    %38 = vector.shape_cast %37 : vector<1x84x160xf32> to vector<84x160xf32>
    %cst_32 = arith.constant dense<0.000000e+00> : vector<80x160xf32>
    %39 = tpu.matmul %36, %38, %cst_32 {dimension_numbers = #tpu.dot_dimension_numbers<[1], [0], [0], [1], [0, 0, 1, 1], [], []>} : vector<80x84xf32>, vector<84x160xf32>, vector<80x160xf32> -> vector<80x160xf32>
    %40 = vector.extract_strided_slice %35 {offsets = [8, 0], sizes = [80, 84], strides = [1, 1]} : vector<112x84xf32> to vector<80x84xf32>
    %c1_33 = arith.constant 1 : index
    %c0_34 = arith.constant 0 : index
    %c0_35 = arith.constant 0 : index
    %41 = vector.load %arg6[%c1_33, %c0_34, %c0_35] : memref<5x84x160xf32, #tpu.memory_space<vmem>>, vector<1x84x160xf32>
    %42 = vector.shape_cast %41 : vector<1x84x160xf32> to vector<84x160xf32>
    %cst_36 = arith.constant dense<0.000000e+00> : vector<80x160xf32>
    %43 = tpu.matmul %40, %42, %cst_36 {dimension_numbers = #tpu.dot_dimension_numbers<[1], [0], [0], [1], [0, 0, 1, 1], [], []>} : vector<80x84xf32>, vector<84x160xf32>, vector<80x160xf32> -> vector<80x160xf32>
    %44 = arith.addf %39, %43 : vector<80x160xf32>
    %45 = vector.extract_strided_slice %35 {offsets = [16, 0], sizes = [80, 84], strides = [1, 1]} : vector<112x84xf32> to vector<80x84xf32>
    %c2_37 = arith.constant 2 : index
    %c0_38 = arith.constant 0 : index
    %c0_39 = arith.constant 0 : index
    %46 = vector.load %arg6[%c2_37, %c0_38, %c0_39] : memref<5x84x160xf32, #tpu.memory_space<vmem>>, vector<1x84x160xf32>
    %47 = vector.shape_cast %46 : vector<1x84x160xf32> to vector<84x160xf32>
    %cst_40 = arith.constant dense<0.000000e+00> : vector<80x160xf32>
    %48 = tpu.matmul %45, %47, %cst_40 {dimension_numbers = #tpu.dot_dimension_numbers<[1], [0], [0], [1], [0, 0, 1, 1], [], []>} : vector<80x84xf32>, vector<84x160xf32>, vector<80x160xf32> -> vector<80x160xf32>
    %49 = arith.addf %44, %48 : vector<80x160xf32>
    %50 = vector.extract_strided_slice %35 {offsets = [24, 0], sizes = [80, 84], strides = [1, 1]} : vector<112x84xf32> to vector<80x84xf32>
    %c3_41 = arith.constant 3 : index
    %c0_42 = arith.constant 0 : index
    %c0_43 = arith.constant 0 : index
    %51 = vector.load %arg6[%c3_41, %c0_42, %c0_43] : memref<5x84x160xf32, #tpu.memory_space<vmem>>, vector<1x84x160xf32>
    %52 = vector.shape_cast %51 : vector<1x84x160xf32> to vector<84x160xf32>
    %cst_44 = arith.constant dense<0.000000e+00> : vector<80x160xf32>
    %53 = tpu.matmul %50, %52, %cst_44 {dimension_numbers = #tpu.dot_dimension_numbers<[1], [0], [0], [1], [0, 0, 1, 1], [], []>} : vector<80x84xf32>, vector<84x160xf32>, vector<80x160xf32> -> vector<80x160xf32>
    %54 = arith.addf %49, %53 : vector<80x160xf32>
    %55 = vector.extract_strided_slice %35 {offsets = [32, 0], sizes = [80, 84], strides = [1, 1]} : vector<112x84xf32> to vector<80x84xf32>
    %c4_45 = arith.constant 4 : index
    %c0_46 = arith.constant 0 : index
    %c0_47 = arith.constant 0 : index
    %56 = vector.load %arg6[%c4_45, %c0_46, %c0_47] : memref<5x84x160xf32, #tpu.memory_space<vmem>>, vector<1x84x160xf32>
    %57 = vector.shape_cast %56 : vector<1x84x160xf32> to vector<84x160xf32>
    %cst_48 = arith.constant dense<0.000000e+00> : vector<80x160xf32>
    %58 = tpu.matmul %55, %57, %cst_48 {dimension_numbers = #tpu.dot_dimension_numbers<[1], [0], [0], [1], [0, 0, 1, 1], [], []>} : vector<80x84xf32>, vector<84x160xf32>, vector<80x160xf32> -> vector<80x160xf32>
    %59 = arith.addf %54, %58 : vector<80x160xf32>
    %c0_49 = arith.constant 0 : index
    %c0_50 = arith.constant 0 : index
    %60 = vector.load %arg7[%c0_49, %c0_50] : memref<1x160xf32, #tpu.memory_space<vmem>>, vector<1x160xf32>
    %61 = vector.broadcast %60 : vector<1x160xf32> to vector<80x160xf32>
    %62 = arith.addf %59, %61 : vector<80x160xf32>
    %63 = arith.negf %62 : vector<80x160xf32>
    %64 = math.exp %63 : vector<80x160xf32>
    %cst_51 = arith.constant 1.000000e+00 : f32
    %65 = vector.broadcast %cst_51 : f32 to vector<80x160xf32>
    %66 = arith.addf %65, %64 : vector<80x160xf32>
    %67 = arith.divf %65, %66 : vector<80x160xf32>
    %c0_52 = arith.constant 0 : index
    %c0_53 = arith.constant 0 : index
    %68 = vector.load %arg9[%c0_52, %c0_53] : memref<40x80xf32, #tpu.memory_space<vmem>>, vector<40x80xf32>
    %c0_54 = arith.constant 0 : index
    %c0_55 = arith.constant 0 : index
    %69 = vector.load %arg8[%c0_54, %c0_55] : memref<160x80xf32, #tpu.memory_space<vmem>>, vector<160x80xf32>
    %cst_56 = arith.constant dense<0.000000e+00> : vector<80x80xf32>
    %70 = tpu.matmul %67, %69, %cst_56 {dimension_numbers = #tpu.dot_dimension_numbers<[1], [0], [0], [1], [0, 0, 1, 1], [], []>} : vector<80x160xf32>, vector<160x80xf32>, vector<80x80xf32> -> vector<80x80xf32>
    %cst_57 = arith.constant dense<0.000000e+00> : vector<40x80xf32>
    %71 = tpu.matmul %68, %70, %cst_57 {dimension_numbers = #tpu.dot_dimension_numbers<[1], [0], [0], [1], [0, 0, 1, 1], [], []>} : vector<40x80xf32>, vector<80x80xf32>, vector<40x80xf32> -> vector<40x80xf32>
    %72 = vector.extract_strided_slice %71 {offsets = [0, 0], sizes = [8, 80], strides = [1, 1]} : vector<40x80xf32> to vector<8x80xf32>
    %c0_58 = arith.constant 0 : index
    %c0_59 = arith.constant 0 : index
    %c0_60 = arith.constant 0 : index
    %73 = vector.load %arg10[%c0_58, %c0_59, %c0_60] : memref<5x80x128xf32, #tpu.memory_space<vmem>>, vector<1x80x128xf32>
    %74 = vector.shape_cast %73 : vector<1x80x128xf32> to vector<80x128xf32>
    %cst_61 = arith.constant dense<0.000000e+00> : vector<8x128xf32>
    %75 = tpu.matmul %72, %74, %cst_61 {dimension_numbers = #tpu.dot_dimension_numbers<[1], [0], [0], [1], [0, 0, 1, 1], [], []>} : vector<8x80xf32>, vector<80x128xf32>, vector<8x128xf32> -> vector<8x128xf32>
    %76 = vector.extract_strided_slice %71 {offsets = [8, 0], sizes = [8, 80], strides = [1, 1]} : vector<40x80xf32> to vector<8x80xf32>
    %c1_62 = arith.constant 1 : index
    %c0_63 = arith.constant 0 : index
    %c0_64 = arith.constant 0 : index
    %77 = vector.load %arg10[%c1_62, %c0_63, %c0_64] : memref<5x80x128xf32, #tpu.memory_space<vmem>>, vector<1x80x128xf32>
    %78 = vector.shape_cast %77 : vector<1x80x128xf32> to vector<80x128xf32>
    %cst_65 = arith.constant dense<0.000000e+00> : vector<8x128xf32>
    %79 = tpu.matmul %76, %78, %cst_65 {dimension_numbers = #tpu.dot_dimension_numbers<[1], [0], [0], [1], [0, 0, 1, 1], [], []>} : vector<8x80xf32>, vector<80x128xf32>, vector<8x128xf32> -> vector<8x128xf32>
    %80 = arith.addf %75, %79 : vector<8x128xf32>
    %81 = vector.extract_strided_slice %71 {offsets = [16, 0], sizes = [8, 80], strides = [1, 1]} : vector<40x80xf32> to vector<8x80xf32>
    %c2_66 = arith.constant 2 : index
    %c0_67 = arith.constant 0 : index
    %c0_68 = arith.constant 0 : index
    %82 = vector.load %arg10[%c2_66, %c0_67, %c0_68] : memref<5x80x128xf32, #tpu.memory_space<vmem>>, vector<1x80x128xf32>
    %83 = vector.shape_cast %82 : vector<1x80x128xf32> to vector<80x128xf32>
    %cst_69 = arith.constant dense<0.000000e+00> : vector<8x128xf32>
    %84 = tpu.matmul %81, %83, %cst_69 {dimension_numbers = #tpu.dot_dimension_numbers<[1], [0], [0], [1], [0, 0, 1, 1], [], []>} : vector<8x80xf32>, vector<80x128xf32>, vector<8x128xf32> -> vector<8x128xf32>
    %85 = arith.addf %80, %84 : vector<8x128xf32>
    %86 = vector.extract_strided_slice %71 {offsets = [24, 0], sizes = [8, 80], strides = [1, 1]} : vector<40x80xf32> to vector<8x80xf32>
    %c3_70 = arith.constant 3 : index
    %c0_71 = arith.constant 0 : index
    %c0_72 = arith.constant 0 : index
    %87 = vector.load %arg10[%c3_70, %c0_71, %c0_72] : memref<5x80x128xf32, #tpu.memory_space<vmem>>, vector<1x80x128xf32>
    %88 = vector.shape_cast %87 : vector<1x80x128xf32> to vector<80x128xf32>
    %cst_73 = arith.constant dense<0.000000e+00> : vector<8x128xf32>
    %89 = tpu.matmul %86, %88, %cst_73 {dimension_numbers = #tpu.dot_dimension_numbers<[1], [0], [0], [1], [0, 0, 1, 1], [], []>} : vector<8x80xf32>, vector<80x128xf32>, vector<8x128xf32> -> vector<8x128xf32>
    %90 = arith.addf %85, %89 : vector<8x128xf32>
    %91 = vector.extract_strided_slice %71 {offsets = [32, 0], sizes = [8, 80], strides = [1, 1]} : vector<40x80xf32> to vector<8x80xf32>
    %c4_74 = arith.constant 4 : index
    %c0_75 = arith.constant 0 : index
    %c0_76 = arith.constant 0 : index
    %92 = vector.load %arg10[%c4_74, %c0_75, %c0_76] : memref<5x80x128xf32, #tpu.memory_space<vmem>>, vector<1x80x128xf32>
    %93 = vector.shape_cast %92 : vector<1x80x128xf32> to vector<80x128xf32>
    %cst_77 = arith.constant dense<0.000000e+00> : vector<8x128xf32>
    %94 = tpu.matmul %91, %93, %cst_77 {dimension_numbers = #tpu.dot_dimension_numbers<[1], [0], [0], [1], [0, 0, 1, 1], [], []>} : vector<8x80xf32>, vector<80x128xf32>, vector<8x128xf32> -> vector<8x128xf32>
    %95 = arith.addf %90, %94 : vector<8x128xf32>
    %c0_78 = arith.constant 0 : index
    %c0_79 = arith.constant 0 : index
    %96 = vector.load %arg11[%c0_78, %c0_79] : memref<1x128xf32, #tpu.memory_space<vmem>>, vector<1x128xf32>
    %97 = vector.broadcast %96 : vector<1x128xf32> to vector<8x128xf32>
    %98 = arith.addf %95, %97 : vector<8x128xf32>
    %99 = arith.negf %98 : vector<8x128xf32>
    %100 = math.exp %99 : vector<8x128xf32>
    %cst_80 = arith.constant 1.000000e+00 : f32
    %101 = vector.broadcast %cst_80 : f32 to vector<8x128xf32>
    %102 = arith.addf %101, %100 : vector<8x128xf32>
    %103 = arith.divf %101, %102 : vector<8x128xf32>
    %c0_81 = arith.constant 0 : index
    %c0_82 = arith.constant 0 : index
    %104 = vector.load %arg12[%c0_81, %c0_82] : memref<128x128xf32, #tpu.memory_space<vmem>>, vector<128x128xf32>
    %cst_83 = arith.constant dense<0.000000e+00> : vector<8x128xf32>
    %105 = tpu.matmul %103, %104, %cst_83 {dimension_numbers = #tpu.dot_dimension_numbers<[1], [0], [0], [1], [0, 0, 1, 1], [], []>} : vector<8x128xf32>, vector<128x128xf32>, vector<8x128xf32> -> vector<8x128xf32>
    %c0_84 = arith.constant 0 : index
    %c0_85 = arith.constant 0 : index
    %106 = vector.load %arg13[%c0_84, %c0_85] : memref<1x128xf32, #tpu.memory_space<vmem>>, vector<1x128xf32>
    %107 = vector.broadcast %106 : vector<1x128xf32> to vector<8x128xf32>
    %108 = arith.addf %105, %107 : vector<8x128xf32>
    %109 = arith.negf %108 : vector<8x128xf32>
    %110 = math.exp %109 : vector<8x128xf32>
    %cst_86 = arith.constant 1.000000e+00 : f32
    %111 = vector.broadcast %cst_86 : f32 to vector<8x128xf32>
    %112 = arith.addf %111, %110 : vector<8x128xf32>
    %113 = arith.divf %111, %112 : vector<8x128xf32>
    %c0_87 = arith.constant 0 : index
    %c0_88 = arith.constant 0 : index
    %114 = vector.load %arg14[%c0_87, %c0_88] : memref<128x128xf32, #tpu.memory_space<vmem>>, vector<128x128xf32>
    %cst_89 = arith.constant dense<0.000000e+00> : vector<8x128xf32>
    %115 = tpu.matmul %113, %114, %cst_89 {dimension_numbers = #tpu.dot_dimension_numbers<[1], [0], [0], [1], [0, 0, 1, 1], [], []>} : vector<8x128xf32>, vector<128x128xf32>, vector<8x128xf32> -> vector<8x128xf32>
    %c0_90 = arith.constant 0 : index
    %c0_91 = arith.constant 0 : index
    %116 = vector.load %arg15[%c0_90, %c0_91] : memref<1x128xf32, #tpu.memory_space<vmem>>, vector<1x128xf32>
    %117 = vector.broadcast %116 : vector<1x128xf32> to vector<8x128xf32>
    %118 = arith.addf %115, %117 : vector<8x128xf32>
    %c0_92 = arith.constant 0 : index
    %c0_93 = arith.constant 0 : index
    %119 = vector.load %arg16[%c0_92, %c0_93] : memref<8x128xf32, #tpu.memory_space<vmem>>, vector<8x128xf32>
    tpu.vector_store %arg16[%c0_92, %c0_93], %118 {strides = array<i32>} : memref<8x128xf32, #tpu.memory_space<vmem>>, vector<8x128xf32>,
    return
  }
  func.func @transform_0(%arg0: i32) -> (i32, i32) {
    %c0_i32 = arith.constant 0 : i32
    %c0_i32_0 = arith.constant 0 : i32
    return %arg0, %c0_i32 : i32, i32
  }
  func.func @transform_1(%arg0: i32) -> (i32, i32, i32) {
    %c0_i32 = arith.constant 0 : i32
    %c0_i32_0 = arith.constant 0 : i32
    %c0_i32_1 = arith.constant 0 : i32
    %c0_i32_2 = arith.constant 0 : i32
    return %c0_i32, %c0_i32_0, %c0_i32_1 : i32, i32, i32
  }
  func.func @transform_2(%arg0: i32) -> (i32, i32) {
    %c0_i32 = arith.constant 0 : i32
    %c0_i32_0 = arith.constant 0 : i32
    %c0_i32_1 = arith.constant 0 : i32
    return %c0_i32, %c0_i32_0 : i32, i32
  }
  func.func @transform_3(%arg0: i32) -> (i32, i32) {
    %c0_i32 = arith.constant 0 : i32
    %c0_i32_0 = arith.constant 0 : i32
    %c0_i32_1 = arith.constant 0 : i32
    return %c0_i32, %c0_i32_0 : i32, i32
  }
  func.func @transform_4(%arg0: i32) -> (i32, i32) {
    %c0_i32 = arith.constant 0 : i32
    %c0_i32_0 = arith.constant 0 : i32
    %c0_i32_1 = arith.constant 0 : i32
    return %c0_i32, %c0_i32_0 : i32, i32
  }
  func.func @transform_5(%arg0: i32) -> (i32, i32, i32) {
    %c0_i32 = arith.constant 0 : i32
    %c0_i32_0 = arith.constant 0 : i32
    %c0_i32_1 = arith.constant 0 : i32
    %c0_i32_2 = arith.constant 0 : i32
    return %c0_i32, %c0_i32_0, %c0_i32_1 : i32, i32, i32
  }
  func.func @transform_6(%arg0: i32) -> (i32, i32) {
    %c0_i32 = arith.constant 0 : i32
    %c0_i32_0 = arith.constant 0 : i32
    %c0_i32_1 = arith.constant 0 : i32
    return %c0_i32, %c0_i32_0 : i32, i32
  }
  func.func @transform_7(%arg0: i32) -> (i32, i32) {
    %c0_i32 = arith.constant 0 : i32
    %c0_i32_0 = arith.constant 0 : i32
    %c0_i32_1 = arith.constant 0 : i32
    return %c0_i32, %c0_i32_0 : i32, i32
  }
  func.func @transform_8(%arg0: i32) -> (i32, i32) {
    %c0_i32 = arith.constant 0 : i32
    %c0_i32_0 = arith.constant 0 : i32
    %c0_i32_1 = arith.constant 0 : i32
    return %c0_i32, %c0_i32_0 : i32, i32
  }
  func.func @transform_9(%arg0: i32) -> (i32, i32, i32) {
    %c0_i32 = arith.constant 0 : i32
    %c0_i32_0 = arith.constant 0 : i32
    %c0_i32_1 = arith.constant 0 : i32
    %c0_i32_2 = arith.constant 0 : i32
    return %c0_i32, %c0_i32_0, %c0_i32_1 : i32, i32, i32
  }
  func.func @transform_10(%arg0: i32) -> (i32, i32) {
    %c0_i32 = arith.constant 0 : i32
    %c0_i32_0 = arith.constant 0 : i32
    %c0_i32_1 = arith.constant 0 : i32
    return %c0_i32, %c0_i32_0 : i32, i32
  }
  func.func @transform_11(%arg0: i32) -> (i32, i32) {
    %c0_i32 = arith.constant 0 : i32
    %c0_i32_0 = arith.constant 0 : i32
    %c0_i32_1 = arith.constant 0 : i32
    return %c0_i32, %c0_i32_0 : i32, i32
  }
  func.func @transform_12(%arg0: i32) -> (i32, i32) {
    %c0_i32 = arith.constant 0 : i32
    %c0_i32_0 = arith.constant 0 : i32
    %c0_i32_1 = arith.constant 0 : i32
    return %c0_i32, %c0_i32_0 : i32, i32
  }
  func.func @transform_13(%arg0: i32) -> (i32, i32) {
    %c0_i32 = arith.constant 0 : i32
    %c0_i32_0 = arith.constant 0 : i32
    %c0_i32_1 = arith.constant 0 : i32
    return %c0_i32, %c0_i32_0 : i32, i32
  }
  func.func @transform_14(%arg0: i32) -> (i32, i32) {
    %c0_i32 = arith.constant 0 : i32
    %c0_i32_0 = arith.constant 0 : i32
    %c0_i32_1 = arith.constant 0 : i32
    return %c0_i32, %c0_i32_0 : i32, i32
  }
  func.func @transform_15(%arg0: i32) -> (i32, i32) {
    %c0_i32 = arith.constant 0 : i32
    %c0_i32_0 = arith.constant 0 : i32
    return %arg0, %c0_i32 : i32, i32
  }
}

</mosaic_0001>

<bundles_post_ra>
// kernel: lenet5_forward.1
= control target key start
LH: loop header
LB: loop body
LE: loop exit
PB: predicated region body
PF: predicated region fallthrough
CT: control target
= control target key end

     0   :  { %v6561_v3 = vmov 0.0   ;;  %vm96_vm0 = vcmask 261120   ;;  %vm2333_vm1 = vcmask 326656   ;;  %vm2623_vm2 = vcmask 785408   ;;  %s8611_s1 = inlined_call_operand.vmem [shape: f32[5,32,168], index: 1, kind: input, shape index: {}]   ;;  %s8612_s0 = inlined_call_operand.vmem [shape: f32[256,32], index: 0, kind: input, shape index: {}]   ;;  %s8613_s3 = inlined_call_operand.vmem [shape: f32[168,84], index: 3, kind: input, shape index: {}]   ;;  %s8614_s2 = inlined_call_operand.vmem [shape: f32[1,168], index: 2, kind: input, shape index: {}]   ;;  %s8615_s4 = inlined_call_operand.vmem [shape: f32[112,224], index: 4, kind: input, shape index: {}]   ;;  %s8616_s5 = inlined_call_operand.vmem [shape: f32[5,84,160], index: 5, kind: input, shape index: {}]   ;;  %s8617_s7 = inlined_call_operand.vmem [shape: f32[160,80], index: 7, kind: input, shape index: {}]   ;;  %s8618_s6 = inlined_call_operand.vmem [shape: f32[1,160], index: 6, kind: input, shape index: {}]   ;;  %s8619_s9 = inlined_call_operand.vmem [shape: f32[5,80,128], index: 9, kind: input, shape index: {}]   ;;  %s8620_s8 = inlined_call_operand.vmem [shape: f32[40,80], index: 8, kind: input, shape index: {}]   ;;  %s8621_s11 = inlined_call_operand.vmem [shape: f32[128,128], index: 11, kind: input, shape index: {}]   ;;  %s8622_s13 = inlined_call_operand.vmem [shape: f32[128,128], index: 13, kind: input, shape index: {}]   ;;  %s8623_s10 = inlined_call_operand.vmem [shape: f32[1,128], index: 10, kind: input, shape index: {}]   ;;  %s8624_s12 = inlined_call_operand.vmem [shape: f32[1,128], index: 12, kind: input, shape index: {}]   ;;  %s8625_s14 = inlined_call_operand.vmem [shape: f32[1,128], index: 14, kind: input, shape index: {}]   ;;  %s8626_s15 = inlined_call_operand.vmem [shape: f32[8,128], index: 15, kind: output, shape index: {}]  }
   0x1   :  { %v4736_v0 = vld [vmem:[%s8611_s1 + $0x48] sm:$0xff]  ;;  %v4738_v1 = vld [vmem:[%s8611_s1 + $0x58] sm:$0xff]  ;;  %v4735_v2 = vld [vmem:[%s8611_s1 + $0x40] sm:$0xff]  ;;  %245 = vmatprep.mubr.f32.mxu0 %v6561_v3  ;;  %vm2877_vm3 = vcmask 1043456   ;;  %vm2846_vm4 = vcmask 687104   ;;  %vm6563_vm5 = vmmov 0  }
   0x2   :  { %v5562_v4 = vpack.c.bf16 %v4738_v1, %v4736_v0  ;;  %v4737_v5 = vld [vmem:[%s8611_s1 + $0x50] sm:$0xff]  ;;  %v4740_v6 = vld [vmem:[%s8611_s1 + $0x68] sm:$0xff]  ;;  %v4742_v7 = vld [vmem:[%s8611_s1 + $0x78] sm:$0xff]  ;;  %vm3996_vm6 = vcmask 654336  }
   0x3   :  { %v5564_v8 = vpack.c.bf16 %v4737_v5, %v4735_v2  ;;  %v5566_v9 = vpack.c.bf16 %v4742_v7, %v4740_v6  ;;  %v4739_v10 = vld [vmem:[%s8611_s1 + $0x60] sm:$0xff]  ;;  %v4741_v11 = vld [vmem:[%s8611_s1 + $0x70] sm:$0xff]  ;;  %v79_v12 = vld [vmem:[%s8611_s1 + $0x8] sm:$0xff] }
   0x4   :  { %5563 = vmatprep.subr.bf16.mxu0 %v5562_v4  ;;  %v81_v13 = vld [vmem:[%s8611_s1 + $0x18] sm:$0xff]  ;;  %v5568_v14 = vpack.c.bf16 %v4741_v11, %v4739_v10  ;;  %v78_v16 = vld [vmem:[%s8611_s1] sm:$0xff]  ;;  %v80_v17 = vld [vmem:[%s8611_s1 + $0x10] sm:$0xff] }
   0x5   :  { %5565 = vmatpush1.bf16.msra.mxu0 %v5564_v8  ;;  %v5570_v15 = vpack.c.bf16 %v81_v13, %v79_v12  ;;  %v6684_v18 = vld [vmem:[%s8612_s0 + $0x8] sm:$0xff]  ;;  %v5572_v19 = vpack.c.bf16 %v80_v17, %v78_v16  ;;  %v85_v21 = vld [vmem:[%s8611_s1 + $0x38] sm:$0xff]  ;;  %v82_v23 = vld [vmem:[%s8611_s1 + $0x20] sm:$0xff] }
   0x6   :  { %5567 = vmatprep.subr.bf16.mxu0 %v5566_v9  ;;  %v83_v20 = vld [vmem:[%s8611_s1 + $0x28] sm:$0xff]  ;;  %v84_v24 = vld [vmem:[%s8611_s1 + $0x30] sm:$0xff]  ;;  %v4802_v28 = vld [vmem:[%s8611_s1 + $0x98] sm:$0xff] }
   0x7   :  { %v5574_v22 = vpack.c.bf16 %v85_v21, %v83_v20  ;;  %v6704_v25 = vld [vmem:[%s8612_s0 + $0x10] sm:$0xff]  ;;  %v5576_v26 = vpack.c.bf16 %v84_v24, %v82_v23  ;;  %v4800_v27 = vld [vmem:[%s8611_s1 + $0x88] sm:$0xff]  ;;  %v6718_v29 = vld [vmem:[%s8612_s0 + $0x18] sm:$0xff] }
   0x8   :  { %v5578_v30 = vpack.c.bf16 %v4802_v28, %v4800_v27  ;;  %v6726_v31 = vld [vmem:[%s8612_s0 + $0x20] sm:$0xff]  ;;  %v6734_v32 = vld [vmem:[%s8612_s0 + $0x28] sm:$0xff]  ;;  %v6742_v33 = vld [vmem:[%s8612_s0 + $0x30] sm:$0xff]  ;;  %v6562_v28 = vmov 0.0|0.0  }
   0x9   :  { %5569 = vmatpush1.bf16.msra.mxu0 %v5568_v14  ;;  %v6750_v34 = vld [vmem:[%s8612_s0 + $0x38] sm:$0xff]  ;;  %v6758_v35 = vld [vmem:[%s8612_s0 + $0x40] sm:$0xff]  ;;  %v6766_v36 = vld [vmem:[%s8612_s0 + $0x48] sm:$0xff]  ;;  %5602 = vmatprep.subr.bf16.mxu1 %v6562_v28 }
   0xa   :  { %5571 = vmatprep.subr.bf16.mxu0 %v5570_v15  ;;  %v6774_v37 = vld [vmem:[%s8612_s0 + $0x50] sm:$0xff]  ;;  %v6782_v38 = vld [vmem:[%s8612_s0 + $0x58] sm:$0xff]  ;;  %v6790_v39 = vld [vmem:[%s8612_s0 + $0x60] sm:$0xff] }
   0xb   :  { %v6798_v40 = vld [vmem:[%s8612_s0 + $0x68] sm:$0xff]  ;;  %v6806_v41 = vld [vmem:[%s8612_s0 + $0x70] sm:$0xff]  ;;  %v6814_v42 = vld [vmem:[%s8612_s0 + $0x78] sm:$0xff] }
   0xc   :  { %4743 = vmatmul.mubr.msk.f32.vlgmr.msra.gmra.mrb[0].mxu0 %vm96_vm0, %v6684_v18  ;;  %v6822_v43 = vld [vmem:[%s8612_s0 + $0x80] sm:$0xff]  ;;  %v6830_v44 = vld [vmem:[%s8612_s0 + $0x88] sm:$0xff]  ;;  %v6838_v45 = vld [vmem:[%s8612_s0 + $0x90] sm:$0xff] }
   0xd   :  { %251 = vmatprep.mubr.f32.mxu0 %v6561_v3  ;;  %5573 = vmatpush1.bf16.msra.mxu0 %v5572_v19  ;;  %v6846_v46 = vld [vmem:[%s8612_s0 + $0x98] sm:$0xff]  ;;  %v6854_v47 = vld [vmem:[%s8612_s0 + $0xa0] sm:$0xff]  ;;  %v6862_v48 = vld [vmem:[%s8612_s0 + $0xa8] sm:$0xff] }
   0xe   :  { %5575 = vmatprep.subr.bf16.mxu0 %v5574_v22  ;;  %v6870_v49 = vld [vmem:[%s8612_s0 + $0xb0] sm:$0xff]  ;;  %v6878_v50 = vld [vmem:[%s8612_s0 + $0xb8] sm:$0xff]  ;;  %v6886_v51 = vld [vmem:[%s8612_s0 + $0xc0] sm:$0xff] }
   0xf   :  { %v6894_v52 = vld [vmem:[%s8612_s0 + $0xc8] sm:$0xff]  ;;  %v6902_v53 = vld [vmem:[%s8612_s0 + $0xd0] sm:$0xff]  ;;  %v6910_v54 = vld [vmem:[%s8612_s0 + $0xd8] sm:$0xff] }
  0x10   :  { %4744 = vmatmul.mubr.msk.f32.gmra.mrb[2].mxu0 %vm96_vm0, %v6704_v25  ;;  %v6918_v55 = vld [vmem:[%s8612_s0 + $0xe0] sm:$0xff]  ;;  %v4801_v57 = vld [vmem:[%s8611_s1 + $0x90] sm:$0xff]  ;;  %v4804_v58 = vld [vmem:[%s8611_s1 + $0xa8] sm:$0xff] }
  0x11   :  { %257 = vmatprep.mubr.f32.mxu0 %v6561_v3  ;;  %5577 = vmatpush1.bf16.msra.mxu0 %v5576_v26  ;;  %v4799_v56 = vld [vmem:[%s8611_s1 + $0x80] sm:$0xff]  ;;  %v4806_v59 = vld [vmem:[%s8611_s1 + $0xb8] sm:$0xff]  ;;  %v4805_v0 = vld [vmem:[%s8611_s1 + $0xb0] sm:$0xff] }
  0x12   :  { %5579 = vmatprep.subr.bf16.mxu0 %v5578_v30  ;;  %v50_v60 = vld [vmem:[%s8612_s0] sm:$0xff]  ;;  %v5580_v61 = vpack.c.bf16 %v4801_v57, %v4799_v56  ;;  %v5582_v62 = vpack.c.bf16 %v4806_v59, %v4804_v58  ;;  %v4836_v1 = vld [vmem:[%s8611_s1 + $0xc8] sm:$0xff]  ;;  %v4838_v2 = vld [vmem:[%s8611_s1 + $0xd8] sm:$0xff] }
  0x13   :  { %v4803_v63 = vld [vmem:[%s8611_s1 + $0xa0] sm:$0xff]  ;;  %v5586_v5 = vpack.c.bf16 %v4838_v2, %v4836_v1  ;;  %v4837_v7 = vld [vmem:[%s8611_s1 + $0xd0] sm:$0xff]  ;;  %v4840_v8 = vld [vmem:[%s8611_s1 + $0xe8] sm:$0xff] }
  0x14   :  { %4745 = vmatmul.mubr.msk.f32.gmra.mrb[4].mxu0 %vm96_vm0, %v6718_v29  ;;  %v5584_v4 = vpack.c.bf16 %v4805_v0, %v4803_v63  ;;  %v4835_v6 = vld [vmem:[%s8611_s1 + $0xc0] sm:$0xff]  ;;  %v4842_v9 = vld [vmem:[%s8611_s1 + $0xf8] sm:$0xff]  ;;  %v4841_v13 = vld [vmem:[%s8611_s1 + $0xf0] sm:$0xff] }
  0x15   :  { %263 = vmatprep.mubr.f32.mxu0 %v6561_v3  ;;  %v5588_v10 = vpack.c.bf16 %v4837_v7, %v4835_v6  ;;  %v5590_v11 = vpack.c.bf16 %v4842_v9, %v4840_v8  ;;  %v4839_v12 = vld [vmem:[%s8611_s1 + $0xe0] sm:$0xff]  ;;  %v4872_v14 = vld [vmem:[%s8611_s1 + $0x108] sm:$0xff]  ;;  %v4874_v15 = vld [vmem:[%s8611_s1 + $0x118] sm:$0xff] }
  0x16   :  { %v5592_v16 = vpack.c.bf16 %v4841_v13, %v4839_v12  ;;  %v5594_v17 = vpack.c.bf16 %v4874_v15, %v4872_v14  ;;  %v4871_v19 = vld [vmem:[%s8611_s1 + $0x100] sm:$0xff]  ;;  %v4873_v20 = vld [vmem:[%s8611_s1 + $0x110] sm:$0xff]  ;;  %v4876_v21 = vld [vmem:[%s8611_s1 + $0x128] sm:$0xff] }
  0x17   :  { %v4878_v22 = vld [vmem:[%s8611_s1 + $0x138] sm:$0xff]  ;;  %v5596_v23 = vpack.c.bf16 %v4873_v20, %v4871_v19  ;;  %v4877_v26 = vld [vmem:[%s8611_s1 + $0x130] sm:$0xff]  ;;  %v2313_v30 = vld [vmem:[%s8613_s3 + $0x8] sm:$0xff] }
  0x18   :  { %4746 = vmatmul.mubr.msk.f32.gmra.mrb[6].mxu0 %vm96_vm0, %v6726_v31  ;;  %v5598_v24 = vpack.c.bf16 %v4878_v22, %v4876_v21  ;;  %v2314_v56 = vld [vmem:[%s8613_s3 + $0x10] sm:$0xff]  ;;  %v2315_v58 = vld [vmem:[%s8613_s3 + $0x18] sm:$0xff]  ;;  %v1880_v1 = vld [vmem:[%s8614_s2] sm:$0x3] }
  0x19   :  { %269 = vmatprep.mubr.f32.mxu0 %v6561_v3  ;;  %v5606_v59 = vpack.c.bf16 %v2315_v58, %v2314_v56  ;;  %v7270_v63 = vld [vmem:[%s8612_s0 + $0xf0] sm:$0xff] }
  0x1c   :  { %4747 = vmatmul.mubr.msk.f32.gmra.mrb[8].mxu0 %vm96_vm0, %v6734_v32 }
  0x1d   :  { %275 = vmatprep.mubr.f32.mxu0 %v6561_v3 }
  0x20   :  { %4748 = vmatmul.mubr.msk.f32.gmra.mrb[10].mxu0 %vm96_vm0, %v6742_v33 }
  0x21   :  { %281 = vmatprep.mubr.f32.mxu0 %v6561_v3 }
  0x24   :  { %4749 = vmatmul.mubr.msk.f32.gmra.mrb[12].mxu0 %vm96_vm0, %v6750_v34 }
  0x25   :  { %287 = vmatprep.mubr.f32.mxu0 %v6561_v3 }
  0x28   :  { %4750 = vmatmul.mubr.msk.f32.gmra.mrb[14].mxu0 %vm96_vm0, %v6758_v35 }
  0x29   :  { %293 = vmatprep.mubr.f32.mxu0 %v6561_v3 }
  0x2c   :  { %4751 = vmatmul.mubr.msk.f32.gmra.mrb[16].mxu0 %vm96_vm0, %v6766_v36 }
  0x2d   :  { %299 = vmatprep.mubr.f32.mxu0 %v6561_v3 }
  0x30   :  { %4752 = vmatmul.mubr.msk.f32.gmra.mrb[18].mxu0 %vm96_vm0, %v6774_v37 }
  0x31   :  { %305 = vmatprep.mubr.f32.mxu0 %v6561_v3 }
  0x34   :  { %4753 = vmatmul.mubr.msk.f32.gmra.mrb[20].mxu0 %vm96_vm0, %v6782_v38 }
  0x35   :  { %311 = vmatprep.mubr.f32.mxu0 %v6561_v3 }
  0x38   :  { %4754 = vmatmul.mubr.msk.f32.gmra.mrb[22].mxu0 %vm96_vm0, %v6790_v39 }
  0x39   :  { %317 = vmatprep.mubr.f32.mxu0 %v6561_v3 }
  0x3c   :  { %4755 = vmatmul.mubr.msk.f32.gmra.mrb[24].mxu0 %vm96_vm0, %v6798_v40 }
  0x3d   :  { %323 = vmatprep.mubr.f32.mxu0 %v6561_v3 }
  0x40   :  { %4756 = vmatmul.mubr.msk.f32.gmra.mrb[26].mxu0 %vm96_vm0, %v6806_v41 }
  0x41   :  { %329 = vmatprep.mubr.f32.mxu0 %v6561_v3 }
  0x44   :  { %4757 = vmatmul.mubr.msk.f32.gmra.mrb[28].mxu0 %vm96_vm0, %v6814_v42 }
  0x45   :  { %335 = vmatprep.mubr.f32.mxu0 %v6561_v3 }
  0x48   :  { %4758 = vmatmul.mubr.msk.f32.gmra.mrb[30].mxu0 %vm96_vm0, %v6822_v43 }
  0x49   :  { %341 = vmatprep.mubr.f32.mxu0 %v6561_v3 }
  0x4c   :  { %4759 = vmatmul.mubr.msk.f32.gmra.mrb[32].mxu0 %vm96_vm0, %v6830_v44 }
  0x4d   :  { %347 = vmatprep.mubr.f32.mxu0 %v6561_v3 }
  0x50   :  { %4760 = vmatmul.mubr.msk.f32.gmra.mrb[34].mxu0 %vm96_vm0, %v6838_v45 }
  0x51   :  { %353 = vmatprep.mubr.f32.mxu0 %v6561_v3 }
  0x54   :  { %4761 = vmatmul.mubr.msk.f32.gmra.mrb[36].mxu0 %vm96_vm0, %v6846_v46 }
  0x55   :  { %359 = vmatprep.mubr.f32.mxu0 %v6561_v3 }
  0x58   :  { %4762 = vmatmul.mubr.msk.f32.gmra.mrb[38].mxu0 %vm96_vm0, %v6854_v47 }
  0x59   :  { %365 = vmatprep.mubr.f32.mxu0 %v6561_v3 }
  0x5c   :  { %4763 = vmatmul.mubr.msk.f32.gmra.mrb[40].mxu0 %vm96_vm0, %v6862_v48 }
  0x5d   :  { %371 = vmatprep.mubr.f32.mxu0 %v6561_v3 }
  0x60   :  { %4764 = vmatmul.mubr.msk.f32.gmra.mrb[42].mxu0 %vm96_vm0, %v6870_v49 }
  0x61   :  { %377 = vmatprep.mubr.f32.mxu0 %v6561_v3 }
  0x64   :  { %4765 = vmatmul.mubr.msk.f32.gmra.mrb[44].mxu0 %vm96_vm0, %v6878_v50 }
  0x65   :  { %383 = vmatprep.mubr.f32.mxu0 %v6561_v3 }
  0x68   :  { %4766 = vmatmul.mubr.msk.f32.gmra.mrb[46].mxu0 %vm96_vm0, %v6886_v51 }
  0x69   :  { %389 = vmatprep.mubr.f32.mxu0 %v6561_v3 }
  0x6c   :  { %4767 = vmatmul.mubr.msk.f32.gmra.mrb[48].mxu0 %vm96_vm0, %v6894_v52 }
  0x6d   :  { %395 = vmatprep.mubr.f32.mxu0 %v6561_v3 }
  0x70   :  { %4768 = vmatmul.mubr.msk.f32.gmra.mrb[50].mxu0 %vm96_vm0, %v6902_v53 }
  0x71   :  { %401 = vmatprep.mubr.f32.mxu0 %v6561_v3 }
  0x74   :  { %4769 = vmatmul.mubr.msk.f32.gmra.mrb[52].mxu0 %vm96_vm0, %v6910_v54 }
  0x75   :  { %407 = vmatprep.mubr.f32.mxu0 %v6561_v3 }
  0x78   :  { %4770 = vmatmul.mubr.msk.f32.gmra.mrb[54].mxu0 %vm96_vm0, %v6918_v55 }
  0x79   :  { %481 = vmatprep.mubr.f32.mxu0 %v6561_v3 }
  0x7c   :  { %4771 = vmatmul.mubr.msk.f32.vlgmr.msra.gmra.mrb[0].mxu0 %vm96_vm0, %v50_v60  ;;  %v2316_v60 = vld [vmem:[%s8613_s3 + $0x20] sm:$0xff] }
  0x7d   :  { %487 = vmatprep.mubr.f32.mxu0 %v6561_v3  ;;  %5581 = vmatpush1.bf16.msra.mxu0 %v5580_v61  ;;  %v2317_v61 = vld [vmem:[%s8613_s3 + $0x28] sm:$0xff] }
  0x7e   :  { %5583 = vmatprep.subr.bf16.mxu0 %v5582_v62  ;;  %v5609_v62 = vpack.c.bf16 %v2317_v61, %v2316_v60 }
  0x80   :  { %4772 = vmatmul.mubr.msk.f32.gmra.mrb[2].mxu0 %vm96_vm0, %v6684_v18  ;;  %v7141_v18 = vld [vmem:[%s8612_s0 + $0xe8] sm:$0xff] }
  0x81   :  { %493 = vmatprep.mubr.f32.mxu0 %v6561_v3  ;;  %5585 = vmatpush1.bf16.msra.mxu0 %v5584_v4 }
  0x82   :  { %5587 = vmatprep.subr.bf16.mxu0 %v5586_v5 }
  0x84   :  { %4773 = vmatmul.mubr.msk.f32.gmra.mrb[4].mxu0 %vm96_vm0, %v6704_v25 }
  0x85   :  { %499 = vmatprep.mubr.f32.mxu0 %v6561_v3 }
  0x88   :  { %4774 = vmatmul.mubr.msk.f32.gmra.mrb[6].mxu0 %vm96_vm0, %v6718_v29 }
  0x89   :  { %505 = vmatprep.mubr.f32.mxu0 %v6561_v3 }
  0x8c   :  { %4775 = vmatmul.mubr.msk.f32.gmra.mrb[8].mxu0 %vm96_vm0, %v6726_v31 }
  0x8d   :  { %511 = vmatprep.mubr.f32.mxu0 %v6561_v3 }
  0x90   :  { %4776 = vmatmul.mubr.msk.f32.gmra.mrb[10].mxu0 %vm96_vm0, %v6734_v32 }
  0x91   :  { %517 = vmatprep.mubr.f32.mxu0 %v6561_v3 }
  0x94   :  { %4777 = vmatmul.mubr.msk.f32.gmra.mrb[12].mxu0 %vm96_vm0, %v6742_v33 }
  0x95   :  { %523 = vmatprep.mubr.f32.mxu0 %v6561_v3 }
  0x98   :  { %4778 = vmatmul.mubr.msk.f32.gmra.mrb[14].mxu0 %vm96_vm0, %v6750_v34 }
  0x99   :  { %529 = vmatprep.mubr.f32.mxu0 %v6561_v3 }
  0x9c   :  { %4779 = vmatmul.mubr.msk.f32.gmra.mrb[16].mxu0 %vm96_vm0, %v6758_v35 }
  0x9d   :  { %535 = vmatprep.mubr.f32.mxu0 %v6561_v3 }
  0xa0   :  { %4780 = vmatmul.mubr.msk.f32.gmra.mrb[18].mxu0 %vm96_vm0, %v6766_v36 }
  0xa1   :  { %541 = vmatprep.mubr.f32.mxu0 %v6561_v3 }
  0xa4   :  { %4781 = vmatmul.mubr.msk.f32.gmra.mrb[20].mxu0 %vm96_vm0, %v6774_v37 }
  0xa5   :  { %547 = vmatprep.mubr.f32.mxu0 %v6561_v3 }
  0xa8   :  { %4782 = vmatmul.mubr.msk.f32.gmra.mrb[22].mxu0 %vm96_vm0, %v6782_v38 }
  0xa9   :  { %553 = vmatprep.mubr.f32.mxu0 %v6561_v3 }
  0xac   :  { %4783 = vmatmul.mubr.msk.f32.gmra.mrb[24].mxu0 %vm96_vm0, %v6790_v39 }
  0xad   :  { %559 = vmatprep.mubr.f32.mxu0 %v6561_v3 }
  0xb0   :  { %4784 = vmatmul.mubr.msk.f32.gmra.mrb[26].mxu0 %vm96_vm0, %v6798_v40 }
  0xb1   :  { %565 = vmatprep.mubr.f32.mxu0 %v6561_v3 }
  0xb4   :  { %4785 = vmatmul.mubr.msk.f32.gmra.mrb[28].mxu0 %vm96_vm0, %v6806_v41 }
  0xb5   :  { %571 = vmatprep.mubr.f32.mxu0 %v6561_v3 }
  0xb8   :  { %4786 = vmatmul.mubr.msk.f32.gmra.mrb[30].mxu0 %vm96_vm0, %v6814_v42 }
  0xb9   :  { %577 = vmatprep.mubr.f32.mxu0 %v6561_v3 }
  0xbc   :  { %4787 = vmatmul.mubr.msk.f32.gmra.mrb[32].mxu0 %vm96_vm0, %v6822_v43 }
  0xbd   :  { %583 = vmatprep.mubr.f32.mxu0 %v6561_v3 }
  0xc0   :  { %4788 = vmatmul.mubr.msk.f32.gmra.mrb[34].mxu0 %vm96_vm0, %v6830_v44 }
  0xc1   :  { %589 = vmatprep.mubr.f32.mxu0 %v6561_v3 }
  0xc4   :  { %4789 = vmatmul.mubr.msk.f32.gmra.mrb[36].mxu0 %vm96_vm0, %v6838_v45 }
  0xc5   :  { %595 = vmatprep.mubr.f32.mxu0 %v6561_v3 }
  0xc8   :  { %4790 = vmatmul.mubr.msk.f32.gmra.mrb[38].mxu0 %vm96_vm0, %v6846_v46 }
  0xc9   :  { %601 = vmatprep.mubr.f32.mxu0 %v6561_v3 }
  0xcc   :  { %4791 = vmatmul.mubr.msk.f32.gmra.mrb[40].mxu0 %vm96_vm0, %v6854_v47 }
  0xcd   :  { %607 = vmatprep.mubr.f32.mxu0 %v6561_v3 }
  0xd0   :  { %4792 = vmatmul.mubr.msk.f32.gmra.mrb[42].mxu0 %vm96_vm0, %v6862_v48 }
  0xd1   :  { %613 = vmatprep.mubr.f32.mxu0 %v6561_v3 }
  0xd4   :  { %4793 = vmatmul.mubr.msk.f32.gmra.mrb[44].mxu0 %vm96_vm0, %v6870_v49 }
  0xd5   :  { %619 = vmatprep.mubr.f32.mxu0 %v6561_v3 }
  0xd8   :  { %4794 = vmatmul.mubr.msk.f32.gmra.mrb[46].mxu0 %vm96_vm0, %v6878_v50 }
  0xd9   :  { %625 = vmatprep.mubr.f32.mxu0 %v6561_v3 }
  0xdc   :  { %4795 = vmatmul.mubr.msk.f32.gmra.mrb[48].mxu0 %vm96_vm0, %v6886_v51 }
  0xdd   :  { %631 = vmatprep.mubr.f32.mxu0 %v6561_v3 }
  0xe0   :  { %4796 = vmatmul.mubr.msk.f32.gmra.mrb[50].mxu0 %vm96_vm0, %v6894_v52 }
  0xe1   :  { %637 = vmatprep.mubr.f32.mxu0 %v6561_v3 }
  0xe4   :  { %4797 = vmatmul.mubr.msk.f32.gmra.mrb[52].mxu0 %vm96_vm0, %v6902_v53 }
  0xe5   :  { %643 = vmatprep.mubr.f32.mxu0 %v6561_v3 }
  0xe8   :  { %4798 = vmatmul.mubr.msk.f32.gmra.mrb[54].mxu0 %vm96_vm0, %v6910_v54 }
  0xe9   :  { %835 = vmatprep.mubr.f32.mxu0 %v6561_v3 }
  0xec   :  { %4807 = vmatmul.mubr.msk.f32.vlgmr.msra.gmra.mrb[0].mxu0 %vm96_vm0, %v6704_v25  ;;  %v4875_v25 = vld [vmem:[%s8611_s1 + $0x120] sm:$0xff] }
  0xed   :  { %841 = vmatprep.mubr.f32.mxu0 %v6561_v3  ;;  %5589 = vmatpush1.bf16.msra.mxu0 %v5588_v10  ;;  %v5600_v27 = vpack.c.bf16 %v4877_v26, %v4875_v25 }
  0xee   :  { %5591 = vmatprep.subr.bf16.mxu0 %v5590_v11 }
  0xf0   :  { %4808 = vmatmul.mubr.msk.f32.gmra.mrb[2].mxu0 %vm96_vm0, %v6718_v29 }
  0xf1   :  { %847 = vmatprep.mubr.f32.mxu0 %v6561_v3  ;;  %5593 = vmatpush1.bf16.msra.mxu0 %v5592_v16 }
  0xf2   :  { %5595 = vmatprep.subr.bf16.mxu0 %v5594_v17 }
  0xf4   :  { %4809 = vmatmul.mubr.msk.f32.gmra.mrb[4].mxu0 %vm96_vm0, %v6726_v31 }
  0xf5   :  { %853 = vmatprep.mubr.f32.mxu0 %v6561_v3 }
  0xf8   :  { %4810 = vmatmul.mubr.msk.f32.gmra.mrb[6].mxu0 %vm96_vm0, %v6734_v32 }
  0xf9   :  { %859 = vmatprep.mubr.f32.mxu0 %v6561_v3 }
  0xfc   :  { %4811 = vmatmul.mubr.msk.f32.gmra.mrb[8].mxu0 %vm96_vm0, %v6742_v33 }
  0xfd   :  { %865 = vmatprep.mubr.f32.mxu0 %v6561_v3 }
 0x100   :  { %4812 = vmatmul.mubr.msk.f32.gmra.mrb[10].mxu0 %vm96_vm0, %v6750_v34 }
 0x101   :  { %871 = vmatprep.mubr.f32.mxu0 %v6561_v3 }
 0x104   :  { %4813 = vmatmul.mubr.msk.f32.gmra.mrb[12].mxu0 %vm96_vm0, %v6758_v35 }
 0x105   :  { %877 = vmatprep.mubr.f32.mxu0 %v6561_v3 }
 0x108   :  { %4814 = vmatmul.mubr.msk.f32.gmra.mrb[14].mxu0 %vm96_vm0, %v6766_v36 }
 0x109   :  { %883 = vmatprep.mubr.f32.mxu0 %v6561_v3 }
 0x10c   :  { %4815 = vmatmul.mubr.msk.f32.gmra.mrb[16].mxu0 %vm96_vm0, %v6774_v37 }
 0x10d   :  { %889 = vmatprep.mubr.f32.mxu0 %v6561_v3 }
 0x110   :  { %4816 = vmatmul.mubr.msk.f32.gmra.mrb[18].mxu0 %vm96_vm0, %v6782_v38 }
 0x111   :  { %895 = vmatprep.mubr.f32.mxu0 %v6561_v3 }
 0x114   :  { %4817 = vmatmul.mubr.msk.f32.gmra.mrb[20].mxu0 %vm96_vm0, %v6790_v39 }
 0x115   :  { %901 = vmatprep.mubr.f32.mxu0 %v6561_v3 }
 0x118   :  { %4818 = vmatmul.mubr.msk.f32.gmra.mrb[22].mxu0 %vm96_vm0, %v6798_v40 }
 0x119   :  { %907 = vmatprep.mubr.f32.mxu0 %v6561_v3 }
 0x11c   :  { %4819 = vmatmul.mubr.msk.f32.gmra.mrb[24].mxu0 %vm96_vm0, %v6806_v41 }
 0x11d   :  { %913 = vmatprep.mubr.f32.mxu0 %v6561_v3 }
 0x120   :  { %4820 = vmatmul.mubr.msk.f32.gmra.mrb[26].mxu0 %vm96_vm0, %v6814_v42 }
 0x121   :  { %919 = vmatprep.mubr.f32.mxu0 %v6561_v3 }
 0x124   :  { %4821 = vmatmul.mubr.msk.f32.gmra.mrb[28].mxu0 %vm96_vm0, %v6822_v43 }
 0x125   :  { %925 = vmatprep.mubr.f32.mxu0 %v6561_v3 }
 0x128   :  { %4822 = vmatmul.mubr.msk.f32.gmra.mrb[30].mxu0 %vm96_vm0, %v6830_v44 }
 0x129   :  { %931 = vmatprep.mubr.f32.mxu0 %v6561_v3 }
 0x12c   :  { %4823 = vmatmul.mubr.msk.f32.gmra.mrb[32].mxu0 %vm96_vm0, %v6838_v45 }
 0x12d   :  { %937 = vmatprep.mubr.f32.mxu0 %v6561_v3 }
 0x130   :  { %4824 = vmatmul.mubr.msk.f32.gmra.mrb[34].mxu0 %vm96_vm0, %v6846_v46 }
 0x131   :  { %943 = vmatprep.mubr.f32.mxu0 %v6561_v3 }
 0x134   :  { %4825 = vmatmul.mubr.msk.f32.gmra.mrb[36].mxu0 %vm96_vm0, %v6854_v47 }
 0x135   :  { %949 = vmatprep.mubr.f32.mxu0 %v6561_v3 }
 0x138   :  { %4826 = vmatmul.mubr.msk.f32.gmra.mrb[38].mxu0 %vm96_vm0, %v6862_v48 }
 0x139   :  { %955 = vmatprep.mubr.f32.mxu0 %v6561_v3 }
 0x13c   :  { %4827 = vmatmul.mubr.msk.f32.gmra.mrb[40].mxu0 %vm96_vm0, %v6870_v49 }
 0x13d   :  { %961 = vmatprep.mubr.f32.mxu0 %v6561_v3 }
 0x140   :  { %4828 = vmatmul.mubr.msk.f32.gmra.mrb[42].mxu0 %vm96_vm0, %v6878_v50 }
 0x141   :  { %967 = vmatprep.mubr.f32.mxu0 %v6561_v3 }
 0x144   :  { %4829 = vmatmul.mubr.msk.f32.gmra.mrb[44].mxu0 %vm96_vm0, %v6886_v51 }
 0x145   :  { %973 = vmatprep.mubr.f32.mxu0 %v6561_v3 }
 0x148   :  { %4830 = vmatmul.mubr.msk.f32.gmra.mrb[46].mxu0 %vm96_vm0, %v6894_v52 }
 0x149   :  { %979 = vmatprep.mubr.f32.mxu0 %v6561_v3 }
 0x14c   :  { %4831 = vmatmul.mubr.msk.f32.gmra.mrb[48].mxu0 %vm96_vm0, %v6902_v53 }
 0x14d   :  { %985 = vmatprep.mubr.f32.mxu0 %v6561_v3 }
 0x150   :  { %4832 = vmatmul.mubr.msk.f32.gmra.mrb[50].mxu0 %vm96_vm0, %v6910_v54 }
 0x151   :  { %991 = vmatprep.mubr.f32.mxu0 %v6561_v3 }
 0x154   :  { %4833 = vmatmul.mubr.msk.f32.gmra.mrb[52].mxu0 %vm96_vm0, %v6918_v55 }
 0x155   :  { %997 = vmatprep.mubr.f32.mxu0 %v6561_v3 }
 0x158   :  { %4834 = vmatmul.mubr.msk.f32.gmra.mrb[54].mxu0 %vm96_vm0, %v7141_v18 }
 0x159   :  { %1245 = vmatprep.mubr.f32.mxu0 %v6561_v3 }
 0x15c   :  { %4843 = vmatmul.mubr.msk.f32.vlgmr.msra.gmra.mrb[0].mxu0 %vm96_vm0, %v6718_v29  ;;  %v2312_v29 = vld [vmem:[%s8613_s3] sm:$0xff] }
 0x15d   :  { %1251 = vmatprep.mubr.f32.mxu0 %v6561_v3  ;;  %5597 = vmatpush1.bf16.msra.mxu0 %v5596_v23  ;;  %v5603_v57 = vpack.c.bf16 %v2313_v30, %v2312_v29 }
 0x15e   :  { %5599 = vmatprep.subr.bf16.mxu0 %v5598_v24 }
 0x15f   :  { %5604 = vmatpush1.bf16.msra.mxu1 %v5603_v57 }
 0x160   :  { %4844 = vmatmul.mubr.msk.f32.gmra.mrb[2].mxu0 %vm96_vm0, %v6726_v31  ;;  %5605 = vmatprep.subr.bf16.mxu1 %v6562_v28 }
 0x161   :  { %1257 = vmatprep.mubr.f32.mxu0 %v6561_v3  ;;  %5601 = vmatpush1.bf16.msra.mxu0 %v5600_v27 }
 0x162   :  { %5894 = vmatprep.subr.bf16.mxu0 %v6562_v28 }
 0x163   :  { %5607 = vmatpush1.bf16.msra.mxu1 %v5606_v59 }
 0x164   :  { %4845 = vmatmul.mubr.msk.f32.gmra.mrb[4].mxu0 %vm96_vm0, %v6734_v32  ;;  %5608 = vmatprep.subr.bf16.mxu1 %v6562_v28 }
 0x165   :  { %1263 = vmatprep.mubr.f32.mxu0 %v6561_v3 }
 0x167   :  { %5610 = vmatpush1.bf16.msra.mxu1 %v5609_v62 }
 0x168   :  { %4846 = vmatmul.mubr.msk.f32.gmra.mrb[6].mxu0 %vm96_vm0, %v6742_v33  ;;  %5611 = vmatprep.subr.bf16.mxu1 %v6562_v28 }
 0x169   :  { %1269 = vmatprep.mubr.f32.mxu0 %v6561_v3 }
 0x16c   :  { %4847 = vmatmul.mubr.msk.f32.gmra.mrb[8].mxu0 %vm96_vm0, %v6750_v34 }
 0x16d   :  { %1275 = vmatprep.mubr.f32.mxu0 %v6561_v3 }
 0x170   :  { %4848 = vmatmul.mubr.msk.f32.gmra.mrb[10].mxu0 %vm96_vm0, %v6758_v35 }
 0x171   :  { %1281 = vmatprep.mubr.f32.mxu0 %v6561_v3 }
 0x174   :  { %4849 = vmatmul.mubr.msk.f32.gmra.mrb[12].mxu0 %vm96_vm0, %v6766_v36 }
 0x175   :  { %1287 = vmatprep.mubr.f32.mxu0 %v6561_v3 }
 0x178   :  { %4850 = vmatmul.mubr.msk.f32.gmra.mrb[14].mxu0 %vm96_vm0, %v6774_v37 }
 0x179   :  { %1293 = vmatprep.mubr.f32.mxu0 %v6561_v3 }
 0x17c   :  { %4851 = vmatmul.mubr.msk.f32.gmra.mrb[16].mxu0 %vm96_vm0, %v6782_v38 }
 0x17d   :  { %1299 = vmatprep.mubr.f32.mxu0 %v6561_v3 }
 0x180   :  { %4852 = vmatmul.mubr.msk.f32.gmra.mrb[18].mxu0 %vm96_vm0, %v6790_v39 }
 0x181   :  { %1305 = vmatprep.mubr.f32.mxu0 %v6561_v3 }
 0x184   :  { %4853 = vmatmul.mubr.msk.f32.gmra.mrb[20].mxu0 %vm96_vm0, %v6798_v40 }
 0x185   :  { %1311 = vmatprep.mubr.f32.mxu0 %v6561_v3 }
 0x188   :  { %4854 = vmatmul.mubr.msk.f32.gmra.mrb[22].mxu0 %vm96_vm0, %v6806_v41 }
 0x189   :  { %1317 = vmatprep.mubr.f32.mxu0 %v6561_v3 }
 0x18c   :  { %4855 = vmatmul.mubr.msk.f32.gmra.mrb[24].mxu0 %vm96_vm0, %v6814_v42 }
 0x18d   :  { %1323 = vmatprep.mubr.f32.mxu0 %v6561_v3 }
 0x190   :  { %4856 = vmatmul.mubr.msk.f32.gmra.mrb[26].mxu0 %vm96_vm0, %v6822_v43 }
 0x191   :  { %1329 = vmatprep.mubr.f32.mxu0 %v6561_v3 }
 0x194   :  { %4857 = vmatmul.mubr.msk.f32.gmra.mrb[28].mxu0 %vm96_vm0, %v6830_v44 }
 0x195   :  { %1335 = vmatprep.mubr.f32.mxu0 %v6561_v3 }
 0x198   :  { %4858 = vmatmul.mubr.msk.f32.gmra.mrb[30].mxu0 %vm96_vm0, %v6838_v45 }
 0x199   :  { %1341 = vmatprep.mubr.f32.mxu0 %v6561_v3 }
 0x19c   :  { %4859 = vmatmul.mubr.msk.f32.gmra.mrb[32].mxu0 %vm96_vm0, %v6846_v46 }
 0x19d   :  { %1347 = vmatprep.mubr.f32.mxu0 %v6561_v3 }
 0x1a0   :  { %4860 = vmatmul.mubr.msk.f32.gmra.mrb[34].mxu0 %vm96_vm0, %v6854_v47 }
 0x1a1   :  { %1353 = vmatprep.mubr.f32.mxu0 %v6561_v3 }
 0x1a4   :  { %4861 = vmatmul.mubr.msk.f32.gmra.mrb[36].mxu0 %vm96_vm0, %v6862_v48 }
 0x1a5   :  { %1359 = vmatprep.mubr.f32.mxu0 %v6561_v3 }
 0x1a8   :  { %4862 = vmatmul.mubr.msk.f32.gmra.mrb[38].mxu0 %vm96_vm0, %v6870_v49 }
 0x1a9   :  { %1365 = vmatprep.mubr.f32.mxu0 %v6561_v3 }
 0x1ac   :  { %4863 = vmatmul.mubr.msk.f32.gmra.mrb[40].mxu0 %vm96_vm0, %v6878_v50 }
 0x1ad   :  { %1371 = vmatprep.mubr.f32.mxu0 %v6561_v3 }
 0x1b0   :  { %4864 = vmatmul.mubr.msk.f32.gmra.mrb[42].mxu0 %vm96_vm0, %v6886_v51 }
 0x1b1   :  { %1377 = vmatprep.mubr.f32.mxu0 %v6561_v3 }
 0x1b4   :  { %4865 = vmatmul.mubr.msk.f32.gmra.mrb[44].mxu0 %vm96_vm0, %v6894_v52 }
 0x1b5   :  { %1383 = vmatprep.mubr.f32.mxu0 %v6561_v3 }
 0x1b8   :  { %4866 = vmatmul.mubr.msk.f32.gmra.mrb[46].mxu0 %vm96_vm0, %v6902_v53 }
 0x1b9   :  { %1389 = vmatprep.mubr.f32.mxu0 %v6561_v3 }
 0x1bc   :  { %4867 = vmatmul.mubr.msk.f32.gmra.mrb[48].mxu0 %vm96_vm0, %v6910_v54 }
 0x1bd   :  { %1395 = vmatprep.mubr.f32.mxu0 %v6561_v3 }
 0x1c0   :  { %4868 = vmatmul.mubr.msk.f32.gmra.mrb[50].mxu0 %vm96_vm0, %v6918_v55 }
 0x1c1   :  { %1401 = vmatprep.mubr.f32.mxu0 %v6561_v3 }
 0x1c4   :  { %4869 = vmatmul.mubr.msk.f32.gmra.mrb[52].mxu0 %vm96_vm0, %v7141_v18 }
 0x1c5   :  { %1407 = vmatprep.mubr.f32.mxu0 %v6561_v3 }
 0x1c8   :  { %4870 = vmatmul.mubr.msk.f32.gmra.mrb[54].mxu0 %vm96_vm0, %v7270_v63 }
 0x1c9   :  { %1655 = vmatprep.mubr.f32.mxu0 %v6561_v3 }
 0x1cc   :  { %4879 = vmatmul.mubr.msk.f32.vlgmr.msra.gmra.mrb[0].mxu0 %vm96_vm0, %v6726_v31  ;;  %v2318_v31 = vld [vmem:[%s8613_s3 + $0x30] sm:$0xff] }
 0x1cd   :  { %1661 = vmatprep.mubr.f32.mxu0 %v6561_v3 }
 0x1d0   :  { %4880 = vmatmul.mubr.msk.f32.gmra.mrb[2].mxu0 %vm96_vm0, %v6734_v32  ;;  %v2319_v32 = vld [vmem:[%s8613_s3 + $0x38] sm:$0xff] }
 0x1d1   :  { %1667 = vmatprep.mubr.f32.mxu0 %v6561_v3 }
 0x1d4   :  { %4881 = vmatmul.mubr.msk.f32.gmra.mrb[4].mxu0 %vm96_vm0, %v6742_v33  ;;  %v5612_v33 = vpack.c.bf16 %v2319_v32, %v2318_v31 }
 0x1d5   :  { %1673 = vmatprep.mubr.f32.mxu0 %v6561_v3 }
 0x1d6   :  { %5613 = vmatpush1.bf16.msra.mxu1 %v5612_v33 }
 0x1d7   :  { %5614 = vmatprep.subr.bf16.mxu1 %v6562_v28 }
 0x1d8   :  { %4882 = vmatmul.mubr.msk.f32.gmra.mrb[6].mxu0 %vm96_vm0, %v6750_v34  ;;  %v2320_v34 = vld [vmem:[%s8613_s3 + $0x40] sm:$0xff] }
 0x1d9   :  { %1679 = vmatprep.mubr.f32.mxu0 %v6561_v3 }
 0x1dc   :  { %4883 = vmatmul.mubr.msk.f32.gmra.mrb[8].mxu0 %vm96_vm0, %v6758_v35  ;;  %v2321_v35 = vld [vmem:[%s8613_s3 + $0x48] sm:$0xff] }
 0x1dd   :  { %1685 = vmatprep.mubr.f32.mxu0 %v6561_v3 }
 0x1e0   :  { %4884 = vmatmul.mubr.msk.f32.gmra.mrb[10].mxu0 %vm96_vm0, %v6766_v36  ;;  %v5615_v36 = vpack.c.bf16 %v2321_v35, %v2320_v34 }
 0x1e1   :  { %1691 = vmatprep.mubr.f32.mxu0 %v6561_v3 }
 0x1e2   :  { %5616 = vmatpush1.bf16.msra.mxu1 %v5615_v36 }
 0x1e3   :  { %5617 = vmatprep.subr.bf16.mxu1 %v6562_v28 }
 0x1e4   :  { %4885 = vmatmul.mubr.msk.f32.gmra.mrb[12].mxu0 %vm96_vm0, %v6774_v37  ;;  %v2322_v37 = vld [vmem:[%s8613_s3 + $0x50] sm:$0xff] }
 0x1e5   :  { %1697 = vmatprep.mubr.f32.mxu0 %v6561_v3 }
 0x1e8   :  { %4886 = vmatmul.mubr.msk.f32.gmra.mrb[14].mxu0 %vm96_vm0, %v6782_v38  ;;  %v2323_v38 = vld [vmem:[%s8613_s3 + $0x58] sm:$0xff] }
 0x1e9   :  { %1703 = vmatprep.mubr.f32.mxu0 %v6561_v3 }
 0x1ec   :  { %4887 = vmatmul.mubr.msk.f32.gmra.mrb[16].mxu0 %vm96_vm0, %v6790_v39  ;;  %v5618_v39 = vpack.c.bf16 %v2323_v38, %v2322_v37 }
 0x1ed   :  { %1709 = vmatprep.mubr.f32.mxu0 %v6561_v3 }
 0x1ee   :  { %5619 = vmatpush1.bf16.msra.mxu1 %v5618_v39 }
 0x1ef   :  { %5620 = vmatprep.subr.bf16.mxu1 %v6562_v28 }
 0x1f0   :  { %4888 = vmatmul.mubr.msk.f32.gmra.mrb[18].mxu0 %vm96_vm0, %v6798_v40  ;;  %v2324_v40 = vld [vmem:[%s8613_s3 + $0x60] sm:$0xff] }
 0x1f1   :  { %1715 = vmatprep.mubr.f32.mxu0 %v6561_v3 }
 0x1f4   :  { %4889 = vmatmul.mubr.msk.f32.gmra.mrb[20].mxu0 %vm96_vm0, %v6806_v41  ;;  %v2325_v41 = vld [vmem:[%s8613_s3 + $0x68] sm:$0xff] }
 0x1f5   :  { %1721 = vmatprep.mubr.f32.mxu0 %v6561_v3 }
 0x1f8   :  { %4890 = vmatmul.mubr.msk.f32.gmra.mrb[22].mxu0 %vm96_vm0, %v6814_v42  ;;  %v5621_v42 = vpack.c.bf16 %v2325_v41, %v2324_v40 }
 0x1f9   :  { %1727 = vmatprep.mubr.f32.mxu0 %v6561_v3 }
 0x1fa   :  { %5622 = vmatpush1.bf16.msra.mxu1 %v5621_v42 }
 0x1fb   :  { %5623 = vmatprep.subr.bf16.mxu1 %v6562_v28 }
 0x1fc   :  { %4891 = vmatmul.mubr.msk.f32.gmra.mrb[24].mxu0 %vm96_vm0, %v6822_v43  ;;  %v2326_v43 = vld [vmem:[%s8613_s3 + $0x70] sm:$0xff] }
 0x1fd   :  { %1733 = vmatprep.mubr.f32.mxu0 %v6561_v3 }
 0x200   :  { %4892 = vmatmul.mubr.msk.f32.gmra.mrb[26].mxu0 %vm96_vm0, %v6830_v44  ;;  %v2327_v44 = vld [vmem:[%s8613_s3 + $0x78] sm:$0xff] }
 0x201   :  { %1739 = vmatprep.mubr.f32.mxu0 %v6561_v3 }
 0x204   :  { %4893 = vmatmul.mubr.msk.f32.gmra.mrb[28].mxu0 %vm96_vm0, %v6838_v45  ;;  %v5624_v45 = vpack.c.bf16 %v2327_v44, %v2326_v43 }
 0x205   :  { %1745 = vmatprep.mubr.f32.mxu0 %v6561_v3 }
 0x206   :  { %5625 = vmatpush1.bf16.msra.mxu1 %v5624_v45 }
 0x207   :  { %5626 = vmatprep.subr.bf16.mxu1 %v6562_v28 }
 0x208   :  { %4894 = vmatmul.mubr.msk.f32.gmra.mrb[30].mxu0 %vm96_vm0, %v6846_v46  ;;  %v2328_v46 = vld [vmem:[%s8613_s3 + $0x80] sm:$0xff] }
 0x209   :  { %1751 = vmatprep.mubr.f32.mxu0 %v6561_v3 }
 0x20c   :  { %4895 = vmatmul.mubr.msk.f32.gmra.mrb[32].mxu0 %vm96_vm0, %v6854_v47  ;;  %v2329_v47 = vld [vmem:[%s8613_s3 + $0x88] sm:$0xff] }
 0x20d   :  { %1757 = vmatprep.mubr.f32.mxu0 %v6561_v3 }
 0x210   :  { %4896 = vmatmul.mubr.msk.f32.gmra.mrb[34].mxu0 %vm96_vm0, %v6862_v48  ;;  %v1497_v48 = vld [vmem:[%s8612_s0 + $0xf8] sm:$0xff] }
 0x211   :  { %1763 = vmatprep.mubr.f32.mxu0 %v6561_v3 }
 0x214   :  { %4897 = vmatmul.mubr.msk.f32.gmra.mrb[36].mxu0 %vm96_vm0, %v6870_v49  ;;  %v5627_v49 = vpack.c.bf16 %v2329_v47, %v2328_v46 }
 0x215   :  { %1769 = vmatprep.mubr.f32.mxu0 %v6561_v3 }
 0x216   :  { %5628 = vmatpush1.bf16.msra.mxu1 %v5627_v49 }
 0x217   :  { %5629 = vmatprep.subr.bf16.mxu1 %v6562_v28 }
 0x218   :  { %4898 = vmatmul.mubr.msk.f32.gmra.mrb[38].mxu0 %vm96_vm0, %v6878_v50  ;;  %v2330_v50 = vld [vmem:[%s8613_s3 + $0x90] sm:$0xff] }
 0x219   :  { %1775 = vmatprep.mubr.f32.mxu0 %v6561_v3 }
 0x21c   :  { %4899 = vmatmul.mubr.msk.f32.gmra.mrb[40].mxu0 %vm96_vm0, %v6886_v51  ;;  %v2331_v51 = vld [vmem:[%s8613_s3 + $0x98] sm:$0xff] }
 0x21d   :  { %1781 = vmatprep.mubr.f32.mxu0 %v6561_v3 }
 0x220   :  { %4900 = vmatmul.mubr.msk.f32.gmra.mrb[42].mxu0 %vm96_vm0, %v6894_v52  ;;  %v5630_v52 = vpack.c.bf16 %v2331_v51, %v2330_v50 }
 0x221   :  { %1787 = vmatprep.mubr.f32.mxu0 %v6561_v3 }
 0x222   :  { %5631 = vmatpush1.bf16.msra.mxu1 %v5630_v52 }
 0x223   :  { %2458 = vmatprep.subr.mxu1 %v6561_v3 }
 0x224   :  { %4901 = vmatmul.mubr.msk.f32.gmra.mrb[44].mxu0 %vm96_vm0, %v6902_v53  ;;  %v2332_v53 = vld [vmem:[%s8613_s3 + $0xa0] sm:$0xff] }
 0x225   :  { %1793 = vmatprep.mubr.f32.mxu0 %v6561_v3 }
 0x226   :  { %2459 = vmatpush1.msra.mxu1 %v2332_v53 }
 0x227   :  { %5632 = vmatprep.subr.bf16.mxu1 %v6562_v28 }
 0x228   :  { %4902 = vmatmul.mubr.msk.f32.gmra.mrb[46].mxu0 %vm96_vm0, %v6910_v54  ;;  %v1882_v54 = vlaneseq }
 0x229   :  { %1799 = vmatprep.mubr.f32.mxu0 %v6561_v3 }
 0x22c   :  { %4903 = vmatmul.mubr.msk.f32.gmra.mrb[48].mxu0 %vm96_vm0, %v6918_v55  ;;  %v7414_v55 = vshrl.u32 %v1882_v54, 7 }
 0x22d   :  { %1805 = vmatprep.mubr.f32.mxu0 %v6561_v3 }
 0x22e   :  { %v1884_v0 = vsub.s32 0, %v7414_v55  ;;  %v1888_v2 = vsub.s32 1, %v7414_v55 }
 0x230   :  { %4904 = vmatmul.mubr.msk.f32.gmra.mrb[50].mxu0 %vm96_vm0, %v7141_v18  ;;  %v7423_v4 = vrot.slane %v1880_v1, %v1884_v0  ;;  %v7427_v5 = vrot.slane %v1880_v1, %v1888_v2 }
 0x231   :  { %1811 = vmatprep.mubr.f32.mxu0 %v6561_v3 }
 0x234   :  { %4905 = vmatmul.mubr.msk.f32.gmra.mrb[52].mxu0 %vm96_vm0, %v7270_v63 }
 0x235   :  { %1817 = vmatprep.mubr.f32.mxu0 %v6561_v3 }
 0x238   :  { %4906 = vmatmul.mubr.msk.f32.gmra.mrb[54].mxu0 %vm96_vm0, %v1497_v48 }
 0x239   :  { %5524 = vmatprep.mubr.msk.f32.mxu0 %vm6563_vm5, %v6561_v3 }
 0x29f   :  { %v1657_v6 = vpop.f32.mrb[0].mxu0 }
 0x2a0   :  { %v1892_v7 = vadd.f32 %v7423_v4, %v1657_v6  ;;  %v1659_v8 = vpop.f32.mrb[1].mxu0 }
 0x2a1   :  { %v1893_v9 = vadd.f32 %v7427_v5, %v1659_v8 }
 0x2a2   :  { %v4907_v10 = vmul.f32 -1.442695, %v1892_v7 }
 0x2a3   :  { %v4908_v11 = vmul.f32 -1.442695, %v1893_v9  ;;  %v1663_v12 = vpop.f32.mrb[2].mxu0 }
 0x2a4   :  { %6249 = vpow2.f32 %v4907_v10  ;;  %v1894_v13 = vadd.f32 %v7423_v4, %v1663_v12  ;;  %v1665_v14 = vpop.f32.mrb[3].mxu0 }
 0x2a5   :  { %6251 = vpow2.f32 %v4908_v11  ;;  %v1895_v15 = vadd.f32 %v7427_v5, %v1665_v14 }
 0x2a6   :  { %v4909_v16 = vmul.f32 -1.442695, %v1894_v13 }
 0x2a7   :  { %v4910_v17 = vmul.f32 -1.442695, %v1895_v15  ;;  %v1669_v18 = vpop.f32.mrb[4].mxu0 }
 0x2a8   :  { %6253 = vpow2.f32 %v4909_v16  ;;  %v1896_v19 = vadd.f32 %v7423_v4, %v1669_v18  ;;  %v1671_v20 = vpop.f32.mrb[5].mxu0 }
 0x2a9   :  { %6255 = vpow2.f32 %v4910_v17  ;;  %v1897_v21 = vadd.f32 %v7427_v5, %v1671_v20 }
 0x2aa   :  { %v4911_v22 = vmul.f32 -1.442695, %v1896_v19 }
 0x2ab   :  { %v4912_v23 = vmul.f32 -1.442695, %v1897_v21  ;;  %v1675_v24 = vpop.f32.mrb[6].mxu0 }
 0x2ac   :  { %6257 = vpow2.f32 %v4911_v22  ;;  %v1898_v25 = vadd.f32 %v7423_v4, %v1675_v24  ;;  %v1677_v26 = vpop.f32.mrb[7].mxu0 }
 0x2ad   :  { %6259 = vpow2.f32 %v4912_v23  ;;  %v1899_v27 = vadd.f32 %v7427_v5, %v1677_v26 }
 0x2ae   :  { %v6250_v29 = vpop.eup %6249  ;;  %v4913_v30 = vmul.f32 -1.442695, %v1898_v25 }
 0x2af   :  { %v6252_v56 = vpop.eup %6251  ;;  %v2116_v57 = vadd.f32 1.0, %v6250_v29  ;;  %v4914_v58 = vmul.f32 -1.442695, %v1899_v27  ;;  %v1681_v59 = vpop.f32.mrb[8].mxu0 }
 0x2b0   :  { %v2117_v60 = vadd.f32 1.0, %v6252_v56  ;;  %6261 = vpow2.f32 %v4913_v30  ;;  %v1900_v61 = vadd.f32 %v7423_v4, %v1681_v59  ;;  %v1683_v62 = vpop.f32.mrb[9].mxu0 }
 0x2b1   :  { %6263 = vrcp.f32 %v2116_v57  ;;  %v1901_v63 = vadd.f32 %v7427_v5, %v1683_v62 }
 0x2b2   :  { %v6254_v31 = vpop.eup %6253  ;;  %6265 = vrcp.f32 %v2117_v60  ;;  %v4915_v32 = vmul.f32 -1.442695, %v1900_v61 }
 0x2b3   :  { %v6256_v33 = vpop.eup %6255  ;;  %v2118_v34 = vadd.f32 1.0, %v6254_v31  ;;  %6267 = vpow2.f32 %v4914_v58  ;;  %v4916_v35 = vmul.f32 -1.442695, %v1901_v63  ;;  %v1687_v36 = vpop.f32.mrb[10].mxu0 }
 0x2b4   :  { %v2119_v37 = vadd.f32 1.0, %v6256_v33  ;;  %6269 = vpow2.f32 %v4915_v32  ;;  %v1902_v38 = vadd.f32 %v7423_v4, %v1687_v36  ;;  %v1689_v39 = vpop.f32.mrb[11].mxu0 }
 0x2b5   :  { %6271 = vrcp.f32 %v2118_v34  ;;  %v1903_v40 = vadd.f32 %v7427_v5, %v1689_v39 }
 0x2b6   :  { %v6258_v41 = vpop.eup %6257  ;;  %6273 = vrcp.f32 %v2119_v37  ;;  %v4917_v42 = vmul.f32 -1.442695, %v1902_v38 }
 0x2b7   :  { %v6260_v43 = vpop.eup %6259  ;;  %v2120_v44 = vadd.f32 1.0, %v6258_v41  ;;  %6275 = vpow2.f32 %v4916_v35  ;;  %v4918_v45 = vmul.f32 -1.442695, %v1903_v40  ;;  %v1693_v46 = vpop.f32.mrb[12].mxu0 }
 0x2b8   :  { %v2121_v47 = vadd.f32 1.0, %v6260_v43  ;;  %6277 = vpow2.f32 %v4917_v42  ;;  %v1904_v48 = vadd.f32 %v7423_v4, %v1693_v46  ;;  %v1695_v49 = vpop.f32.mrb[13].mxu0 }
 0x2b9   :  { %6279 = vrcp.f32 %v2120_v44  ;;  %v1905_v50 = vadd.f32 %v7427_v5, %v1695_v49 }
 0x2ba   :  { %v6262_v51 = vpop.eup %6261  ;;  %6281 = vrcp.f32 %v2121_v47  ;;  %v4919_v52 = vmul.f32 -1.442695, %v1904_v48 }
 0x2bb   :  { %v6264_v53 = vpop.eup %6263  ;;  %v2122_v54 = vadd.f32 1.0, %v6262_v51  ;;  %6283 = vpow2.f32 %v4918_v45  ;;  %v4920_v1 = vmul.f32 -1.442695, %v1905_v50  ;;  %v1699_v6 = vpop.f32.mrb[14].mxu0 }
 0x2bc   :  { %v6266_v7 = vpop.eup %6265  ;;  %6285 = vpow2.f32 %v4919_v52  ;;  %v1906_v8 = vadd.f32 %v7423_v4, %v1699_v6  ;;  %v1701_v9 = vpop.f32.mrb[15].mxu0 }
 0x2bd   :  { %v6268_v10 = vpop.eup %6267  ;;  %v1907_v11 = vadd.f32 %v7427_v5, %v1701_v9  ;;  %4963 = vmatprep.mubr.msk.f32.mxu1 %vm2333_vm1, %v6266_v7  ;;  %6287 = vpow2.f32 %v4920_v1 }
 0x2be   :  { %v6270_v12 = vpop.eup %6269  ;;  %v2123_v13 = vadd.f32 1.0, %v6268_v10  ;;  %v4921_v14 = vmul.f32 -1.442695, %v1906_v8  ;;  %2483 = vmatmul.mubr.f32.vlgmr.msra.gmra.mrb[0].mxu1 %v6264_v53  ;;  %6289 = vrcp.f32 %v2122_v54 }
 0x2bf   :  { %v6272_v15 = vpop.eup %6271  ;;  %v2124_v16 = vadd.f32 1.0, %v6270_v12  ;;  %v4922_v17 = vmul.f32 -1.442695, %v1907_v11  ;;  %v1705_v18 = vpop.f32.mrb[16].mxu0 }
 0x2c0   :  { %v6274_v19 = vpop.eup %6273  ;;  %6291 = vrcp.f32 %v2123_v13  ;;  %v1908_v20 = vadd.f32 %v7423_v4, %v1705_v18  ;;  %v1707_v21 = vpop.f32.mrb[17].mxu0 }
 0x2c1   :  { %v6276_v22 = vpop.eup %6275  ;;  %6293 = vrcp.f32 %v2124_v16  ;;  %v1909_v23 = vadd.f32 %v7427_v5, %v1707_v21  ;;  %4964 = vmatprep.mubr.msk.f32.mxu1 %vm2333_vm1, %v6274_v19 }
 0x2c2   :  { %v6278_v24 = vpop.eup %6277  ;;  %v2125_v25 = vadd.f32 1.0, %v6276_v22  ;;  %6295 = vpow2.f32 %v4921_v14  ;;  %v4923_v26 = vmul.f32 -1.442695, %v1908_v20  ;;  %2488 = vmatmul.mubr.f32.gmra.mrb[2].mxu1 %v6272_v15 }
 0x2c3   :  { %v6280_v27 = vpop.eup %6279  ;;  %v2126_v29 = vadd.f32 1.0, %v6278_v24  ;;  %6297 = vpow2.f32 %v4922_v17  ;;  %v4924_v30 = vmul.f32 -1.442695, %v1909_v23  ;;  %v1711_v56 = vpop.f32.mrb[18].mxu0 }
 0x2c4   :  { %v6282_v57 = vpop.eup %6281  ;;  %6299 = vrcp.f32 %v2125_v25  ;;  %v1910_v58 = vadd.f32 %v7423_v4, %v1711_v56  ;;  %v1713_v59 = vpop.f32.mrb[19].mxu0 }
 0x2c5   :  { %v6284_v60 = vpop.eup %6283  ;;  %6301 = vrcp.f32 %v2126_v29  ;;  %v1911_v61 = vadd.f32 %v7427_v5, %v1713_v59  ;;  %4965 = vmatprep.mubr.msk.f32.mxu1 %vm2333_vm1, %v6282_v57 }
 0x2c6   :  { %v6286_v62 = vpop.eup %6285  ;;  %v2127_v63 = vadd.f32 1.0, %v6284_v60  ;;  %6303 = vpow2.f32 %v4923_v26  ;;  %v4925_v31 = vmul.f32 -1.442695, %v1910_v58  ;;  %2493 = vmatmul.mubr.f32.gmra.mrb[4].mxu1 %v6280_v27 }
 0x2c7   :  { %v2128_v32 = vadd.f32 1.0, %v6286_v62  ;;  %6305 = vpow2.f32 %v4924_v30  ;;  %v1717_v33 = vpop.f32.mrb[20].mxu0  ;;  %v6288_v34 = vpop.eup %6287  ;;  %v4926_v35 = vmul.f32 -1.442695, %v1911_v61 }
 0x2c8   :  { %6307 = vrcp.f32 %v2127_v63  ;;  %v1912_v36 = vadd.f32 %v7423_v4, %v1717_v33  ;;  %v1719_v37 = vpop.f32.mrb[21].mxu0  ;;  %v6290_v38 = vpop.eup %6289  ;;  %v2129_v39 = vadd.f32 1.0, %v6288_v34 }
 0x2c9   :  { %6309 = vrcp.f32 %v2128_v32  ;;  %v1913_v40 = vadd.f32 %v7427_v5, %v1719_v37 }
 0x2ca   :  { %v6292_v41 = vpop.eup %6291  ;;  %6311 = vpow2.f32 %v4925_v31  ;;  %v4927_v42 = vmul.f32 -1.442695, %v1912_v36 }
 0x2cb   :  { %v6294_v43 = vpop.eup %6293  ;;  %6313 = vrcp.f32 %v2129_v39  ;;  %v4928_v44 = vmul.f32 -1.442695, %v1913_v40  ;;  %4966 = vmatprep.mubr.msk.f32.mxu1 %vm2333_vm1, %v6292_v41  ;;  %v1723_v45 = vpop.f32.mrb[22].mxu0 }
 0x2cc   :  { %v6296_v46 = vpop.eup %6295  ;;  %6315 = vpow2.f32 %v4926_v35  ;;  %2498 = vmatmul.mubr.f32.gmra.mrb[6].mxu1 %v6290_v38  ;;  %v1914_v47 = vadd.f32 %v7423_v4, %v1723_v45  ;;  %v1725_v48 = vpop.f32.mrb[23].mxu0 }
 0x2cd   :  { %v6298_v49 = vpop.eup %6297  ;;  %v2130_v50 = vadd.f32 1.0, %v6296_v46  ;;  %6317 = vpow2.f32 %v4927_v42  ;;  %v1915_v51 = vadd.f32 %v7427_v5, %v1725_v48 }
 0x2ce   :  { %v6300_v52 = vpop.eup %6299  ;;  %v2131_v53 = vadd.f32 1.0, %v6298_v49  ;;  %6319 = vpow2.f32 %v4928_v44  ;;  %v4929_v54 = vmul.f32 -1.442695, %v1914_v47 }
 0x2cf   :  { %v6302_v1 = vpop.eup %6301  ;;  %6321 = vrcp.f32 %v2130_v50  ;;  %v4930_v6 = vmul.f32 -1.442695, %v1915_v51  ;;  %4967 = vmatprep.mubr.msk.f32.mxu1 %vm2333_vm1, %v6300_v52  ;;  %v1729_v7 = vpop.f32.mrb[24].mxu0 }
 0x2d0   :  { %v6304_v8 = vpop.eup %6303  ;;  %6323 = vrcp.f32 %v2131_v53  ;;  %2503 = vmatmul.mubr.f32.gmra.mrb[8].mxu1 %v6294_v43  ;;  %v1916_v9 = vadd.f32 %v7423_v4, %v1729_v7  ;;  %v1731_v10 = vpop.f32.mrb[25].mxu0 }
 0x2d1   :  { %v6306_v11 = vpop.eup %6305  ;;  %v2132_v12 = vadd.f32 1.0, %v6304_v8  ;;  %6325 = vpow2.f32 %v4929_v54  ;;  %v1917_v13 = vadd.f32 %v7427_v5, %v1731_v10 }
 0x2d2   :  { %v6308_v14 = vpop.eup %6307  ;;  %v2133_v15 = vadd.f32 1.0, %v6306_v11  ;;  %6327 = vpow2.f32 %v4930_v6  ;;  %v4931_v16 = vmul.f32 -1.442695, %v1916_v9 }
 0x2d3   :  { %v6310_v17 = vpop.eup %6309  ;;  %6329 = vrcp.f32 %v2132_v12  ;;  %v4932_v18 = vmul.f32 -1.442695, %v1917_v13  ;;  %4968 = vmatprep.mubr.msk.f32.mxu1 %vm2333_vm1, %v6308_v14  ;;  %v1735_v19 = vpop.f32.mrb[26].mxu0 }
 0x2d4   :  { %v6312_v20 = vpop.eup %6311  ;;  %6331 = vrcp.f32 %v2133_v15  ;;  %2508 = vmatmul.mubr.f32.gmra.mrb[10].mxu1 %v6302_v1  ;;  %v1918_v21 = vadd.f32 %v7423_v4, %v1735_v19  ;;  %v1737_v22 = vpop.f32.mrb[27].mxu0 }
 0x2d5   :  { %v6314_v23 = vpop.eup %6313  ;;  %v2134_v24 = vadd.f32 1.0, %v6312_v20  ;;  %6333 = vpow2.f32 %v4931_v16  ;;  %v1919_v25 = vadd.f32 %v7427_v5, %v1737_v22 }
 0x2d6   :  { %v6316_v26 = vpop.eup %6315  ;;  %6335 = vpow2.f32 %v4932_v18  ;;  %v4933_v27 = vmul.f32 -1.442695, %v1918_v21  ;;  %4969 = vmatprep.mubr.msk.f32.mxu1 %vm2333_vm1, %v6314_v23 }
 0x2d7   :  { %v6318_v29 = vpop.eup %6317  ;;  %6337 = vrcp.f32 %v2134_v24  ;;  %v2135_v30 = vadd.f32 1.0, %v6316_v26  ;;  %v1741_v56 = vpop.f32.mrb[28].mxu0  ;;  %v4934_v59 = vmul.f32 -1.442695, %v1919_v25 }
 0x2d8   :  { %v6320_v57 = vpop.eup %6319  ;;  %v2136_v58 = vadd.f32 1.0, %v6318_v29  ;;  %6339 = vpow2.f32 %v4933_v27  ;;  %2513 = vmatmul.mubr.f32.gmra.mrb[12].mxu1 %v6310_v17  ;;  %v1920_v60 = vadd.f32 %v7423_v4, %v1741_v56  ;;  %v1743_v61 = vpop.f32.mrb[29].mxu0 }
 0x2d9   :  { %v6322_v62 = vpop.eup %6321  ;;  %6341 = vrcp.f32 %v2135_v30  ;;  %v2137_v63 = vadd.f32 1.0, %v6320_v57  ;;  %v1921_v31 = vadd.f32 %v7427_v5, %v1743_v61 }
 0x2da   :  { %v6324_v32 = vpop.eup %6323  ;;  %6343 = vrcp.f32 %v2136_v58  ;;  %v4935_v33 = vmul.f32 -1.442695, %v1920_v60 }
 0x2db   :  { %v6326_v34 = vpop.eup %6325  ;;  %6345 = vrcp.f32 %v2137_v63  ;;  %4970 = vmatprep.mubr.msk.f32.mxu1 %vm2333_vm1, %v6324_v32  ;;  %v1747_v35 = vpop.f32.mrb[30].mxu0  ;;  %v4936_v38 = vmul.f32 -1.442695, %v1921_v31 }
 0x2dc   :  { %v6328_v36 = vpop.eup %6327  ;;  %v2138_v37 = vadd.f32 1.0, %v6326_v34  ;;  %6347 = vpow2.f32 %v4934_v59  ;;  %2518 = vmatmul.mubr.f32.gmra.mrb[14].mxu1 %v6322_v62  ;;  %v1922_v39 = vadd.f32 %v7423_v4, %v1747_v35  ;;  %v1749_v40 = vpop.f32.mrb[31].mxu0 }
 0x2dd   :  { %v6330_v41 = vpop.eup %6329  ;;  %v2139_v42 = vadd.f32 1.0, %v6328_v36  ;;  %6349 = vpow2.f32 %v4935_v33  ;;  %v1923_v43 = vadd.f32 %v7427_v5, %v1749_v40 }
 0x2de   :  { %v6332_v44 = vpop.eup %6331  ;;  %6351 = vrcp.f32 %v2138_v37  ;;  %v4937_v45 = vmul.f32 -1.442695, %v1922_v39 }
 0x2df   :  { %v6334_v46 = vpop.eup %6333  ;;  %6353 = vrcp.f32 %v2139_v42  ;;  %4971 = vmatprep.mubr.msk.f32.mxu1 %vm2333_vm1, %v6332_v44  ;;  %v1753_v47 = vpop.f32.mrb[32].mxu0  ;;  %v4938_v50 = vmul.f32 -1.442695, %v1923_v43 }
 0x2e0   :  { %v6336_v48 = vpop.eup %6335  ;;  %v2140_v49 = vadd.f32 1.0, %v6334_v46  ;;  %6355 = vpow2.f32 %v4936_v38  ;;  %2523 = vmatmul.mubr.f32.gmra.mrb[16].mxu1 %v6330_v41  ;;  %v1924_v51 = vadd.f32 %v7423_v4, %v1753_v47  ;;  %v1755_v52 = vpop.f32.mrb[33].mxu0 }
 0x2e1   :  { %v6338_v53 = vpop.eup %6337  ;;  %v2141_v54 = vadd.f32 1.0, %v6336_v48  ;;  %6357 = vpow2.f32 %v4937_v45  ;;  %v1925_v1 = vadd.f32 %v7427_v5, %v1755_v52 }
 0x2e2   :  { %v6340_v6 = vpop.eup %6339  ;;  %6359 = vrcp.f32 %v2140_v49  ;;  %v4939_v7 = vmul.f32 -1.442695, %v1924_v51 }
 0x2e3   :  { %v6342_v8 = vpop.eup %6341  ;;  %6361 = vrcp.f32 %v2141_v54  ;;  %v2142_v9 = vadd.f32 1.0, %v6340_v6  ;;  %v4940_v10 = vmul.f32 -1.442695, %v1925_v1  ;;  %v1759_v11 = vpop.f32.mrb[34].mxu0 }
 0x2e4   :  { %v6344_v12 = vpop.eup %6343  ;;  %6363 = vpow2.f32 %v4938_v50  ;;  %4972 = vmatprep.mubr.msk.f32.mxu1 %vm2333_vm1, %v6342_v8  ;;  %v1926_v13 = vadd.f32 %v7423_v4, %v1759_v11  ;;  %v1761_v14 = vpop.f32.mrb[35].mxu0 }
 0x2e5   :  { %v6346_v15 = vpop.eup %6345  ;;  %6365 = vrcp.f32 %v2142_v9  ;;  %2528 = vmatmul.mubr.f32.gmra.mrb[18].mxu1 %v6338_v53  ;;  %v1927_v16 = vadd.f32 %v7427_v5, %v1761_v14 }
 0x2e6   :  { %v6348_v17 = vpop.eup %6347  ;;  %6367 = vpow2.f32 %v4939_v7  ;;  %v4941_v18 = vmul.f32 -1.442695, %v1926_v13  ;;  %4973 = vmatprep.mubr.msk.f32.mxu1 %vm2333_vm1, %v6346_v15 }
 0x2e7   :  { %v6350_v19 = vpop.eup %6349  ;;  %v2143_v20 = vadd.f32 1.0, %v6348_v17  ;;  %6369 = vpow2.f32 %v4940_v10  ;;  %v4942_v21 = vmul.f32 -1.442695, %v1927_v16  ;;  %v1765_v22 = vpop.f32.mrb[36].mxu0 }
 0x2e8   :  { %v6352_v23 = vpop.eup %6351  ;;  %v2144_v24 = vadd.f32 1.0, %v6350_v19  ;;  %6371 = vpow2.f32 %v4941_v18  ;;  %v1928_v25 = vadd.f32 %v7423_v4, %v1765_v22  ;;  %v1767_v26 = vpop.f32.mrb[37].mxu0 }
 0x2e9   :  { %v6354_v27 = vpop.eup %6353  ;;  %6373 = vrcp.f32 %v2143_v20  ;;  %2533 = vmatmul.mubr.f32.gmra.mrb[20].mxu1 %v6344_v12  ;;  %v1929_v29 = vadd.f32 %v7427_v5, %v1767_v26 }
 0x2ea   :  { %v6356_v30 = vpop.eup %6355  ;;  %6375 = vrcp.f32 %v2144_v24  ;;  %v4943_v56 = vmul.f32 -1.442695, %v1928_v25  ;;  %4974 = vmatprep.mubr.msk.f32.mxu1 %vm2333_vm1, %v6354_v27 }
 0x2eb   :  { %v6358_v57 = vpop.eup %6357  ;;  %v2145_v58 = vadd.f32 1.0, %v6356_v30  ;;  %6377 = vpow2.f32 %v4942_v21  ;;  %v4944_v59 = vmul.f32 -1.442695, %v1929_v29  ;;  %v1771_v60 = vpop.f32.mrb[38].mxu0 }
 0x2ec   :  { %v6360_v61 = vpop.eup %6359  ;;  %v2146_v62 = vadd.f32 1.0, %v6358_v57  ;;  %6379 = vpow2.f32 %v4943_v56  ;;  %v1930_v63 = vadd.f32 %v7423_v4, %v1771_v60  ;;  %v1773_v31 = vpop.f32.mrb[39].mxu0 }
 0x2ed   :  { %v6362_v32 = vpop.eup %6361  ;;  %6381 = vrcp.f32 %v2145_v58  ;;  %2538 = vmatmul.mubr.f32.gmra.mrb[22].mxu1 %v6352_v23  ;;  %v1931_v33 = vadd.f32 %v7427_v5, %v1773_v31 }
 0x2ee   :  { %v6364_v34 = vpop.eup %6363  ;;  %6383 = vrcp.f32 %v2146_v62  ;;  %v4945_v35 = vmul.f32 -1.442695, %v1930_v63  ;;  %4975 = vmatprep.mubr.msk.f32.mxu1 %vm2333_vm1, %v6362_v32 }
 0x2ef   :  { %v6366_v36 = vpop.eup %6365  ;;  %v2147_v37 = vadd.f32 1.0, %v6364_v34  ;;  %6385 = vpow2.f32 %v4944_v59  ;;  %v4946_v38 = vmul.f32 -1.442695, %v1931_v33  ;;  %v1777_v39 = vpop.f32.mrb[40].mxu0 }
 0x2f0   :  { %v6368_v40 = vpop.eup %6367  ;;  %6387 = vpow2.f32 %v4945_v35  ;;  %v1932_v41 = vadd.f32 %v7423_v4, %v1777_v39  ;;  %v1779_v42 = vpop.f32.mrb[41].mxu0 }
 0x2f1   :  { %v6370_v43 = vpop.eup %6369  ;;  %6389 = vrcp.f32 %v2147_v37  ;;  %v2148_v44 = vadd.f32 1.0, %v6368_v40  ;;  %2543 = vmatmul.mubr.f32.gmra.mrb[24].mxu1 %v6360_v61  ;;  %v1933_v45 = vadd.f32 %v7427_v5, %v1779_v42 }
 0x2f2   :  { %v6372_v46 = vpop.eup %6371  ;;  %v2149_v47 = vadd.f32 1.0, %v6370_v43  ;;  %6391 = vpow2.f32 %v4946_v38  ;;  %v4947_v48 = vmul.f32 -1.442695, %v1932_v41 }
 0x2f3   :  { %v6374_v49 = vpop.eup %6373  ;;  %6393 = vrcp.f32 %v2148_v44  ;;  %v2150_v50 = vadd.f32 1.0, %v6372_v46  ;;  %v4948_v51 = vmul.f32 -1.442695, %v1933_v45  ;;  %v1783_v52 = vpop.f32.mrb[42].mxu0 }
 0x2f4   :  { %v6376_v53 = vpop.eup %6375  ;;  %6395 = vrcp.f32 %v2149_v47  ;;  %4976 = vmatprep.mubr.msk.f32.mxu1 %vm2333_vm1, %v6374_v49  ;;  %v1934_v54 = vadd.f32 %v7423_v4, %v1783_v52  ;;  %v1785_v1 = vpop.f32.mrb[43].mxu0 }
 0x2f5   :  { %v6378_v6 = vpop.eup %6377  ;;  %6397 = vrcp.f32 %v2150_v50  ;;  %2548 = vmatmul.mubr.f32.gmra.mrb[26].mxu1 %v6366_v36  ;;  %v1935_v7 = vadd.f32 %v7427_v5, %v1785_v1 }
 0x2f6   :  { %v6380_v8 = vpop.eup %6379  ;;  %v2151_v9 = vadd.f32 1.0, %v6378_v6  ;;  %6399 = vpow2.f32 %v4947_v48  ;;  %v4949_v10 = vmul.f32 -1.442695, %v1934_v54 }
 0x2f7   :  { %v6382_v11 = vpop.eup %6381  ;;  %v2152_v12 = vadd.f32 1.0, %v6380_v8  ;;  %6401 = vpow2.f32 %v4948_v51  ;;  %v4950_v13 = vmul.f32 -1.442695, %v1935_v7  ;;  %v1789_v14 = vpop.f32.mrb[44].mxu0 }
 0x2f8   :  { %v6384_v15 = vpop.eup %6383  ;;  %6403 = vrcp.f32 %v2151_v9  ;;  %4977 = vmatprep.mubr.msk.f32.mxu1 %vm2333_vm1, %v6382_v11  ;;  %v1936_v16 = vadd.f32 %v7423_v4, %v1789_v14  ;;  %v1791_v17 = vpop.f32.mrb[45].mxu0 }
 0x2f9   :  { %v6386_v18 = vpop.eup %6385  ;;  %6405 = vrcp.f32 %v2152_v12  ;;  %2553 = vmatmul.mubr.f32.gmra.mrb[28].mxu1 %v6376_v53  ;;  %v1937_v19 = vadd.f32 %v7427_v5, %v1791_v17 }
 0x2fa   :  { %v6388_v20 = vpop.eup %6387  ;;  %v2153_v21 = vadd.f32 1.0, %v6386_v18  ;;  %6407 = vpow2.f32 %v4949_v10  ;;  %v4951_v22 = vmul.f32 -1.442695, %v1936_v16 }
 0x2fb   :  { %v6390_v23 = vpop.eup %6389  ;;  %v2154_v24 = vadd.f32 1.0, %v6388_v20  ;;  %6409 = vpow2.f32 %v4950_v13  ;;  %v1795_v25 = vpop.f32.mrb[46].mxu0  ;;  %v4952_v27 = vmul.f32 -1.442695, %v1937_v19 }
 0x2fc   :  { %v6392_v26 = vpop.eup %6391  ;;  %6411 = vrcp.f32 %v2153_v21  ;;  %4978 = vmatprep.mubr.msk.f32.mxu1 %vm2333_vm1, %v6390_v23  ;;  %v1938_v29 = vadd.f32 %v7423_v4, %v1795_v25  ;;  %v1797_v30 = vpop.f32.mrb[47].mxu0 }
 0x2fd   :  { %v6394_v56 = vpop.eup %6393  ;;  %6413 = vrcp.f32 %v2154_v24  ;;  %v2155_v57 = vadd.f32 1.0, %v6392_v26  ;;  %2558 = vmatmul.mubr.f32.gmra.mrb[30].mxu1 %v6384_v15  ;;  %v1939_v58 = vadd.f32 %v7427_v5, %v1797_v30 }
 0x2fe   :  { %v6396_v59 = vpop.eup %6395  ;;  %6415 = vpow2.f32 %v4951_v22  ;;  %v4953_v60 = vmul.f32 -1.442695, %v1938_v29 }
 0x2ff   :  { %v6398_v61 = vpop.eup %6397  ;;  %6417 = vrcp.f32 %v2155_v57  ;;  %v4954_v62 = vmul.f32 -1.442695, %v1939_v58  ;;  %4979 = vmatprep.mubr.msk.f32.mxu1 %vm2333_vm1, %v6396_v59  ;;  %v1801_v63 = vpop.f32.mrb[48].mxu0 }
 0x300   :  { %v6400_v31 = vpop.eup %6399  ;;  %6419 = vpow2.f32 %v4952_v27  ;;  %v1940_v32 = vadd.f32 %v7423_v4, %v1801_v63  ;;  %v1803_v33 = vpop.f32.mrb[49].mxu0 }
 0x301   :  { %v6402_v34 = vpop.eup %6401  ;;  %v2156_v35 = vadd.f32 1.0, %v6400_v31  ;;  %6421 = vpow2.f32 %v4953_v60  ;;  %2563 = vmatmul.mubr.f32.gmra.mrb[32].mxu1 %v6394_v56  ;;  %v1941_v36 = vadd.f32 %v7427_v5, %v1803_v33 }
 0x302   :  { %v6404_v37 = vpop.eup %6403  ;;  %v2157_v38 = vadd.f32 1.0, %v6402_v34  ;;  %6423 = vpow2.f32 %v4954_v62  ;;  %v4955_v39 = vmul.f32 -1.442695, %v1940_v32 }
 0x303   :  { %v6406_v40 = vpop.eup %6405  ;;  %6425 = vrcp.f32 %v2156_v35  ;;  %v4956_v41 = vmul.f32 -1.442695, %v1941_v36  ;;  %4980 = vmatprep.mubr.msk.f32.mxu1 %vm2333_vm1, %v6404_v37  ;;  %v1807_v42 = vpop.f32.mrb[50].mxu0 }
 0x304   :  { %v6408_v43 = vpop.eup %6407  ;;  %6427 = vrcp.f32 %v2157_v38  ;;  %v1942_v44 = vadd.f32 %v7423_v4, %v1807_v42  ;;  %v1809_v45 = vpop.f32.mrb[51].mxu0 }
 0x305   :  { %v6410_v46 = vpop.eup %6409  ;;  %v2158_v47 = vadd.f32 1.0, %v6408_v43  ;;  %6429 = vpow2.f32 %v4955_v39  ;;  %2568 = vmatmul.mubr.f32.gmra.mrb[34].mxu1 %v6398_v61  ;;  %v1943_v48 = vadd.f32 %v7427_v5, %v1809_v45 }
 0x306   :  { %v6412_v49 = vpop.eup %6411  ;;  %v2159_v50 = vadd.f32 1.0, %v6410_v46  ;;  %6431 = vpow2.f32 %v4956_v41  ;;  %v4957_v51 = vmul.f32 -1.442695, %v1942_v44 }
 0x307   :  { %v6414_v52 = vpop.eup %6413  ;;  %6433 = vrcp.f32 %v2158_v47  ;;  %v4958_v53 = vmul.f32 -1.442695, %v1943_v48  ;;  %4981 = vmatprep.mubr.msk.f32.mxu1 %vm2333_vm1, %v6412_v49  ;;  %v1813_v54 = vpop.f32.mrb[52].mxu0  ;;  %v2285_v48 = vld [vmem:[%s8615_s4 + $0x8] sm:$0xff] }
 0x308   :  { %v6416_v1 = vpop.eup %6415  ;;  %6435 = vrcp.f32 %v2159_v50  ;;  %v1944_v6 = vadd.f32 %v7423_v4, %v1813_v54  ;;  %v1815_v7 = vpop.f32.mrb[53].mxu0 }
 0x309   :  { %v6418_v8 = vpop.eup %6417  ;;  %6437 = vpow2.f32 %v4957_v51  ;;  %2573 = vmatmul.mubr.f32.gmra.mrb[36].mxu1 %v6406_v40  ;;  %v1945_v9 = vadd.f32 %v7427_v5, %v1815_v7  ;;  %v2160_v11 = vadd.f32 1.0, %v6416_v1 }
 0x30a   :  { %v6420_v10 = vpop.eup %6419  ;;  %6439 = vpow2.f32 %v4958_v53  ;;  %v4959_v12 = vmul.f32 -1.442695, %v1944_v6  ;;  %4982 = vmatprep.mubr.msk.f32.mxu1 %vm2333_vm1, %v6418_v8 }
 0x30b   :  { %v6422_v13 = vpop.eup %6421  ;;  %v2161_v14 = vadd.f32 1.0, %v6420_v10  ;;  %v1819_v15 = vpop.f32.mrb[54].mxu0  ;;  %v4960_v17 = vmul.f32 -1.442695, %v1945_v9 }
 0x30c   :  { %v6424_v16 = vpop.eup %6423  ;;  %6441 = vpow2.f32 %v4959_v12  ;;  %v1946_v18 = vadd.f32 %v7423_v4, %v1819_v15  ;;  %v1821_v19 = vpop.f32.mrb[55].mxu0  ;;  %v2162_v24 = vadd.f32 1.0, %v6422_v13 }
 0x30d   :  { %v6426_v20 = vpop.eup %6425  ;;  %6443 = vrcp.f32 %v2161_v14  ;;  %v2163_v21 = vadd.f32 1.0, %v6424_v16  ;;  %2578 = vmatmul.mubr.f32.gmra.mrb[38].mxu1 %v6414_v52  ;;  %v1947_v22 = vadd.f32 %v7427_v5, %v1821_v19 }
 0x30e   :  { %v6428_v23 = vpop.eup %6427  ;;  %6445 = vrcp.f32 %v2160_v11  ;;  %v4961_v25 = vmul.f32 -1.442695, %v1946_v18 }
 0x30f   :  { %v6430_v26 = vpop.eup %6429  ;;  %6447 = vrcp.f32 %v2163_v21  ;;  %4983 = vmatprep.mubr.msk.f32.mxu1 %vm2333_vm1, %v6428_v23  ;;  %v4962_v29 = vmul.f32 -1.442695, %v1947_v22 }
 0x310   :  { %v6432_v27 = vpop.eup %6431  ;;  %6449 = vpow2.f32 %v4960_v17  ;;  %v2164_v57 = vadd.f32 1.0, %v6430_v26 }
 0x311   :  { %v6434_v30 = vpop.eup %6433  ;;  %v2165_v4 = vadd.f32 1.0, %v6432_v27  ;;  %6451 = vpow2.f32 %v4961_v25  ;;  %2583 = vmatmul.mubr.f32.gmra.mrb[40].mxu1 %v6426_v20 }
 0x312   :  { %v6436_v56 = vpop.eup %6435  ;;  %6453 = vrcp.f32 %v2162_v24 }
 0x313   :  { %v6438_v58 = vpop.eup %6437  ;;  %6455 = vrcp.f32 %v2165_v4  ;;  %4984 = vmatprep.mubr.msk.f32.mxu1 %vm2333_vm1, %v6436_v56 }
 0x314   :  { %v6440_v5 = vpop.eup %6439  ;;  %6457 = vpow2.f32 %v4962_v29  ;;  %v2166_v61 = vadd.f32 1.0, %v6438_v58 }
 0x315   :  { %v2167_v59 = vadd.f32 1.0, %v6440_v5  ;;  %2588 = vmatmul.mubr.f32.gmra.mrb[42].mxu1 %v6434_v30  ;;  %6459 = vrcp.f32 %v2164_v57 }
 0x316   :  { %v6442_v60 = vpop.eup %6441 }
 0x317   :  { %v6444_v62 = vpop.eup %6443  ;;  %6461 = vrcp.f32 %v2167_v59  ;;  %v2168_v33 = vadd.f32 1.0, %v6442_v60 }
 0x318   :  { %v6446_v63 = vpop.eup %6445  ;;  %4985 = vmatprep.mubr.msk.f32.mxu1 %vm2333_vm1, %v6444_v62  ;;  %6463 = vrcp.f32 %v2166_v61 }
 0x319   :  { %v6448_v31 = vpop.eup %6447  ;;  %2593 = vmatmul.mubr.f32.gmra.mrb[44].mxu1 %v6446_v63 }
 0x31a   :  { %v6450_v32 = vpop.eup %6449  ;;  %4986 = vmatprep.mubr.msk.f32.mxu1 %vm2333_vm1, %v6448_v31 }
 0x31b   :  { %v6452_v34 = vpop.eup %6451  ;;  %v2169_v35 = vadd.f32 1.0, %v6450_v32 }
 0x31c   :  { %v6454_v36 = vpop.eup %6453  ;;  %v2170_v39 = vadd.f32 1.0, %v6452_v34 }
 0x31d   :  { %v6456_v37 = vpop.eup %6455  ;;  %6465 = vrcp.f32 %v2169_v35  ;;  %2598 = vmatmul.mubr.f32.gmra.mrb[46].mxu1 %v6454_v36 }
 0x31e   :  { %v6458_v38 = vpop.eup %6457  ;;  %6467 = vrcp.f32 %v2168_v33  ;;  %4987 = vmatprep.mubr.msk.f32.mxu1 %vm2333_vm1, %v6456_v37 }
 0x31f   :  { %v2171_v40 = vadd.f32 1.0, %v6458_v38  ;;  %v6460_v41 = vpop.eup %6459 }
 0x321   :  { %v6462_v42 = vpop.eup %6461  ;;  %6469 = vrcp.f32 %v2171_v40  ;;  %2603 = vmatmul.mubr.f32.gmra.mrb[48].mxu1 %v6460_v41 }
 0x322   :  { %6471 = vrcp.f32 %v2170_v39  ;;  %4988 = vmatprep.mubr.msk.f32.mxu1 %vm2333_vm1, %v6462_v42  ;;  %v6464_v43 = vpop.eup %6463 }
 0x325   :  { %2608 = vmatmul.mubr.f32.gmra.mrb[50].mxu1 %v6464_v43 }
 0x327   :  { %v6466_v44 = vpop.eup %6465 }
 0x328   :  { %v6468_v45 = vpop.eup %6467  ;;  %4989 = vmatprep.mubr.msk.f32.mxu1 %vm2333_vm1, %v6466_v44 }
 0x329   :  { %2613 = vmatmul.mubr.f32.gmra.mrb[52].mxu1 %v6468_v45 }
 0x32b   :  { %v6470_v46 = vpop.eup %6469 }
 0x32c   :  { %v6472_v47 = vpop.eup %6471  ;;  %4990 = vmatprep.mubr.msk.f32.mxu1 %vm2333_vm1, %v6470_v46 }
 0x32d   :  { %2618 = vmatmul.mubr.f32.gmra.mrb[54].mxu1 %v6472_v47 }
 0x32e   :  { %4991 = vmatprep.mubr.msk.f32.mxu1 %vm2623_vm2, %v2285_v48 }
 0x391   :  { %v2484_v49 = vpop.f32.mrb[0].mxu1 }
 0x392   :  { %v2486_v50 = vpop.f32.mrb[1].mxu1 }
 0x395   :  { %v2489_v51 = vpop.f32.mrb[2].mxu1 }
 0x396   :  { %v5633_v52 = vpack.c.bf16 %v2489_v51, %v2484_v49  ;;  %v2491_v53 = vpop.f32.mrb[3].mxu1 }
 0x398   :  { %5634 = vmatpush1.bf16.msra.mxu1 %v5633_v52 }
 0x399   :  { %v2494_v54 = vpop.f32.mrb[4].mxu1  ;;  %5635 = vmatprep.subr.bf16.mxu1 %v6562_v28 }
 0x39a   :  { %v2496_v1 = vpop.f32.mrb[5].mxu1 }
 0x39f   :  { %v2499_v6 = vpop.f32.mrb[6].mxu1 }
 0x3a0   :  { %v5636_v7 = vpack.c.bf16 %v2499_v6, %v2494_v54  ;;  %v2501_v8 = vpop.f32.mrb[7].mxu1 }
 0x3a1   :  { %v5008_v8 = vld [vmem:[%s8616_s5 + $0xc8] sm:$0xff] }
 0x3a2   :  { %5637 = vmatpush1.bf16.msra.mxu1 %v5636_v7  ;;  %v5006_v7 = vld [vmem:[%s8616_s5 + $0xb8] sm:$0xff] }
 0x3a3   :  { %v2504_v9 = vpop.f32.mrb[8].mxu1  ;;  %5638 = vmatprep.subr.bf16.mxu1 %v6562_v28 }
 0x3a4   :  { %v2506_v10 = vpop.f32.mrb[9].mxu1 }
 0x3a5   :  { %v5674_v10 = vpack.c.bf16 %v5008_v8, %v5006_v7  ;;  %v2310_v7 = vld [vmem:[%s8615_s4 + $0xd0] sm:$0xff]  ;;  %v5026_v8 = vld [vmem:[%s8616_s5 + $0x158] sm:$0xf] }
 0x3a7   :  { %v2509_v11 = vpop.f32.mrb[10].mxu1 }
 0x3a8   :  { %v5639_v12 = vpack.c.bf16 %v2509_v11, %v2504_v9  ;;  %v2511_v13 = vpop.f32.mrb[11].mxu1  ;;  %v5005_v11 = vld [vmem:[%s8616_s5 + $0xb0] sm:$0xff] }
 0x3aa   :  { %5640 = vmatpush1.bf16.msra.mxu1 %v5639_v12  ;;  %v5007_v12 = vld [vmem:[%s8616_s5 + $0xc0] sm:$0xff] }
 0x3ab   :  { %v2514_v14 = vpop.f32.mrb[12].mxu1  ;;  %5641 = vmatprep.subr.bf16.mxu1 %v6562_v28 }
 0x3ac   :  { %v2516_v15 = vpop.f32.mrb[13].mxu1 }
 0x3ad   :  { %v5010_v15 = vld [vmem:[%s8616_s5 + $0xd8] sm:$0xff] }
 0x3af   :  { %v2519_v16 = vpop.f32.mrb[14].mxu1 }
 0x3b0   :  { %v5642_v17 = vpack.c.bf16 %v2519_v16, %v2514_v14  ;;  %v2521_v18 = vpop.f32.mrb[15].mxu1  ;;  %v5012_v16 = vld [vmem:[%s8616_s5 + $0xe8] sm:$0xff] }
 0x3b1   :  { %v5676_v18 = vpack.c.bf16 %v5007_v12, %v5005_v11  ;;  %v2804_v11 = vld [vmem:[%s8616_s5 + $0x18] sm:$0xff] }
 0x3b2   :  { %5643 = vmatpush1.bf16.msra.mxu1 %v5642_v17  ;;  %v2284_v17 = vld [vmem:[%s8615_s4] sm:$0xff] }
 0x3b3   :  { %v2524_v19 = vpop.f32.mrb[16].mxu1  ;;  %5644 = vmatprep.subr.bf16.mxu1 %v6562_v28 }
 0x3b4   :  { %v2526_v20 = vpop.f32.mrb[17].mxu1 }
 0x3b5   :  { %v5678_v20 = vpack.c.bf16 %v5012_v16, %v5010_v15  ;;  %v2806_v16 = vld [vmem:[%s8616_s5 + $0x28] sm:$0xff] }
 0x3b8   :  { %v2529_v21 = vpop.f32.mrb[18].mxu1 }
 0x3b9   :  { %v5645_v22 = vpack.c.bf16 %v2529_v21, %v2524_v19  ;;  %v2531_v23 = vpop.f32.mrb[19].mxu1  ;;  %v2287_v19 = vld [vmem:[%s8615_s4 + $0x18] sm:$0xff]  ;;  %v5009_v21 = vld [vmem:[%s8616_s5 + $0xd0] sm:$0xff] }
 0x3ba   :  { %v5014_v23 = vld [vmem:[%s8616_s5 + $0xf8] sm:$0xff] }
 0x3bb   :  { %5646 = vmatpush1.bf16.msra.mxu1 %v5645_v22  ;;  %v5011_v22 = vld [vmem:[%s8616_s5 + $0xe0] sm:$0xff] }
 0x3bc   :  { %v2534_v24 = vpop.f32.mrb[20].mxu1  ;;  %5647 = vmatprep.subr.bf16.mxu1 %v6562_v28 }
 0x3bd   :  { %v2536_v25 = vpop.f32.mrb[21].mxu1 }
 0x3be   :  { %v2286_v25 = vld [vmem:[%s8615_s4 + $0x10] sm:$0xff] }
 0x3c0   :  { %v2539_v26 = vpop.f32.mrb[22].mxu1 }
 0x3c1   :  { %v5648_v27 = vpack.c.bf16 %v2539_v26, %v2534_v24  ;;  %v2541_v29 = vpop.f32.mrb[23].mxu1  ;;  %v5016_v24 = vld [vmem:[%s8616_s5 + $0x108] sm:$0xff]  ;;  %v5680_v26 = vpack.c.bf16 %v5011_v22, %v5009_v21  ;;  %v2805_v21 = vld [vmem:[%s8616_s5 + $0x20] sm:$0xff]  ;;  %v2807_v22 = vld [vmem:[%s8616_s5 + $0x30] sm:$0xff] }
 0x3c2   :  { %v5682_v29 = vpack.c.bf16 %v5016_v24, %v5014_v23  ;;  %v2810_v24 = vld [vmem:[%s8616_s5 + $0x48] sm:$0xff] }
 0x3c3   :  { %5649 = vmatpush1.bf16.msra.mxu1 %v5648_v27  ;;  %v2289_v27 = vld [vmem:[%s8615_s4 + $0x28] sm:$0xff] }
 0x3c4   :  { %v2544_v30 = vpop.f32.mrb[24].mxu1  ;;  %5650 = vmatprep.subr.bf16.mxu1 %v6562_v28 }
 0x3c5   :  { %v2546_v4 = vpop.f32.mrb[25].mxu1 }
 0x3c6   :  { %v5015_v4 = vld [vmem:[%s8616_s5 + $0x100] sm:$0xff] }
 0x3c8   :  { %v2549_v56 = vpop.f32.mrb[26].mxu1 }
 0x3c9   :  { %v5651_v57 = vpack.c.bf16 %v2549_v56, %v2544_v30  ;;  %v2551_v58 = vpop.f32.mrb[27].mxu1  ;;  %v5013_v30 = vld [vmem:[%s8616_s5 + $0xf0] sm:$0xff]  ;;  %v5018_v56 = vld [vmem:[%s8616_s5 + $0x118] sm:$0xff] }
 0x3ca   :  { %v2288_v58 = vld [vmem:[%s8615_s4 + $0x20] sm:$0xff] }
 0x3cb   :  { %5652 = vmatpush1.bf16.msra.mxu1 %v5651_v57  ;;  %v5020_v57 = vld [vmem:[%s8616_s5 + $0x128] sm:$0xff] }
 0x3cc   :  { %v2554_v5 = vpop.f32.mrb[28].mxu1  ;;  %5653 = vmatprep.subr.bf16.mxu1 %v6562_v28 }
 0x3cd   :  { %v2556_v59 = vpop.f32.mrb[29].mxu1 }
 0x3ce   :  { %v2291_v59 = vld [vmem:[%s8615_s4 + $0x38] sm:$0xff] }
 0x3d0   :  { %v2559_v60 = vpop.f32.mrb[30].mxu1 }
 0x3d1   :  { %v5654_v61 = vpack.c.bf16 %v2559_v60, %v2554_v5  ;;  %v2561_v62 = vpop.f32.mrb[31].mxu1  ;;  %v5684_v5 = vpack.c.bf16 %v5015_v4, %v5013_v30  ;;  %v5686_v60 = vpack.c.bf16 %v5020_v57, %v5018_v56  ;;  %v2809_v30 = vld [vmem:[%s8616_s5 + $0x40] sm:$0xff]  ;;  %v2811_v4 = vld [vmem:[%s8616_s5 + $0x50] sm:$0xff]  ;;  %v2814_v57 = vld [vmem:[%s8616_s5 + $0x68] sm:$0xff] }
 0x3d2   :  { %v5019_v62 = vld [vmem:[%s8616_s5 + $0x120] sm:$0xff] }
 0x3d3   :  { %5655 = vmatpush1.bf16.msra.mxu1 %v5654_v61  ;;  %v5017_v61 = vld [vmem:[%s8616_s5 + $0x110] sm:$0xff] }
 0x3d4   :  { %v2564_v63 = vpop.f32.mrb[32].mxu1  ;;  %5656 = vmatprep.subr.bf16.mxu1 %v6562_v28 }
 0x3d5   :  { %v2566_v31 = vpop.f32.mrb[33].mxu1 }
 0x3d6   :  { %v5024_v31 = vld [vmem:[%s8616_s5 + $0x148] sm:$0xff] }
 0x3d8   :  { %v2569_v32 = vpop.f32.mrb[34].mxu1 }
 0x3d9   :  { %v5657_v33 = vpack.c.bf16 %v2569_v32, %v2564_v63  ;;  %v2571_v34 = vpop.f32.mrb[35].mxu1  ;;  %v5022_v63 = vld [vmem:[%s8616_s5 + $0x138] sm:$0xff]  ;;  %v2290_v32 = vld [vmem:[%s8615_s4 + $0x30] sm:$0xff] }
 0x3da   :  { %v2293_v34 = vld [vmem:[%s8615_s4 + $0x48] sm:$0xff] }
 0x3db   :  { %5658 = vmatpush1.bf16.msra.mxu1 %v5657_v33  ;;  %v5688_v33 = vpack.c.bf16 %v5019_v62, %v5017_v61  ;;  %v2813_v61 = vld [vmem:[%s8616_s5 + $0x60] sm:$0xff]  ;;  %v2815_v62 = vld [vmem:[%s8616_s5 + $0x70] sm:$0xff] }
 0x3dc   :  { %v2574_v35 = vpop.f32.mrb[36].mxu1  ;;  %5659 = vmatprep.subr.bf16.mxu1 %v6562_v28 }
 0x3dd   :  { %v2576_v36 = vpop.f32.mrb[37].mxu1 }
 0x3de   :  { %v5021_v36 = vld [vmem:[%s8616_s5 + $0x130] sm:$0xff] }
 0x3e0   :  { %v2579_v37 = vpop.f32.mrb[38].mxu1 }
 0x3e1   :  { %v5660_v38 = vpack.c.bf16 %v2579_v37, %v2574_v35  ;;  %v2581_v39 = vpop.f32.mrb[39].mxu1  ;;  %v5690_v35 = vpack.c.bf16 %v5024_v31, %v5022_v63  ;;  %v5023_v37 = vld [vmem:[%s8616_s5 + $0x140] sm:$0xff]  ;;  %v2818_v31 = vld [vmem:[%s8616_s5 + $0x88] sm:$0xff] }
 0x3e2   :  { %v5692_v39 = vpack.c.bf16 %v5023_v37, %v5021_v36  ;;  %v2817_v36 = vld [vmem:[%s8616_s5 + $0x80] sm:$0xff]  ;;  %v2819_v37 = vld [vmem:[%s8616_s5 + $0x90] sm:$0xff] }
 0x3e3   :  { %5661 = vmatpush1.bf16.msra.mxu1 %v5660_v38  ;;  %v2292_v38 = vld [vmem:[%s8615_s4 + $0x40] sm:$0xff] }
 0x3e4   :  { %v2584_v40 = vpop.f32.mrb[40].mxu1  ;;  %5662 = vmatprep.subr.bf16.mxu1 %v6562_v28 }
 0x3e5   :  { %v2586_v41 = vpop.f32.mrb[41].mxu1 }
 0x3e6   :  { %v2294_v41 = vld [vmem:[%s8615_s4 + $0x50] sm:$0xff] }
 0x3e8   :  { %v2589_v42 = vpop.f32.mrb[42].mxu1 }
 0x3e9   :  { %v5663_v43 = vpack.c.bf16 %v2589_v42, %v2584_v40  ;;  %v2591_v44 = vpop.f32.mrb[43].mxu1  ;;  %v2295_v40 = vld [vmem:[%s8615_s4 + $0x58] sm:$0xff]  ;;  %v2297_v42 = vld [vmem:[%s8615_s4 + $0x68] sm:$0xff] }
 0x3ea   :  { %v2299_v44 = vld [vmem:[%s8615_s4 + $0x78] sm:$0xff] }
 0x3eb   :  { %5664 = vmatpush1.bf16.msra.mxu1 %v5663_v43  ;;  %v2296_v43 = vld [vmem:[%s8615_s4 + $0x60] sm:$0xff] }
 0x3ec   :  { %v2594_v45 = vpop.f32.mrb[44].mxu1  ;;  %5665 = vmatprep.subr.bf16.mxu1 %v6562_v28 }
 0x3ed   :  { %v2596_v46 = vpop.f32.mrb[45].mxu1 }
 0x3ee   :  { %v2301_v46 = vld [vmem:[%s8615_s4 + $0x88] sm:$0xff] }
 0x3f0   :  { %v2599_v47 = vpop.f32.mrb[46].mxu1 }
 0x3f1   :  { %v5666_v48 = vpack.c.bf16 %v2599_v47, %v2594_v45  ;;  %v2601_v49 = vpop.f32.mrb[47].mxu1  ;;  %v2298_v45 = vld [vmem:[%s8615_s4 + $0x70] sm:$0xff]  ;;  %v2300_v47 = vld [vmem:[%s8615_s4 + $0x80] sm:$0xff] }
 0x3f2   :  { %v2302_v49 = vld [vmem:[%s8615_s4 + $0x90] sm:$0xff] }
 0x3f3   :  { %5667 = vmatpush1.bf16.msra.mxu1 %v5666_v48  ;;  %v2303_v48 = vld [vmem:[%s8615_s4 + $0x98] sm:$0xff] }
 0x3f4   :  { %v2604_v50 = vpop.f32.mrb[48].mxu1  ;;  %5668 = vmatprep.subr.bf16.mxu1 %v6562_v28 }
 0x3f5   :  { %v2606_v51 = vpop.f32.mrb[49].mxu1 }
 0x3f6   :  { %v2304_v51 = vld [vmem:[%s8615_s4 + $0xa0] sm:$0xff] }
 0x3f8   :  { %v2609_v52 = vpop.f32.mrb[50].mxu1 }
 0x3f9   :  { %v5669_v53 = vpack.c.bf16 %v2609_v52, %v2604_v50  ;;  %v2611_v54 = vpop.f32.mrb[51].mxu1  ;;  %v2305_v50 = vld [vmem:[%s8615_s4 + $0xa8] sm:$0xff]  ;;  %v2307_v52 = vld [vmem:[%s8615_s4 + $0xb8] sm:$0xff] }
 0x3fa   :  { %v2309_v54 = vld [vmem:[%s8615_s4 + $0xc8] sm:$0xff] }
 0x3fb   :  { %5670 = vmatpush1.bf16.msra.mxu1 %v5669_v53  ;;  %v2306_v53 = vld [vmem:[%s8615_s4 + $0xb0] sm:$0xff] }
 0x3fc   :  { %v2614_v1 = vpop.f32.mrb[52].mxu1  ;;  %5671 = vmatprep.subr.bf16.mxu1 %v6562_v28 }
 0x3fd   :  { %v2616_v6 = vpop.f32.mrb[53].mxu1 }
 0x3fe   :  { %v2311_v6 = vld [vmem:[%s8615_s4 + $0xd8] sm:$0xff] }
 0x400   :  { %v2619_v9 = vpop.f32.mrb[54].mxu1 }
 0x401   :  { %v5672_v13 = vpack.c.bf16 %v2619_v9, %v2614_v1  ;;  %v2621_v14 = vpop.f32.mrb[55].mxu1  ;;  %v2308_v1 = vld [vmem:[%s8615_s4 + $0xc0] sm:$0xff]  ;;  %v5025_v9 = vld [vmem:[%s8616_s5 + $0x150] sm:$0xf] }
 0x402   :  { %v2803_v14 = vld [vmem:[%s8616_s5 + $0x10] sm:$0xff] }
 0x403   :  { %5673 = vmatpush1.bf16.msra.mxu1 %v5672_v13  ;;  %v2801_v13 = vld [vmem:[%s8616_s5] sm:$0xff] }
 0x404   :  { %5675 = vmatprep.subr.bf16.mxu1 %v5674_v10  ;;  %v2802_v10 = vld [vmem:[%s8616_s5 + $0x8] sm:$0xff] }
 0x405   :  { %v5694_v12 = vpack.c.bf16 %v2804_v11, %v2802_v10  ;;  %v5058_v10 = vld [vmem:[%s8616_s5 + $0x198] sm:$0xff] }
 0x406   :  { %2731 = vmatmul.mubr.f32.vlgmr.msra.gmra.mrb[56].mxu1 %v2284_v17  ;;  %v2808_v17 = vld [vmem:[%s8616_s5 + $0x38] sm:$0xff] }
 0x407   :  { %4992 = vmatprep.mubr.msk.f32.mxu1 %vm2623_vm2, %v2287_v19  ;;  %5677 = vmatpush1.bf16.msra.mxu1 %v5676_v18  ;;  %v5696_v19 = vpack.c.bf16 %v2803_v14, %v2801_v13  ;;  %v5055_v14 = vld [vmem:[%s8616_s5 + $0x180] sm:$0xff] }
 0x408   :  { %5679 = vmatprep.subr.bf16.mxu1 %v5678_v20  ;;  %v5698_v20 = vpack.c.bf16 %v2808_v17, %v2806_v16  ;;  %v5057_v16 = vld [vmem:[%s8616_s5 + $0x190] sm:$0xff]  ;;  %v5060_v17 = vld [vmem:[%s8616_s5 + $0x1a8] sm:$0xff] }
 0x40a   :  { %2736 = vmatmul.mubr.f32.gmra.mrb[58].mxu1 %v2286_v25  ;;  %v2812_v25 = vld [vmem:[%s8616_s5 + $0x58] sm:$0xff] }
 0x40b   :  { %4993 = vmatprep.mubr.msk.f32.mxu1 %vm2623_vm2, %v2289_v27  ;;  %5681 = vmatpush1.bf16.msra.mxu1 %v5680_v26  ;;  %v5700_v27 = vpack.c.bf16 %v2807_v22, %v2805_v21  ;;  %v5720_v21 = vpack.c.bf16 %v5057_v16, %v5055_v14  ;;  %v5099_v14 = vld [vmem:[%s8616_s5 + $0x280] sm:$0xff]  ;;  %v5102_v16 = vld [vmem:[%s8616_s5 + $0x298] sm:$0xff] }
 0x40c   :  { %5683 = vmatprep.subr.bf16.mxu1 %v5682_v29  ;;  %v5702_v29 = vpack.c.bf16 %v2812_v25, %v2810_v24  ;;  %v5059_v24 = vld [vmem:[%s8616_s5 + $0x1a0] sm:$0xff]  ;;  %v5061_v25 = vld [vmem:[%s8616_s5 + $0x1b0] sm:$0xff] }
 0x40e   :  { %2741 = vmatmul.mubr.f32.gmra.mrb[60].mxu1 %v2288_v58  ;;  %v2816_v58 = vld [vmem:[%s8616_s5 + $0x78] sm:$0xff] }
 0x40f   :  { %4994 = vmatprep.mubr.msk.f32.mxu1 %vm2623_vm2, %v2291_v59  ;;  %5685 = vmatpush1.bf16.msra.mxu1 %v5684_v5  ;;  %v5704_v59 = vpack.c.bf16 %v2811_v4, %v2809_v30  ;;  %v5724_v30 = vpack.c.bf16 %v5061_v25, %v5059_v24  ;;  %v5106_v25 = vld [vmem:[%s8616_s5 + $0x2b8] sm:$0xf] }
 0x410   :  { %5687 = vmatprep.subr.bf16.mxu1 %v5686_v60  ;;  %v5706_v60 = vpack.c.bf16 %v2816_v58, %v2814_v57  ;;  %v5063_v57 = vld [vmem:[%s8616_s5 + $0x1c0] sm:$0xff]  ;;  %v5065_v58 = vld [vmem:[%s8616_s5 + $0x1d0] sm:$0xff] }
 0x412   :  { %2746 = vmatmul.mubr.f32.gmra.mrb[62].mxu1 %v2290_v32  ;;  %v2820_v32 = vld [vmem:[%s8616_s5 + $0x98] sm:$0xff] }
 0x413   :  { %4995 = vmatprep.mubr.msk.f32.mxu1 %vm2623_vm2, %v2293_v34  ;;  %5689 = vmatpush1.bf16.msra.mxu1 %v5688_v33  ;;  %v5708_v34 = vpack.c.bf16 %v2815_v62, %v2813_v61  ;;  %v5067_v61 = vld [vmem:[%s8616_s5 + $0x1e0] sm:$0xff]  ;;  %v5069_v62 = vld [vmem:[%s8616_s5 + $0x1f0] sm:$0xff] }
 0x414   :  { %5691 = vmatprep.subr.bf16.mxu1 %v5690_v35  ;;  %v5710_v35 = vpack.c.bf16 %v2820_v32, %v2818_v31  ;;  %v5732_v31 = vpack.c.bf16 %v5069_v62, %v5067_v61  ;;  %v5072_v32 = vld [vmem:[%s8616_s5 + $0x208] sm:$0xf]  ;;  %v5125_v61 = vld [vmem:[%s8616_s5 + $0x2f0] sm:$0xff] }
 0x415   :  { %v5128_v62 = vld [vmem:[%s8616_s5 + $0x308] sm:$0xff] }
 0x416   :  { %2751 = vmatmul.mubr.f32.gmra.mrb[64].mxu1 %v2292_v38 }
 0x417   :  { %4996 = vmatprep.mubr.msk.f32.mxu1 %vm2623_vm2, %v2295_v40  ;;  %5693 = vmatpush1.bf16.msra.mxu1 %v5692_v39  ;;  %v5712_v40 = vpack.c.bf16 %v2819_v37, %v2817_v36 }
 0x418   :  { %5027 = vmatprep.subr.msk.mxu1 %vm2877_vm3, %v5026_v8 }
 0x41a   :  { %2756 = vmatmul.mubr.f32.gmra.mrb[66].mxu1 %v2294_v41 }
 0x41b   :  { %4997 = vmatprep.mubr.msk.f32.mxu1 %vm2623_vm2, %v2297_v42  ;;  %5028 = vmatpush1.msk.msra.mxu1 %vm2877_vm3, %v5025_v9  ;;  %v2822_v42 = vld [vmem:[%s8616_s5 + $0xa8] sm:$0xf] }
 0x41c   :  { %5695 = vmatprep.subr.bf16.mxu1 %v5694_v12  ;;  %v5056_v9 = vld [vmem:[%s8616_s5 + $0x188] sm:$0xff] }
 0x41d   :  { %v5718_v13 = vpack.c.bf16 %v5058_v10, %v5056_v9  ;;  %v5095_v9 = vld [vmem:[%s8616_s5 + $0x260] sm:$0xff]  ;;  %v5098_v10 = vld [vmem:[%s8616_s5 + $0x278] sm:$0xff] }
 0x41e   :  { %2761 = vmatmul.mubr.f32.gmra.mrb[68].mxu1 %v2296_v43  ;;  %v5052_v43 = vld [vmem:[%s8616_s5 + $0x168] sm:$0xff] }
 0x41f   :  { %4998 = vmatprep.mubr.msk.f32.mxu1 %vm2623_vm2, %v2299_v44  ;;  %v5054_v44 = vld [vmem:[%s8616_s5 + $0x178] sm:$0xff] }
 0x422   :  { %2766 = vmatmul.mubr.f32.gmra.mrb[70].mxu1 %v2298_v45 }
 0x423   :  { %4999 = vmatprep.mubr.msk.f32.mxu1 %vm2623_vm2, %v2301_v46  ;;  %v2821_v46 = vld [vmem:[%s8616_s5 + $0xa0] sm:$0xf] }
 0x426   :  { %2771 = vmatmul.mubr.f32.gmra.mrb[72].mxu1 %v2300_v47  ;;  %v5714_v47 = vpack.c.bf16 %v5054_v44, %v5052_v43  ;;  %v5090_v43 = vld [vmem:[%s8616_s5 + $0x238] sm:$0xff]  ;;  %v5092_v44 = vld [vmem:[%s8616_s5 + $0x248] sm:$0xff] }
 0x427   :  { %5000 = vmatprep.mubr.msk.f32.mxu1 %vm2623_vm2, %v2303_v48 }
 0x42a   :  { %2776 = vmatmul.mubr.f32.gmra.mrb[74].mxu1 %v2302_v49 }
 0x42b   :  { %5001 = vmatprep.mubr.msk.f32.mxu1 %vm2623_vm2, %v2305_v50 }
 0x42e   :  { %2781 = vmatmul.mubr.f32.gmra.mrb[76].mxu1 %v2304_v51 }
 0x42f   :  { %5002 = vmatprep.mubr.msk.f32.mxu1 %vm2623_vm2, %v2307_v52 }
 0x432   :  { %2786 = vmatmul.mubr.f32.gmra.mrb[78].mxu1 %v2306_v53 }
 0x433   :  { %5003 = vmatprep.mubr.msk.f32.mxu1 %vm2623_vm2, %v2309_v54 }
 0x436   :  { %2791 = vmatmul.mubr.f32.gmra.mrb[80].mxu1 %v2308_v1 }
 0x437   :  { %5004 = vmatprep.mubr.msk.f32.mxu1 %vm2623_vm2, %v2311_v6  ;;  %v5051_v6 = vld [vmem:[%s8616_s5 + $0x160] sm:$0xff] }
 0x43a   :  { %2796 = vmatmul.mubr.f32.gmra.mrb[82].mxu1 %v2310_v7  ;;  %v5053_v7 = vld [vmem:[%s8616_s5 + $0x170] sm:$0xff] }
 0x43b   :  { %2948 = vmatprep.mubr.f32.mxu1 %v6561_v3  ;;  %v5716_v12 = vpack.c.bf16 %v5053_v7, %v5051_v6  ;;  %v5093_v7 = vld [vmem:[%s8616_s5 + $0x250] sm:$0xff] }
 0x4d9   :  { %v7705_v15 = vpop.f32.mrb[56].mxu1 }
 0x4da   :  { %v2734_v18 = vpop.f32.mrb[57].mxu1 }
 0x4db   :  { %v5062_v18 = vld [vmem:[%s8616_s5 + $0x1b8] sm:$0xff] }
 0x4dc   :  { %v5722_v22 = vpack.c.bf16 %v5062_v18, %v5060_v17  ;;  %v5104_v17 = vld [vmem:[%s8616_s5 + $0x2a8] sm:$0xff] }
 0x4dd   :  { %v7719_v23 = vpop.f32.mrb[58].mxu1 }
 0x4de   :  { %v2739_v26 = vpop.f32.mrb[59].mxu1  ;;  %5029 = vmatmul.mubr.msk.f32.vlgmr.msra.gmra.mrb[84].mxu1 %vm2846_vm4, %v7719_v23 }
 0x4df   :  { %2954 = vmatprep.mubr.f32.mxu1 %v6561_v3  ;;  %5697 = vmatpush1.bf16.msra.mxu1 %v5696_v19  ;;  %v5064_v26 = vld [vmem:[%s8616_s5 + $0x1c8] sm:$0xff] }
 0x4e0   :  { %5699 = vmatprep.subr.bf16.mxu1 %v5698_v20 }
 0x4e1   :  { %v7736_v56 = vpop.f32.mrb[60].mxu1 }
 0x4e2   :  { %v2744_v5 = vpop.f32.mrb[61].mxu1  ;;  %5030 = vmatmul.mubr.msk.f32.gmra.mrb[86].mxu1 %vm2846_vm4, %v7736_v56 }
 0x4e3   :  { %2960 = vmatprep.mubr.f32.mxu1 %v6561_v3  ;;  %5701 = vmatpush1.bf16.msra.mxu1 %v5700_v27  ;;  %v5068_v5 = vld [vmem:[%s8616_s5 + $0x1e8] sm:$0xff] }
 0x4e4   :  { %5703 = vmatprep.subr.bf16.mxu1 %v5702_v29 }
 0x4e5   :  { %v7753_v63 = vpop.f32.mrb[62].mxu1 }
 0x4e6   :  { %v2749_v33 = vpop.f32.mrb[63].mxu1  ;;  %5031 = vmatmul.mubr.msk.f32.gmra.mrb[88].mxu1 %vm2846_vm4, %v7753_v63 }
 0x4e7   :  { %2966 = vmatprep.mubr.f32.mxu1 %v6561_v3  ;;  %5705 = vmatpush1.bf16.msra.mxu1 %v5704_v59  ;;  %v5728_v59 = vpack.c.bf16 %v5065_v58, %v5063_v57  ;;  %v5086_v33 = vld [vmem:[%s8616_s5 + $0x218] sm:$0xff]  ;;  %v5121_v57 = vld [vmem:[%s8616_s5 + $0x2d0] sm:$0xff]  ;;  %v5124_v58 = vld [vmem:[%s8616_s5 + $0x2e8] sm:$0xff] }
 0x4e8   :  { %5707 = vmatprep.subr.bf16.mxu1 %v5706_v60 }
 0x4e9   :  { %v7770_v38 = vpop.f32.mrb[64].mxu1 }
 0x4ea   :  { %v2754_v39 = vpop.f32.mrb[65].mxu1  ;;  %5032 = vmatmul.mubr.msk.f32.gmra.mrb[90].mxu1 %vm2846_vm4, %v7770_v38 }
 0x4eb   :  { %2972 = vmatprep.mubr.f32.mxu1 %v6561_v3  ;;  %5709 = vmatpush1.bf16.msra.mxu1 %v5708_v34  ;;  %v5088_v34 = vld [vmem:[%s8616_s5 + $0x228] sm:$0xff] }
 0x4ec   :  { %5711 = vmatprep.subr.bf16.mxu1 %v5710_v35  ;;  %v5071_v35 = vld [vmem:[%s8616_s5 + $0x200] sm:$0xf]  ;;  %v5734_v36 = vpack.c.bf16 %v5088_v34, %v5086_v33 }
 0x4ed   :  { %v7775_v41 = vpop.f32.mrb[66].mxu1  ;;  %v5127_v34 = vld [vmem:[%s8616_s5 + $0x300] sm:$0xff] }
 0x4ee   :  { %v2759_v45 = vpop.f32.mrb[67].mxu1  ;;  %5033 = vmatmul.mubr.msk.f32.gmra.mrb[92].mxu1 %vm2846_vm4, %v7775_v41 }
 0x4ef   :  { %2978 = vmatprep.mubr.f32.mxu1 %v6561_v3  ;;  %5713 = vmatpush1.bf16.msra.mxu1 %v5712_v40  ;;  %v5085_v40 = vld [vmem:[%s8616_s5 + $0x210] sm:$0xff] }
 0x4f0   :  { %5039 = vmatprep.subr.msk.mxu1 %vm2877_vm3, %v2822_v42  ;;  %v5087_v42 = vld [vmem:[%s8616_s5 + $0x220] sm:$0xff] }
 0x4f1   :  { %v7793_v48 = vpop.f32.mrb[68].mxu1  ;;  %v5736_v45 = vpack.c.bf16 %v5087_v42, %v5085_v40  ;;  %v5131_v42 = vld [vmem:[%s8616_s5 + $0x320] sm:$0xff] }
 0x4f2   :  { %v2764_v49 = vpop.f32.mrb[69].mxu1  ;;  %5034 = vmatmul.mubr.msk.f32.gmra.mrb[94].mxu1 %vm2846_vm4, %v7793_v48 }
 0x4f3   :  { %2984 = vmatprep.mubr.f32.mxu1 %v6561_v3  ;;  %5040 = vmatpush1.msk.msra.mxu1 %vm2877_vm3, %v2821_v46  ;;  %v5738_v46 = vpack.c.bf16 %v5092_v44, %v5090_v43  ;;  %v5091_v49 = vld [vmem:[%s8616_s5 + $0x240] sm:$0xff]  ;;  %v5133_v43 = vld [vmem:[%s8616_s5 + $0x330] sm:$0xff]  ;;  %v5136_v44 = vld [vmem:[%s8616_s5 + $0x348] sm:$0xff] }
 0x4f4   :  { %5715 = vmatprep.subr.bf16.mxu1 %v5714_v47  ;;  %v5089_v47 = vld [vmem:[%s8616_s5 + $0x230] sm:$0xff] }
 0x4f5   :  { %v7799_v50 = vpop.f32.mrb[70].mxu1 }
 0x4f6   :  { %v2769_v51 = vpop.f32.mrb[71].mxu1  ;;  %5035 = vmatmul.mubr.msk.f32.gmra.mrb[96].mxu1 %vm2846_vm4, %v7799_v50 }
 0x4f7   :  { %2990 = vmatprep.mubr.f32.mxu1 %v6561_v3  ;;  %v5094_v51 = vld [vmem:[%s8616_s5 + $0x258] sm:$0xff] }
 0x4f9   :  { %v7804_v52 = vpop.f32.mrb[72].mxu1 }
 0x4fa   :  { %v2774_v53 = vpop.f32.mrb[73].mxu1  ;;  %5036 = vmatmul.mubr.msk.f32.gmra.mrb[98].mxu1 %vm2846_vm4, %v7804_v52 }
 0x4fb   :  { %2996 = vmatprep.mubr.f32.mxu1 %v6561_v3  ;;  %v5096_v53 = vld [vmem:[%s8616_s5 + $0x268] sm:$0xff] }
 0x4fc   :  { %v5742_v6 = vpack.c.bf16 %v5096_v53, %v5094_v51  ;;  %v5137_v51 = vld [vmem:[%s8616_s5 + $0x350] sm:$0xff] }
 0x4fd   :  { %v7809_v54 = vpop.f32.mrb[74].mxu1 }
 0x4fe   :  { %v2779_v1 = vpop.f32.mrb[75].mxu1  ;;  %5037 = vmatmul.mubr.msk.f32.gmra.mrb[100].mxu1 %vm2846_vm4, %v7809_v54 }
 0x4ff   :  { %3002 = vmatprep.mubr.f32.mxu1 %v6561_v3  ;;  %v5740_v1 = vpack.c.bf16 %v5091_v49, %v5089_v47  ;;  %v5135_v49 = vld [vmem:[%s8616_s5 + $0x340] sm:$0xff] }
 0x500   :  { %v5772_v53 = vpack.c.bf16 %v5137_v51, %v5135_v49 }
 0x501   :  { %v7820_v8 = vpop.f32.mrb[76].mxu1 }
 0x502   :  { %v2784_v11 = vpop.f32.mrb[77].mxu1  ;;  %5038 = vmatmul.mubr.msk.f32.gmra.mrb[102].mxu1 %vm2846_vm4, %v7820_v8 }
 0x503   :  { %3082 = vmatprep.mubr.f32.mxu1 %v6561_v3  ;;  %v5744_v11 = vpack.c.bf16 %v5095_v9, %v5093_v7  ;;  %v3831_v7 = vld [vmem:[%s8617_s7] sm:$0xff]  ;;  %v3832_v9 = vld [vmem:[%s8617_s7 + $0x8] sm:$0xff] }
 0x505   :  { %v7843_v19 = vpop.f32.mrb[78].mxu1 }
 0x506   :  { %5041 = vmatmul.mubr.msk.f32.vlgmr.msra.gmra.mrb[84].mxu1 %vm2846_vm4, %v7705_v15  ;;  %v2789_v20 = vpop.f32.mrb[79].mxu1  ;;  %v5066_v15 = vld [vmem:[%s8616_s5 + $0x1d8] sm:$0xff] }
 0x507   :  { %3088 = vmatprep.mubr.f32.mxu1 %v6561_v3  ;;  %5717 = vmatpush1.bf16.msra.mxu1 %v5716_v12  ;;  %v5726_v4 = vpack.c.bf16 %v5066_v15, %v5064_v26  ;;  %v5750_v20 = vpack.c.bf16 %v5104_v17, %v5102_v16  ;;  %v5120_v26 = vld [vmem:[%s8616_s5 + $0x2c8] sm:$0xff]  ;;  %v5122_v15 = vld [vmem:[%s8616_s5 + $0x2d8] sm:$0xff]  ;;  %v3843_v16 = vld [vmem:[%s8617_s7 + $0x60] sm:$0xff] }
 0x508   :  { %5719 = vmatprep.subr.bf16.mxu1 %v5718_v13  ;;  %v5097_v13 = vld [vmem:[%s8616_s5 + $0x270] sm:$0xff]  ;;  %v3844_v17 = vld [vmem:[%s8617_s7 + $0x68] sm:$0xff] }
 0x509   :  { %v7860_v27 = vpop.f32.mrb[80].mxu1  ;;  %v5748_v18 = vpack.c.bf16 %v5099_v14, %v5097_v13  ;;  %v3842_v13 = vld [vmem:[%s8617_s7 + $0x58] sm:$0xff] }
 0x50a   :  { %5042 = vmatmul.mubr.msk.f32.gmra.mrb[86].mxu1 %vm2846_vm4, %v7719_v23  ;;  %v2794_v29 = vpop.f32.mrb[81].mxu1  ;;  %v5070_v23 = vld [vmem:[%s8616_s5 + $0x1f8] sm:$0xff] }
 0x50b   :  { %3094 = vmatprep.mubr.f32.mxu1 %v6561_v3  ;;  %5721 = vmatpush1.bf16.msra.mxu1 %v5720_v21  ;;  %v5730_v60 = vpack.c.bf16 %v5070_v23, %v5068_v5  ;;  %v5101_v21 = vld [vmem:[%s8616_s5 + $0x290] sm:$0xff]  ;;  %v5126_v5 = vld [vmem:[%s8616_s5 + $0x2f8] sm:$0xff] }
 0x50c   :  { %5723 = vmatprep.subr.bf16.mxu1 %v5722_v22  ;;  %v5103_v22 = vld [vmem:[%s8616_s5 + $0x2a0] sm:$0xff]  ;;  %v5105_v29 = vld [vmem:[%s8616_s5 + $0x2b0] sm:$0xf] }
 0x50d   :  { %v7911_v37 = vpop.f32.mrb[82].mxu1  ;;  %v5752_v24 = vpack.c.bf16 %v5103_v22, %v5101_v21  ;;  %v3846_v21 = vld [vmem:[%s8617_s7 + $0x78] sm:$0xff] }
 0x50e   :  { %5043 = vmatmul.mubr.msk.f32.gmra.mrb[88].mxu1 %vm2846_vm4, %v7736_v56  ;;  %v2799_v39 = vpop.f32.mrb[83].mxu1 }
 0x50f   :  { %3100 = vmatprep.mubr.f32.mxu1 %v6561_v3  ;;  %5725 = vmatpush1.bf16.msra.mxu1 %v5724_v30  ;;  %v5754_v30 = vpack.c.bf16 %v5122_v15, %v5120_v26  ;;  %v3849_v15 = vld [vmem:[%s8617_s7 + $0x90] sm:$0xff] }
 0x510   :  { %5727 = vmatprep.subr.bf16.mxu1 %v5726_v4  ;;  %v5119_v4 = vld [vmem:[%s8616_s5 + $0x2c0] sm:$0xff] }
 0x511   :  { %v5756_v23 = vpack.c.bf16 %v5121_v57, %v5119_v4  ;;  %v3674_v4 = vld [vmem:[%s8618_s6] sm:$0x3] }
 0x512   :  { %5044 = vmatmul.mubr.msk.f32.gmra.mrb[90].mxu1 %vm2846_vm4, %v7753_v63  ;;  %v8218_v57 = vrot.slane %v3674_v4, %v1884_v0 }
 0x513   :  { %3106 = vmatprep.mubr.f32.mxu1 %v6561_v3  ;;  %5729 = vmatpush1.bf16.msra.mxu1 %v5728_v59  ;;  %v5758_v59 = vpack.c.bf16 %v5126_v5, %v5124_v58  ;;  %v8222_v58 = vrot.slane %v3674_v4, %v1888_v2 }
 0x514   :  { %5731 = vmatprep.subr.bf16.mxu1 %v5730_v60  ;;  %v5123_v60 = vld [vmem:[%s8616_s5 + $0x2e0] sm:$0xff] }
 0x516   :  { %5045 = vmatmul.mubr.msk.f32.gmra.mrb[92].mxu1 %vm2846_vm4, %v7770_v38 }
 0x517   :  { %3112 = vmatprep.mubr.f32.mxu1 %v6561_v3  ;;  %5733 = vmatpush1.bf16.msra.mxu1 %v5732_v31  ;;  %v5130_v31 = vld [vmem:[%s8616_s5 + $0x318] sm:$0xff] }
 0x518   :  { %5073 = vmatprep.subr.msk.mxu1 %vm2877_vm3, %v5072_v32  ;;  %v5760_v32 = vpack.c.bf16 %v5125_v61, %v5123_v60  ;;  %v5762_v33 = vpack.c.bf16 %v5130_v31, %v5128_v62 }
 0x51a   :  { %5046 = vmatmul.mubr.msk.f32.gmra.mrb[94].mxu1 %vm2846_vm4, %v7775_v41 }
 0x51b   :  { %3118 = vmatprep.mubr.f32.mxu1 %v6561_v3  ;;  %5074 = vmatpush1.msk.msra.mxu1 %vm2877_vm3, %v5071_v35  ;;  %v5129_v35 = vld [vmem:[%s8616_s5 + $0x310] sm:$0xff] }
 0x51c   :  { %5735 = vmatprep.subr.bf16.mxu1 %v5734_v36  ;;  %v5132_v36 = vld [vmem:[%s8616_s5 + $0x328] sm:$0xff]  ;;  %v5764_v39 = vpack.c.bf16 %v5129_v35, %v5127_v34 }
 0x51e   :  { %5047 = vmatmul.mubr.msk.f32.gmra.mrb[96].mxu1 %vm2846_vm4, %v7793_v48 }
 0x51f   :  { %3124 = vmatprep.mubr.f32.mxu1 %v6561_v3 }
 0x522   :  { %5048 = vmatmul.mubr.msk.f32.gmra.mrb[98].mxu1 %vm2846_vm4, %v7799_v50 }
 0x523   :  { %3130 = vmatprep.mubr.f32.mxu1 %v6561_v3 }
 0x526   :  { %5049 = vmatmul.mubr.msk.f32.gmra.mrb[100].mxu1 %vm2846_vm4, %v7804_v52 }
 0x527   :  { %3136 = vmatprep.mubr.f32.mxu1 %v6561_v3 }
 0x52a   :  { %5050 = vmatmul.mubr.msk.f32.gmra.mrb[102].mxu1 %vm2846_vm4, %v7809_v54 }
 0x52b   :  { %3239 = vmatprep.mubr.f32.mxu1 %v6561_v3 }
 0x52e   :  { %5075 = vmatmul.mubr.msk.f32.vlgmr.msra.gmra.mrb[84].mxu1 %vm2846_vm4, %v7736_v56  ;;  %v5100_v56 = vld [vmem:[%s8616_s5 + $0x288] sm:$0xff] }
 0x52f   :  { %3245 = vmatprep.mubr.f32.mxu1 %v6561_v3  ;;  %5737 = vmatpush1.bf16.msra.mxu1 %v5736_v45  ;;  %v5746_v12 = vpack.c.bf16 %v5100_v56, %v5098_v10  ;;  %v5138_v45 = vld [vmem:[%s8616_s5 + $0x358] sm:$0xff]  ;;  %v5775_v10 = vpack.c.bf16 %v3832_v9, %v3831_v7  ;;  %v3833_v56 = vld [vmem:[%s8617_s7 + $0x10] sm:$0xff] }
 0x530   :  { %5739 = vmatprep.subr.bf16.mxu1 %v5738_v46  ;;  %v5768_v46 = vpack.c.bf16 %v5133_v43, %v5131_v42  ;;  %v5770_v47 = vpack.c.bf16 %v5138_v45, %v5136_v44 }
 0x532   :  { %5076 = vmatmul.mubr.msk.f32.gmra.mrb[86].mxu1 %vm2846_vm4, %v7753_v63 }
 0x533   :  { %3251 = vmatprep.mubr.f32.mxu1 %v6561_v3  ;;  %5741 = vmatpush1.bf16.msra.mxu1 %v5740_v1  ;;  %v5140_v1 = vld [vmem:[%s8616_s5 + $0x368] sm:$0xf] }
 0x534   :  { %5743 = vmatprep.subr.bf16.mxu1 %v5742_v6  ;;  %v5139_v6 = vld [vmem:[%s8616_s5 + $0x360] sm:$0xf] }
 0x536   :  { %5077 = vmatmul.mubr.msk.f32.gmra.mrb[88].mxu1 %vm2846_vm4, %v7770_v38 }
 0x537   :  { %3257 = vmatprep.mubr.f32.mxu1 %v6561_v3  ;;  %5745 = vmatpush1.bf16.msra.mxu1 %v5744_v11  ;;  %v3834_v11 = vld [vmem:[%s8617_s7 + $0x18] sm:$0xff] }
 0x538   :  { %5747 = vmatprep.subr.bf16.mxu1 %v5746_v12  ;;  %v5778_v12 = vpack.c.bf16 %v3834_v11, %v3833_v56 }
 0x53a   :  { %5078 = vmatmul.mubr.msk.f32.gmra.mrb[90].mxu1 %vm2846_vm4, %v7775_v41 }
 0x53b   :  { %3263 = vmatprep.mubr.f32.mxu1 %v6561_v3  ;;  %5749 = vmatpush1.bf16.msra.mxu1 %v5748_v18  ;;  %v5793_v18 = vpack.c.bf16 %v3844_v17, %v3843_v16 }
 0x53c   :  { %5751 = vmatprep.subr.bf16.mxu1 %v5750_v20  ;;  %v3845_v20 = vld [vmem:[%s8617_s7 + $0x70] sm:$0xff] }
 0x53d   :  { %v5796_v22 = vpack.c.bf16 %v3846_v21, %v3845_v20 }
 0x53e   :  { %5079 = vmatmul.mubr.msk.f32.gmra.mrb[92].mxu1 %vm2846_vm4, %v7793_v48 }
 0x53f   :  { %3269 = vmatprep.mubr.f32.mxu1 %v6561_v3  ;;  %5753 = vmatpush1.bf16.msra.mxu1 %v5752_v24  ;;  %v3847_v24 = vld [vmem:[%s8617_s7 + $0x80] sm:$0xff] }
 0x540   :  { %5107 = vmatprep.subr.msk.mxu1 %vm2877_vm3, %v5106_v25  ;;  %v3848_v25 = vld [vmem:[%s8617_s7 + $0x88] sm:$0xff] }
 0x541   :  { %v5799_v26 = vpack.c.bf16 %v3848_v25, %v3847_v24 }
 0x542   :  { %5080 = vmatmul.mubr.msk.f32.gmra.mrb[94].mxu1 %vm2846_vm4, %v7799_v50 }
 0x543   :  { %3275 = vmatprep.mubr.f32.mxu1 %v6561_v3  ;;  %5108 = vmatpush1.msk.msra.mxu1 %vm2877_vm3, %v5105_v29  ;;  %v3850_v29 = vld [vmem:[%s8617_s7 + $0x98] sm:$0xff] }
 0x544   :  { %5755 = vmatprep.subr.bf16.mxu1 %v5754_v30  ;;  %v5802_v30 = vpack.c.bf16 %v3850_v29, %v3849_v15 }
 0x546   :  { %5081 = vmatmul.mubr.msk.f32.gmra.mrb[96].mxu1 %vm2846_vm4, %v7804_v52 }
 0x547   :  { %3281 = vmatprep.mubr.f32.mxu1 %v6561_v3 }
 0x54a   :  { %5082 = vmatmul.mubr.msk.f32.gmra.mrb[98].mxu1 %vm2846_vm4, %v7809_v54 }
 0x54b   :  { %3287 = vmatprep.mubr.f32.mxu1 %v6561_v3 }
 0x54e   :  { %5083 = vmatmul.mubr.msk.f32.gmra.mrb[100].mxu1 %vm2846_vm4, %v7820_v8 }
 0x54f   :  { %3293 = vmatprep.mubr.f32.mxu1 %v6561_v3 }
 0x552   :  { %5084 = vmatmul.mubr.msk.f32.gmra.mrb[102].mxu1 %vm2846_vm4, %v7843_v19 }
 0x553   :  { %3416 = vmatprep.mubr.f32.mxu1 %v6561_v3 }
 0x556   :  { %5109 = vmatmul.mubr.msk.f32.vlgmr.msra.gmra.mrb[84].mxu1 %vm2846_vm4, %v7753_v63  ;;  %v5134_v63 = vld [vmem:[%s8616_s5 + $0x338] sm:$0xff] }
 0x557   :  { %3422 = vmatprep.mubr.f32.mxu1 %v6561_v3  ;;  %5757 = vmatpush1.bf16.msra.mxu1 %v5756_v23  ;;  %v5766_v40 = vpack.c.bf16 %v5134_v63, %v5132_v36 }
 0x558   :  { %5759 = vmatprep.subr.bf16.mxu1 %v5758_v59 }
 0x55a   :  { %5110 = vmatmul.mubr.msk.f32.gmra.mrb[86].mxu1 %vm2846_vm4, %v7770_v38 }
 0x55b   :  { %3428 = vmatprep.mubr.f32.mxu1 %v6561_v3  ;;  %5761 = vmatpush1.bf16.msra.mxu1 %v5760_v32 }
 0x55c   :  { %5763 = vmatprep.subr.bf16.mxu1 %v5762_v33 }
 0x55e   :  { %5111 = vmatmul.mubr.msk.f32.gmra.mrb[88].mxu1 %vm2846_vm4, %v7775_v41 }
 0x55f   :  { %3434 = vmatprep.mubr.f32.mxu1 %v6561_v3  ;;  %5765 = vmatpush1.bf16.msra.mxu1 %v5764_v39 }
 0x560   :  { %5767 = vmatprep.subr.bf16.mxu1 %v5766_v40 }
 0x562   :  { %5112 = vmatmul.mubr.msk.f32.gmra.mrb[90].mxu1 %vm2846_vm4, %v7793_v48 }
 0x563   :  { %3440 = vmatprep.mubr.f32.mxu1 %v6561_v3  ;;  %5769 = vmatpush1.bf16.msra.mxu1 %v5768_v46 }
 0x564   :  { %5771 = vmatprep.subr.bf16.mxu1 %v5770_v47 }
 0x566   :  { %5113 = vmatmul.mubr.msk.f32.gmra.mrb[92].mxu1 %vm2846_vm4, %v7799_v50 }
 0x567   :  { %3446 = vmatprep.mubr.f32.mxu1 %v6561_v3  ;;  %5773 = vmatpush1.bf16.msra.mxu1 %v5772_v53 }
 0x568   :  { %5141 = vmatprep.subr.msk.mxu1 %vm2877_vm3, %v5140_v1 }
 0x56a   :  { %5114 = vmatmul.mubr.msk.f32.gmra.mrb[94].mxu1 %vm2846_vm4, %v7804_v52 }
 0x56b   :  { %3452 = vmatprep.mubr.f32.mxu1 %v6561_v3  ;;  %5142 = vmatpush1.msk.msra.mxu1 %vm2877_vm3, %v5139_v6 }
 0x56c   :  { %5774 = vmatprep.subr.bf16.mxu1 %v6562_v28 }
 0x56e   :  { %5115 = vmatmul.mubr.msk.f32.gmra.mrb[96].mxu1 %vm2846_vm4, %v7809_v54 }
 0x56f   :  { %3458 = vmatprep.mubr.f32.mxu1 %v6561_v3 }
 0x572   :  { %5116 = vmatmul.mubr.msk.f32.gmra.mrb[98].mxu1 %vm2846_vm4, %v7820_v8 }
 0x573   :  { %3464 = vmatprep.mubr.f32.mxu1 %v6561_v3 }
 0x576   :  { %5117 = vmatmul.mubr.msk.f32.gmra.mrb[100].mxu1 %vm2846_vm4, %v7843_v19 }
 0x577   :  { %3470 = vmatprep.mubr.f32.mxu1 %v6561_v3 }
 0x57a   :  { %5118 = vmatmul.mubr.msk.f32.gmra.mrb[102].mxu1 %vm2846_vm4, %v7860_v27 }
 0x57b   :  { %3593 = vmatprep.mubr.f32.mxu1 %v6561_v3 }
 0x57e   :  { %5143 = vmatmul.mubr.msk.f32.vlgmr.msra.gmra.mrb[84].mxu1 %vm2846_vm4, %v7770_v38  ;;  %v3835_v38 = vld [vmem:[%s8617_s7 + $0x20] sm:$0xff] }
 0x57f   :  { %3599 = vmatprep.mubr.f32.mxu1 %v6561_v3  ;;  %5776 = vmatpush1.bf16.msra.mxu1 %v5775_v10 }
 0x580   :  { %5777 = vmatprep.subr.bf16.mxu1 %v6562_v28 }
 0x582   :  { %5144 = vmatmul.mubr.msk.f32.gmra.mrb[86].mxu1 %vm2846_vm4, %v7775_v41  ;;  %v3836_v41 = vld [vmem:[%s8617_s7 + $0x28] sm:$0xff] }
 0x583   :  { %3605 = vmatprep.mubr.f32.mxu1 %v6561_v3  ;;  %5779 = vmatpush1.bf16.msra.mxu1 %v5778_v12 }
 0x584   :  { %5780 = vmatprep.subr.bf16.mxu1 %v6562_v28 }
 0x586   :  { %5145 = vmatmul.mubr.msk.f32.gmra.mrb[88].mxu1 %vm2846_vm4, %v7793_v48  ;;  %v5781_v48 = vpack.c.bf16 %v3836_v41, %v3835_v38 }
 0x587   :  { %3611 = vmatprep.mubr.f32.mxu1 %v6561_v3 }
 0x588   :  { %5782 = vmatpush1.bf16.msra.mxu1 %v5781_v48 }
 0x589   :  { %5783 = vmatprep.subr.bf16.mxu1 %v6562_v28 }
 0x58a   :  { %5146 = vmatmul.mubr.msk.f32.gmra.mrb[90].mxu1 %vm2846_vm4, %v7799_v50  ;;  %v3837_v50 = vld [vmem:[%s8617_s7 + $0x30] sm:$0xff] }
 0x58b   :  { %3617 = vmatprep.mubr.f32.mxu1 %v6561_v3 }
 0x58e   :  { %5147 = vmatmul.mubr.msk.f32.gmra.mrb[92].mxu1 %vm2846_vm4, %v7804_v52  ;;  %v3838_v52 = vld [vmem:[%s8617_s7 + $0x38] sm:$0xff] }
 0x58f   :  { %3623 = vmatprep.mubr.f32.mxu1 %v6561_v3 }
 0x592   :  { %5148 = vmatmul.mubr.msk.f32.gmra.mrb[94].mxu1 %vm2846_vm4, %v7809_v54  ;;  %v5784_v54 = vpack.c.bf16 %v3838_v52, %v3837_v50 }
 0x593   :  { %3629 = vmatprep.mubr.f32.mxu1 %v6561_v3 }
 0x594   :  { %5785 = vmatpush1.bf16.msra.mxu1 %v5784_v54 }
 0x595   :  { %5786 = vmatprep.subr.bf16.mxu1 %v6562_v28 }
 0x596   :  { %5149 = vmatmul.mubr.msk.f32.gmra.mrb[96].mxu1 %vm2846_vm4, %v7820_v8  ;;  %v3839_v8 = vld [vmem:[%s8617_s7 + $0x40] sm:$0xff] }
 0x597   :  { %3635 = vmatprep.mubr.f32.mxu1 %v6561_v3 }
 0x59a   :  { %5150 = vmatmul.mubr.msk.f32.gmra.mrb[98].mxu1 %vm2846_vm4, %v7843_v19  ;;  %v3840_v19 = vld [vmem:[%s8617_s7 + $0x48] sm:$0xff] }
 0x59b   :  { %3641 = vmatprep.mubr.f32.mxu1 %v6561_v3 }
 0x59e   :  { %5151 = vmatmul.mubr.msk.f32.gmra.mrb[100].mxu1 %vm2846_vm4, %v7860_v27  ;;  %v5787_v27 = vpack.c.bf16 %v3840_v19, %v3839_v8 }
 0x59f   :  { %3647 = vmatprep.mubr.f32.mxu1 %v6561_v3 }
 0x5a0   :  { %5788 = vmatpush1.bf16.msra.mxu1 %v5787_v27 }
 0x5a1   :  { %5789 = vmatprep.subr.bf16.mxu1 %v6562_v28 }
 0x5a2   :  { %5152 = vmatmul.mubr.msk.f32.gmra.mrb[102].mxu1 %vm2846_vm4, %v7911_v37  ;;  %v3841_v37 = vld [vmem:[%s8617_s7 + $0x50] sm:$0xff] }
 0x5a3   :  { %v5790_v14 = vpack.c.bf16 %v3842_v13, %v3841_v37 }
 0x5a5   :  { %5791 = vmatpush1.bf16.msra.mxu1 %v5790_v14 }
 0x5a6   :  { %5792 = vmatprep.subr.bf16.mxu1 %v6562_v28 }
 0x5a9   :  { %5794 = vmatpush1.bf16.msra.mxu1 %v5793_v18 }
 0x5aa   :  { %5795 = vmatprep.subr.bf16.mxu1 %v6562_v28 }
 0x5ad   :  { %5797 = vmatpush1.bf16.msra.mxu1 %v5796_v22 }
 0x5ae   :  { %5798 = vmatprep.subr.bf16.mxu1 %v6562_v28 }
 0x5b1   :  { %5800 = vmatpush1.bf16.msra.mxu1 %v5799_v26 }
 0x5b2   :  { %5801 = vmatprep.subr.bf16.mxu1 %v6562_v28 }
 0x5b5   :  { %5803 = vmatpush1.bf16.msra.mxu1 %v5802_v30 }
 0x5b6   :  { %5804 = vmatprep.subr.bf16.mxu1 %v6562_v28 }
 0x651   :  { %v3595_v5 = vpop.f32.mrb[84].mxu1 }
 0x652   :  { %v3686_v23 = vadd.f32 %v8218_v57, %v3595_v5  ;;  %v3597_v59 = vpop.f32.mrb[85].mxu1 }
 0x653   :  { %v3687_v60 = vadd.f32 %v8222_v58, %v3597_v59 }
 0x654   :  { %v5153_v61 = vmul.f32 -1.442695, %v3686_v23 }
 0x655   :  { %v5154_v62 = vmul.f32 -1.442695, %v3687_v60  ;;  %v3601_v31 = vpop.f32.mrb[86].mxu1 }
 0x656   :  { %6473 = vpow2.f32 %v5153_v61  ;;  %v3688_v32 = vadd.f32 %v8218_v57, %v3601_v31  ;;  %v3603_v33 = vpop.f32.mrb[87].mxu1 }
 0x657   :  { %6475 = vpow2.f32 %v5154_v62  ;;  %v3689_v0 = vadd.f32 %v8222_v58, %v3603_v33 }
 0x658   :  { %v5155_v34 = vmul.f32 -1.442695, %v3688_v32 }
 0x659   :  { %v5156_v55 = vmul.f32 -1.442695, %v3689_v0  ;;  %v3607_v2 = vpop.f32.mrb[88].mxu1 }
 0x65a   :  { %6477 = vpow2.f32 %v5155_v34  ;;  %v3690_v35 = vadd.f32 %v8218_v57, %v3607_v2  ;;  %v3609_v36 = vpop.f32.mrb[89].mxu1 }
 0x65b   :  { %6479 = vpow2.f32 %v5156_v55  ;;  %v3691_v63 = vadd.f32 %v8222_v58, %v3609_v36 }
 0x65c   :  { %v5157_v39 = vmul.f32 -1.442695, %v3690_v35 }
 0x65d   :  { %v5158_v40 = vmul.f32 -1.442695, %v3691_v63  ;;  %v3613_v42 = vpop.f32.mrb[90].mxu1 }
 0x65e   :  { %6481 = vpow2.f32 %v5157_v39  ;;  %v3692_v43 = vadd.f32 %v8218_v57, %v3613_v42  ;;  %v3615_v44 = vpop.f32.mrb[91].mxu1 }
 0x65f   :  { %6483 = vpow2.f32 %v5158_v40  ;;  %v3693_v45 = vadd.f32 %v8222_v58, %v3615_v44 }
 0x660   :  { %v6474_v46 = vpop.eup %6473  ;;  %v5159_v47 = vmul.f32 -1.442695, %v3692_v43 }
 0x661   :  { %v6476_v49 = vpop.eup %6475  ;;  %v3766_v51 = vadd.f32 1.0, %v6474_v46  ;;  %v5160_v53 = vmul.f32 -1.442695, %v3693_v45  ;;  %v3619_v1 = vpop.f32.mrb[92].mxu1 }
 0x662   :  { %v3767_v6 = vadd.f32 1.0, %v6476_v49  ;;  %6485 = vpow2.f32 %v5159_v47  ;;  %v3694_v7 = vadd.f32 %v8218_v57, %v3619_v1  ;;  %v3621_v9 = vpop.f32.mrb[93].mxu1 }
 0x663   :  { %6487 = vrcp.f32 %v3766_v51  ;;  %v3695_v10 = vadd.f32 %v8222_v58, %v3621_v9 }
 0x664   :  { %v6478_v56 = vpop.eup %6477  ;;  %6489 = vrcp.f32 %v3767_v6  ;;  %v5161_v11 = vmul.f32 -1.442695, %v3694_v7 }
 0x665   :  { %v6480_v12 = vpop.eup %6479  ;;  %v3768_v38 = vadd.f32 1.0, %v6478_v56  ;;  %6491 = vpow2.f32 %v5160_v53  ;;  %v5162_v41 = vmul.f32 -1.442695, %v3695_v10  ;;  %v3625_v48 = vpop.f32.mrb[94].mxu1 }
 0x666   :  { %v3769_v50 = vadd.f32 1.0, %v6480_v12  ;;  %6493 = vpow2.f32 %v5161_v11  ;;  %v3696_v52 = vadd.f32 %v8218_v57, %v3625_v48  ;;  %v3627_v54 = vpop.f32.mrb[95].mxu1 }
 0x667   :  { %6495 = vrcp.f32 %v3768_v38  ;;  %v3697_v8 = vadd.f32 %v8222_v58, %v3627_v54 }
 0x668   :  { %v6482_v19 = vpop.eup %6481  ;;  %6497 = vrcp.f32 %v3769_v50  ;;  %v5163_v27 = vmul.f32 -1.442695, %v3696_v52 }
 0x669   :  { %v6484_v37 = vpop.eup %6483  ;;  %v3770_v13 = vadd.f32 1.0, %v6482_v19  ;;  %6499 = vpow2.f32 %v5162_v41  ;;  %v5164_v14 = vmul.f32 -1.442695, %v3697_v8  ;;  %v3631_v16 = vpop.f32.mrb[96].mxu1 }
 0x66a   :  { %v3771_v17 = vadd.f32 1.0, %v6484_v37  ;;  %6501 = vpow2.f32 %v5163_v27  ;;  %v3698_v18 = vadd.f32 %v8218_v57, %v3631_v16  ;;  %v3633_v20 = vpop.f32.mrb[97].mxu1 }
 0x66b   :  { %6503 = vrcp.f32 %v3770_v13  ;;  %v3699_v21 = vadd.f32 %v8222_v58, %v3633_v20 }
 0x66c   :  { %v6486_v22 = vpop.eup %6485  ;;  %6505 = vrcp.f32 %v3771_v17  ;;  %v5165_v24 = vmul.f32 -1.442695, %v3698_v18 }
 0x66d   :  { %v6488_v25 = vpop.eup %6487  ;;  %6507 = vpow2.f32 %v5164_v14  ;;  %v5166_v26 = vmul.f32 -1.442695, %v3699_v21  ;;  %v3637_v15 = vpop.f32.mrb[98].mxu1  ;;  %v3772_v23 = vadd.f32 1.0, %v6486_v22 }
 0x66e   :  { %v6490_v29 = vpop.eup %6489  ;;  %6509 = vpow2.f32 %v5165_v24  ;;  %v3700_v30 = vadd.f32 %v8218_v57, %v3637_v15  ;;  %v3639_v4 = vpop.f32.mrb[99].mxu1 }
 0x66f   :  { %v6492_v5 = vpop.eup %6491  ;;  %v3701_v59 = vadd.f32 %v8222_v58, %v3639_v4  ;;  %5173 = vmatprep.mubr.msk.f32.mxu1 %vm96_vm0, %v6490_v29  ;;  %6511 = vpow2.f32 %v5166_v26 }
 0x670   :  { %v6494_v60 = vpop.eup %6493  ;;  %v3773_v61 = vadd.f32 1.0, %v6492_v5  ;;  %v5167_v62 = vmul.f32 -1.442695, %v3700_v30  ;;  %3946 = vmatmul.mubr.f32.vlgmr.msra.gmra.mrb[104].mxu1 %v6488_v25 }
 0x671   :  { %v6496_v31 = vpop.eup %6495  ;;  %v5168_v32 = vmul.f32 -1.442695, %v3701_v59  ;;  %v3643_v33 = vpop.f32.mrb[100].mxu1  ;;  %v3774_v35 = vadd.f32 1.0, %v6494_v60 }
 0x672   :  { %v6498_v0 = vpop.eup %6497  ;;  %6513 = vrcp.f32 %v3773_v61  ;;  %v3702_v34 = vadd.f32 %v8218_v57, %v3643_v33  ;;  %v3645_v55 = vpop.f32.mrb[101].mxu1 }
 0x673   :  { %v6500_v2 = vpop.eup %6499  ;;  %6515 = vrcp.f32 %v3772_v23  ;;  %v3703_v36 = vadd.f32 %v8222_v58, %v3645_v55  ;;  %5174 = vmatprep.mubr.msk.f32.mxu1 %vm96_vm0, %v6498_v0 }
 0x674   :  { %v6502_v63 = vpop.eup %6501  ;;  %v3775_v39 = vadd.f32 1.0, %v6500_v2  ;;  %6517 = vpow2.f32 %v5167_v62  ;;  %v5169_v40 = vmul.f32 -1.442695, %v3702_v34  ;;  %3951 = vmatmul.mubr.f32.gmra.mrb[106].mxu1 %v6496_v31 }
 0x675   :  { %v6504_v42 = vpop.eup %6503  ;;  %6519 = vpow2.f32 %v5168_v32  ;;  %v5170_v43 = vmul.f32 -1.442695, %v3703_v36  ;;  %v3649_v44 = vpop.f32.mrb[102].mxu1  ;;  %v3776_v51 = vadd.f32 1.0, %v6502_v63 }
 0x676   :  { %v6506_v45 = vpop.eup %6505  ;;  %6521 = vrcp.f32 %v3775_v39  ;;  %v3704_v46 = vadd.f32 %v8218_v57, %v3649_v44  ;;  %v3651_v47 = vpop.f32.mrb[103].mxu1 }
 0x677   :  { %v6508_v49 = vpop.eup %6507  ;;  %6523 = vrcp.f32 %v3774_v35  ;;  %v3705_v53 = vadd.f32 %v8222_v58, %v3651_v47  ;;  %5175 = vmatprep.mubr.msk.f32.mxu1 %vm96_vm0, %v6506_v45  ;;  %v5188_v45 = vld [vmem:[%s8619_s9 + $0x50] sm:$0xff] }
 0x678   :  { %v6510_v1 = vpop.eup %6509  ;;  %v3777_v6 = vadd.f32 1.0, %v6508_v49  ;;  %6525 = vpow2.f32 %v5169_v40  ;;  %v5171_v7 = vmul.f32 -1.442695, %v3704_v46  ;;  %3956 = vmatmul.mubr.f32.gmra.mrb[108].mxu1 %v6504_v42  ;;  %v5189_v46 = vld [vmem:[%s8619_s9 + $0x58] sm:$0xff] }
 0x679   :  { %6527 = vpow2.f32 %v5170_v43  ;;  %v6512_v9 = vpop.eup %6511  ;;  %v5172_v10 = vmul.f32 -1.442695, %v3705_v53  ;;  %v3778_v56 = vadd.f32 1.0, %v6510_v1  ;;  %v5820_v53 = vpack.c.bf16 %v5189_v46, %v5188_v45  ;;  %v5190_v1 = vld [vmem:[%s8619_s9 + $0x60] sm:$0xff]  ;;  %v5209_v46 = vld [vmem:[%s8619_s9 + $0xe8] sm:$0xff] }
 0x67a   :  { %6529 = vrcp.f32 %v3777_v6  ;;  %v3779_v57 = vadd.f32 1.0, %v6512_v9  ;;  %v5191_v6 = vld [vmem:[%s8619_s9 + $0x68] sm:$0xff]  ;;  %v5208_v45 = vld [vmem:[%s8619_s9 + $0xe0] sm:$0xff] }
 0x67b   :  { %6531 = vrcp.f32 %v3776_v51  ;;  %v3826_v51 = vld [vmem:[%s8620_s8] sm:$0xff]  ;;  %v5823_v9 = vpack.c.bf16 %v5191_v6, %v5190_v1  ;;  %v5214_v6 = vld [vmem:[%s8619_s9 + $0x108] sm:$0xff] }
 0x67c   :  { %v6514_v11 = vpop.eup %6513  ;;  %6533 = vpow2.f32 %v5171_v7  ;;  %v3827_v7 = vld [vmem:[%s8620_s8 + $0x8] sm:$0xff]  ;;  %v5213_v1 = vld [vmem:[%s8619_s9 + $0x100] sm:$0xff] }
 0x67d   :  { %v6516_v12 = vpop.eup %6515  ;;  %6535 = vrcp.f32 %v3779_v57  ;;  %5176 = vmatprep.mubr.msk.f32.mxu1 %vm96_vm0, %v6514_v11  ;;  %v3828_v57 = vld [vmem:[%s8620_s8 + $0x10] sm:$0xff] }
 0x67e   :  { %v6518_v58 = vpop.eup %6517  ;;  %6537 = vpow2.f32 %v5172_v10  ;;  %3961 = vmatmul.mubr.f32.gmra.mrb[110].mxu1 %v6516_v12  ;;  %v5192_v10 = vld [vmem:[%s8619_s9 + $0x70] sm:$0xff]  ;;  %v5194_v12 = vld [vmem:[%s8619_s9 + $0x80] sm:$0xff] }
 0x67f   :  { %v6520_v38 = vpop.eup %6519  ;;  %6539 = vrcp.f32 %v3778_v56  ;;  %v3780_v41 = vadd.f32 1.0, %v6518_v58  ;;  %v5193_v56 = vld [vmem:[%s8619_s9 + $0x78] sm:$0xff]  ;;  %v5195_v58 = vld [vmem:[%s8619_s9 + $0x88] sm:$0xff] }
 0x680   :  { %v6522_v48 = vpop.eup %6521  ;;  %v3781_v50 = vadd.f32 1.0, %v6520_v38  ;;  %v5826_v11 = vpack.c.bf16 %v5193_v56, %v5192_v10  ;;  %v3829_v38 = vld [vmem:[%s8620_s8 + $0x18] sm:$0xff] }
 0x681   :  { %v6524_v52 = vpop.eup %6523  ;;  %5177 = vmatprep.mubr.msk.f32.mxu1 %vm96_vm0, %v6522_v48  ;;  %v5196_v48 = vld [vmem:[%s8619_s9 + $0x90] sm:$0xff]  ;;  %v5216_v10 = vld [vmem:[%s8619_s9 + $0x118] sm:$0xff] }
 0x682   :  { %v6526_v54 = vpop.eup %6525  ;;  %6541 = vrcp.f32 %v3781_v50  ;;  %3966 = vmatmul.mubr.f32.gmra.mrb[112].mxu1 %v6524_v52  ;;  %v5197_v50 = vld [vmem:[%s8619_s9 + $0x98] sm:$0xff]  ;;  %v3830_v52 = vld [vmem:[%s8620_s8 + $0x20] sm:$0xff] }
 0x683   :  { %v6528_v8 = vpop.eup %6527  ;;  %6543 = vrcp.f32 %v3780_v41  ;;  %v3782_v19 = vadd.f32 1.0, %v6526_v54  ;;  %v5829_v41 = vpack.c.bf16 %v5195_v58, %v5194_v12  ;;  %v5832_v54 = vpack.c.bf16 %v5197_v50, %v5196_v48  ;;  %v5219_v58 = vld [vmem:[%s8619_s9 + $0x130] sm:$0xff]  ;;  %v5222_v48 = vld [vmem:[%s8619_s9 + $0x140] sm:$0xff]  ;;  %v5223_v50 = vld [vmem:[%s8619_s9 + $0x148] sm:$0xff] }
 0x684   :  { %v6530_v27 = vpop.eup %6529  ;;  %v3783_v37 = vadd.f32 1.0, %v6528_v8  ;;  %v4538_v8 = vld [vmem:[%s8621_s11] sm:$0xff] }
 0x685   :  { %v6532_v13 = vpop.eup %6531  ;;  %5178 = vmatprep.mubr.msk.f32.mxu1 %vm96_vm0, %v6530_v27 }
 0x686   :  { %v6534_v14 = vpop.eup %6533  ;;  %6545 = vrcp.f32 %v3783_v37  ;;  %3971 = vmatmul.mubr.f32.gmra.mrb[114].mxu1 %v6532_v13  ;;  %v4102_v37 = vld [vmem:[%s8619_s9] sm:$0xff]  ;;  %v4103_v13 = vld [vmem:[%s8619_s9 + $0x8] sm:$0xff] }
 0x687   :  { %v6536_v16 = vpop.eup %6535  ;;  %6547 = vrcp.f32 %v3782_v19  ;;  %v3784_v18 = vadd.f32 1.0, %v6534_v14  ;;  %v4539_v19 = vld [vmem:[%s8621_s11 + $0x8] sm:$0xff] }
 0x688   :  { %v6538_v17 = vpop.eup %6537  ;;  %5179 = vmatprep.mubr.msk.f32.mxu1 %vm96_vm0, %v6536_v16  ;;  %v5895_v27 = vpack.c.bf16 %v4539_v19, %v4538_v8  ;;  %v5225_v8 = vld [vmem:[%s8619_s9 + $0x158] sm:$0xff] }
 0x689   :  { %v6540_v20 = vpop.eup %6539  ;;  %v3785_v21 = vadd.f32 1.0, %v6538_v17  ;;  %v5835_v17 = vpack.c.bf16 %v4103_v13, %v4102_v37  ;;  %v5227_v37 = vld [vmem:[%s8619_s9 + $0x168] sm:$0xff] }
 0x68a   :  { %3976 = vmatmul.mubr.f32.gmra.mrb[116].mxu1 %v6540_v20  ;;  %5896 = vmatpush3.bf16.msra.mxu0 %v5895_v27  ;;  %v4105_v20 = vld [vmem:[%s8619_s9 + $0x18] sm:$0xff]  ;;  %v5226_v27 = vld [vmem:[%s8619_s9 + $0x160] sm:$0xff] }
 0x68b   :  { %6549 = vrcp.f32 %v3785_v21  ;;  %5897 = vmatprep.subr.bf16.mxu0 %v6562_v28  ;;  %v5886_v13 = vpack.c.bf16 %v5227_v37, %v5226_v27  ;;  %v4646_v27 = vld [vmem:[%s8622_s13 + $0x48] sm:$0xff] }
 0x68c   :  { %v6542_v22 = vpop.eup %6541  ;;  %6551 = vrcp.f32 %v3784_v18  ;;  %v4104_v18 = vld [vmem:[%s8619_s9 + $0x10] sm:$0xff] }
 0x68d   :  { %v6544_v24 = vpop.eup %6543  ;;  %5180 = vmatprep.mubr.msk.f32.mxu1 %vm96_vm0, %v6542_v22 }
 0x68e   :  { %3981 = vmatmul.mubr.f32.gmra.mrb[118].mxu1 %v6544_v24  ;;  %v5838_v24 = vpack.c.bf16 %v4105_v20, %v4104_v18  ;;  %v5230_v18 = vld [vmem:[%s8619_s9 + $0x180] sm:$0xff]  ;;  %v5231_v20 = vld [vmem:[%s8619_s9 + $0x188] sm:$0xff] }
 0x690   :  { %v6546_v25 = vpop.eup %6545 }
 0x691   :  { %v6548_v26 = vpop.eup %6547  ;;  %5181 = vmatprep.mubr.msk.f32.mxu1 %vm96_vm0, %v6546_v25  ;;  %v4106_v25 = vld [vmem:[%s8619_s9 + $0x20] sm:$0xff] }
 0x692   :  { %3986 = vmatmul.mubr.f32.gmra.mrb[120].mxu1 %v6548_v26  ;;  %v4107_v26 = vld [vmem:[%s8619_s9 + $0x28] sm:$0xff] }
 0x695   :  { %v6550_v15 = vpop.eup %6549 }
 0x696   :  { %v6552_v29 = vpop.eup %6551  ;;  %5182 = vmatprep.mubr.msk.f32.mxu1 %vm96_vm0, %v6550_v15 }
 0x697   :  { %3991 = vmatmul.mubr.f32.gmra.mrb[122].mxu1 %v6552_v29 }
 0x698   :  { %5362 = vmatprep.mubr.msk.f32.mxu1 %vm6563_vm5, %v6561_v3 }
 0x743   :  { %v3947_v30 = vpop.f32.mrb[104].mxu1 }
 0x744   :  { %v3949_v4 = vpop.f32.mrb[105].mxu1 }
 0x745   :  { %v4108_v4 = vld [vmem:[%s8619_s9 + $0x30] sm:$0xff] }
 0x747   :  { %v3952_v5 = vpop.f32.mrb[106].mxu1 }
 0x748   :  { %v5805_v23 = vpack.c.bf16 %v3952_v5, %v3947_v30  ;;  %v3954_v59 = vpop.f32.mrb[107].mxu1  ;;  %v5841_v30 = vpack.c.bf16 %v4107_v26, %v4106_v25  ;;  %v4109_v5 = vld [vmem:[%s8619_s9 + $0x38] sm:$0xff]  ;;  %v4542_v26 = vld [vmem:[%s8621_s11 + $0x20] sm:$0xff] }
 0x74a   :  { %5806 = vmatpush3.bf16.msra.mxu1 %v5805_v23 }
 0x74b   :  { %v3957_v60 = vpop.f32.mrb[108].mxu1  ;;  %5807 = vmatprep.subr.bf16.mxu1 %v6562_v28 }
 0x74c   :  { %v3959_v61 = vpop.f32.mrb[109].mxu1 }
 0x74d   :  { %v4110_v61 = vld [vmem:[%s8619_s9 + $0x40] sm:$0xff] }
 0x751   :  { %v3962_v62 = vpop.f32.mrb[110].mxu1 }
 0x752   :  { %v5808_v31 = vpack.c.bf16 %v3962_v62, %v3957_v60  ;;  %v3964_v32 = vpop.f32.mrb[111].mxu1  ;;  %v5844_v60 = vpack.c.bf16 %v4109_v5, %v4108_v4  ;;  %v4111_v62 = vld [vmem:[%s8619_s9 + $0x48] sm:$0xff]  ;;  %v4546_v5 = vld [vmem:[%s8621_s11 + $0x40] sm:$0xff] }
 0x754   :  { %5809 = vmatpush3.bf16.msra.mxu1 %v5808_v31 }
 0x755   :  { %v3967_v33 = vpop.f32.mrb[112].mxu1  ;;  %5810 = vmatprep.subr.bf16.mxu1 %v6562_v28 }
 0x756   :  { %v3969_v0 = vpop.f32.mrb[113].mxu1 }
 0x757   :  { %v5200_v0 = vld [vmem:[%s8619_s9 + $0xa0] sm:$0xff] }
 0x759   :  { %v3972_v34 = vpop.f32.mrb[114].mxu1 }
 0x75a   :  { %v5811_v55 = vpack.c.bf16 %v3972_v34, %v3967_v33  ;;  %v3974_v2 = vpop.f32.mrb[115].mxu1  ;;  %v5847_v33 = vpack.c.bf16 %v4111_v62, %v4110_v61  ;;  %v5201_v34 = vld [vmem:[%s8619_s9 + $0xa8] sm:$0xff]  ;;  %v4549_v61 = vld [vmem:[%s8621_s11 + $0x58] sm:$0xff] }
 0x75b   :  { %v5202_v2 = vld [vmem:[%s8619_s9 + $0xb0] sm:$0xff] }
 0x75c   :  { %5812 = vmatpush3.bf16.msra.mxu1 %v5811_v55  ;;  %v5850_v55 = vpack.c.bf16 %v5201_v34, %v5200_v0  ;;  %v4553_v34 = vld [vmem:[%s8621_s11 + $0x78] sm:$0xff] }
 0x75d   :  { %v3977_v35 = vpop.f32.mrb[116].mxu1  ;;  %5813 = vmatprep.subr.bf16.mxu1 %v6562_v28 }
 0x75e   :  { %v3979_v36 = vpop.f32.mrb[117].mxu1 }
 0x761   :  { %v3982_v63 = vpop.f32.mrb[118].mxu1 }
 0x762   :  { %v5814_v39 = vpack.c.bf16 %v3982_v63, %v3977_v35  ;;  %v3984_v40 = vpop.f32.mrb[119].mxu1  ;;  %v5203_v35 = vld [vmem:[%s8619_s9 + $0xb8] sm:$0xff]  ;;  %v5204_v63 = vld [vmem:[%s8619_s9 + $0xc0] sm:$0xff] }
 0x763   :  { %v5853_v36 = vpack.c.bf16 %v5203_v35, %v5202_v2  ;;  %v4637_v2 = vld [vmem:[%s8622_s13] sm:$0xff]  ;;  %v4638_v35 = vld [vmem:[%s8622_s13 + $0x8] sm:$0xff] }
 0x764   :  { %5815 = vmatpush3.bf16.msra.mxu1 %v5814_v39  ;;  %v5205_v39 = vld [vmem:[%s8619_s9 + $0xc8] sm:$0xff] }
 0x765   :  { %v3987_v42 = vpop.f32.mrb[120].mxu1  ;;  %5816 = vmatprep.subr.bf16.mxu1 %v6562_v28  ;;  %v5856_v40 = vpack.c.bf16 %v5205_v39, %v5204_v63 }
 0x766   :  { %v3989_v43 = vpop.f32.mrb[121].mxu1 }
 0x767   :  { %v5207_v43 = vld [vmem:[%s8619_s9 + $0xd8] sm:$0xff] }
 0x76a   :  { %v3992_v44 = vpop.f32.mrb[122].mxu1 }
 0x76b   :  { %v5817_v47 = vpack.c.bf16 %v3992_v44, %v3987_v42  ;;  %v3994_v49 = vpop.f32.mrb[123].mxu1  ;;  %v5206_v42 = vld [vmem:[%s8619_s9 + $0xd0] sm:$0xff] }
 0x76c   :  { %v5859_v44 = vpack.c.bf16 %v5207_v43, %v5206_v42  ;;  %v5211_v49 = vld [vmem:[%s8619_s9 + $0xf0] sm:$0xff] }
 0x76d   :  { %5818 = vmatpush3.bf16.msra.mxu1 %v5817_v47  ;;  %v5862_v47 = vpack.c.bf16 %v5209_v46, %v5208_v45 }
 0x76e   :  { %5819 = vmatprep.subr.bf16.mxu1 %v6562_v28 }
 0x770   :  { %5363 = vmatmul.mubr.msk.f32.vlgmr.msra.gmra.mrb[124].mxu1 %vm3996_vm6, %v3826_v51  ;;  %v5212_v51 = vld [vmem:[%s8619_s9 + $0xf8] sm:$0xff] }
 0x771   :  { %5365 = vmatprep.mubr.msk.f32.mxu1 %vm6563_vm5, %v6561_v3  ;;  %5821 = vmatpush3.bf16.msra.mxu1 %v5820_v53  ;;  %v5865_v53 = vpack.c.bf16 %v5212_v51, %v5211_v49 }
 0x772   :  { %5822 = vmatprep.subr.bf16.mxu1 %v6562_v28 }
 0x774   :  { %5366 = vmatmul.mubr.msk.f32.gmra.mrb[126].mxu1 %vm3996_vm6, %v3827_v7  ;;  %v5868_v7 = vpack.c.bf16 %v5214_v6, %v5213_v1  ;;  %v5233_v1 = vld [vmem:[%s8623_s10] ss:$0 sm:$0xff] }
 0x775   :  { %5368 = vmatprep.mubr.msk.f32.mxu1 %vm6563_vm5, %v6561_v3  ;;  %5824 = vmatpush3.bf16.msra.mxu1 %v5823_v9  ;;  %v5215_v9 = vld [vmem:[%s8619_s9 + $0x110] sm:$0xff] }
 0x776   :  { %5825 = vmatprep.subr.bf16.mxu1 %v6562_v28  ;;  %v5871_v56 = vpack.c.bf16 %v5216_v10, %v5215_v9 }
 0x778   :  { %5369 = vmatmul.mubr.msk.f32.gmra.mrb[128].mxu1 %vm3996_vm6, %v3828_v57  ;;  %v5217_v57 = vld [vmem:[%s8619_s9 + $0x120] sm:$0xff] }
 0x779   :  { %5371 = vmatprep.mubr.msk.f32.mxu1 %vm6563_vm5, %v6561_v3  ;;  %5827 = vmatpush3.bf16.msra.mxu1 %v5826_v11  ;;  %v5218_v11 = vld [vmem:[%s8619_s9 + $0x128] sm:$0xff] }
 0x77a   :  { %5828 = vmatprep.subr.bf16.mxu1 %v6562_v28  ;;  %v5874_v12 = vpack.c.bf16 %v5218_v11, %v5217_v57 }
 0x77c   :  { %5372 = vmatmul.mubr.msk.f32.gmra.mrb[130].mxu1 %vm3996_vm6, %v3829_v38  ;;  %v5220_v38 = vld [vmem:[%s8619_s9 + $0x138] sm:$0xff] }
 0x77d   :  { %5374 = vmatprep.mubr.msk.f32.mxu1 %vm6563_vm5, %v6561_v3  ;;  %5830 = vmatpush3.bf16.msra.mxu1 %v5829_v41  ;;  %v5877_v41 = vpack.c.bf16 %v5220_v38, %v5219_v58  ;;  %v4640_v58 = vld [vmem:[%s8622_s13 + $0x18] sm:$0xff] }
 0x77e   :  { %5831 = vmatprep.subr.bf16.mxu1 %v6562_v28 }
 0x780   :  { %5375 = vmatmul.mubr.msk.f32.gmra.mrb[132].mxu1 %vm3996_vm6, %v3830_v52  ;;  %v5880_v52 = vpack.c.bf16 %v5223_v50, %v5222_v48  ;;  %v4642_v48 = vld [vmem:[%s8622_s13 + $0x28] sm:$0xff] }
 0x781   :  { %5833 = vmatpush3.bf16.msra.mxu1 %v5832_v54  ;;  %5397 = vmatprep.mubr.msk.f32.mxu1 %vm6563_vm5, %v6561_v3  ;;  %v5224_v54 = vld [vmem:[%s8619_s9 + $0x150] sm:$0xff] }
 0x782   :  { %5834 = vmatprep.subr.bf16.mxu1 %v6562_v28  ;;  %v5883_v19 = vpack.c.bf16 %v5225_v8, %v5224_v54  ;;  %v4644_v54 = vld [vmem:[%s8622_s13 + $0x38] sm:$0xff] }
 0x843   :  { %v4078_v14 = vpop.f32.mrb[124].mxu1 }
 0x844   :  { %v5364_v16 = vpop.f32.mrb[125].mxu1 }
 0x845   :  { %v5229_v16 = vld [vmem:[%s8619_s9 + $0x178] sm:$0xff] }
 0x847   :  { %v4083_v21 = vpop.f32.mrb[126].mxu1 }
 0x848   :  { %5398 = vmatmul.mubr.msk.f32.vlgmr.msra.gmra.mrb[134].mxu1 %vm3996_vm6, %v4083_v21  ;;  %v5367_v22 = vpop.f32.mrb[127].mxu1  ;;  %v5892_v21 = vpack.c.bf16 %v5231_v20, %v5230_v18  ;;  %v4650_v18 = vld [vmem:[%s8622_s13 + $0x68] sm:$0xff] }
 0x849   :  { %5836 = vmatpush3.bf16.msra.mxu1 %v5835_v17  ;;  %5420 = vmatprep.mubr.msk.f32.mxu1 %vm6563_vm5, %v6561_v3  ;;  %v4540_v22 = vld [vmem:[%s8621_s11 + $0x10] sm:$0xff] }
 0x84a   :  { %5837 = vmatprep.subr.bf16.mxu1 %v6562_v28 }
 0x84b   :  { %v4088_v15 = vpop.f32.mrb[128].mxu1 }
 0x84c   :  { %v5370_v29 = vpop.f32.mrb[129].mxu1 }
 0x84d   :  { %5839 = vmatpush3.bf16.msra.mxu1 %v5838_v24  ;;  %v4541_v24 = vld [vmem:[%s8621_s11 + $0x18] sm:$0xff]  ;;  %v4544_v29 = vld [vmem:[%s8621_s11 + $0x30] sm:$0xff] }
 0x84e   :  { %5840 = vmatprep.subr.bf16.mxu1 %v6562_v28  ;;  %v5898_v25 = vpack.c.bf16 %v4541_v24, %v4540_v22  ;;  %v4652_v22 = vld [vmem:[%s8622_s13 + $0x78] sm:$0xff] }
 0x84f   :  { %v8364_v23 = vpop.f32.mrb[130].mxu1 }
 0x850   :  { %v5373_v59 = vpop.f32.mrb[131].mxu1  ;;  %5899 = vmatpush3.bf16.msra.mxu0 %v5898_v25  ;;  %v5235_v25 = vld [vmem:[%s8624_s12] ss:$0 sm:$0xff] }
 0x851   :  { %5842 = vmatpush3.bf16.msra.mxu1 %v5841_v30  ;;  %5900 = vmatprep.subr.bf16.mxu0 %v6562_v28  ;;  %v4545_v30 = vld [vmem:[%s8621_s11 + $0x38] sm:$0xff]  ;;  %v4548_v59 = vld [vmem:[%s8621_s11 + $0x50] sm:$0xff] }
 0x852   :  { %5843 = vmatprep.subr.bf16.mxu1 %v6562_v28  ;;  %v5904_v4 = vpack.c.bf16 %v4545_v30, %v4544_v29  ;;  %v5910_v62 = vpack.c.bf16 %v4549_v61, %v4548_v59 }
 0x853   :  { %v8373_v31 = vpop.f32.mrb[132].mxu1 }
 0x854   :  { %v5376_v32 = vpop.f32.mrb[133].mxu1 }
 0x855   :  { %5845 = vmatpush3.bf16.msra.mxu1 %v5844_v60  ;;  %v4551_v32 = vld [vmem:[%s8621_s11 + $0x68] sm:$0xff] }
 0x856   :  { %5846 = vmatprep.subr.bf16.mxu1 %v6562_v28 }
 0x859   :  { %5848 = vmatpush3.bf16.msra.mxu1 %v5847_v33  ;;  %v4552_v33 = vld [vmem:[%s8621_s11 + $0x70] sm:$0xff] }
 0x85a   :  { %5849 = vmatprep.subr.bf16.mxu1 %v6562_v28 }
 0x85c   :  { %5421 = vmatmul.mubr.msk.f32.vlgmr.msra.gmra.mrb[136].mxu1 %vm3996_vm6, %v4078_v14  ;;  %v5228_v14 = vld [vmem:[%s8619_s9 + $0x170] sm:$0xff] }
 0x85d   :  { %5851 = vmatpush3.bf16.msra.mxu1 %v5850_v55  ;;  %5443 = vmatprep.mubr.msk.f32.mxu1 %vm6563_vm5, %v6561_v3  ;;  %v5889_v17 = vpack.c.bf16 %v5229_v16, %v5228_v14  ;;  %v5916_v55 = vpack.c.bf16 %v4553_v34, %v4552_v33  ;;  %v4648_v14 = vld [vmem:[%s8622_s13 + $0x58] sm:$0xff] }
 0x85e   :  { %5852 = vmatprep.subr.bf16.mxu1 %v6562_v28 }
 0x861   :  { %5854 = vmatpush3.bf16.msra.mxu1 %v5853_v36  ;;  %v5919_v36 = vpack.c.bf16 %v4638_v35, %v4637_v2 }
 0x862   :  { %5855 = vmatprep.subr.bf16.mxu1 %v6562_v28 }
 0x865   :  { %5857 = vmatpush3.bf16.msra.mxu1 %v5856_v40 }
 0x866   :  { %5858 = vmatprep.subr.bf16.mxu1 %v6562_v28 }
 0x869   :  { %5860 = vmatpush3.bf16.msra.mxu1 %v5859_v44 }
 0x86a   :  { %5861 = vmatprep.subr.bf16.mxu1 %v6562_v28 }
 0x86d   :  { %5863 = vmatpush3.bf16.msra.mxu1 %v5862_v47 }
 0x86e   :  { %5864 = vmatprep.subr.bf16.mxu1 %v6562_v28 }
 0x870   :  { %5444 = vmatmul.mubr.msk.f32.vlgmr.msra.gmra.mrb[138].mxu1 %vm3996_vm6, %v4088_v15 }
 0x871   :  { %5866 = vmatpush3.bf16.msra.mxu1 %v5865_v53  ;;  %5466 = vmatprep.mubr.msk.f32.mxu1 %vm6563_vm5, %v6561_v3 }
 0x872   :  { %5867 = vmatprep.subr.bf16.mxu1 %v6562_v28 }
 0x875   :  { %5869 = vmatpush3.bf16.msra.mxu1 %v5868_v7 }
 0x876   :  { %5870 = vmatprep.subr.bf16.mxu1 %v6562_v28 }
 0x879   :  { %5872 = vmatpush3.bf16.msra.mxu1 %v5871_v56 }
 0x87a   :  { %5873 = vmatprep.subr.bf16.mxu1 %v6562_v28 }
 0x87d   :  { %5875 = vmatpush3.bf16.msra.mxu1 %v5874_v12  ;;  %v4639_v12 = vld [vmem:[%s8622_s13 + $0x10] sm:$0xff] }
 0x87e   :  { %5876 = vmatprep.subr.bf16.mxu1 %v6562_v28  ;;  %v5922_v38 = vpack.c.bf16 %v4640_v58, %v4639_v12 }
 0x881   :  { %5878 = vmatpush3.bf16.msra.mxu1 %v5877_v41  ;;  %v4641_v41 = vld [vmem:[%s8622_s13 + $0x20] sm:$0xff] }
 0x882   :  { %5879 = vmatprep.subr.bf16.mxu1 %v6562_v28  ;;  %v5925_v50 = vpack.c.bf16 %v4642_v48, %v4641_v41 }
 0x884   :  { %5467 = vmatmul.mubr.msk.f32.vlgmr.msra.gmra.mrb[140].mxu1 %vm3996_vm6, %v8364_v23  ;;  %v4547_v23 = vld [vmem:[%s8621_s11 + $0x48] sm:$0xff] }
 0x885   :  { %5881 = vmatpush3.bf16.msra.mxu1 %v5880_v52  ;;  %5489 = vmatprep.mubr.msk.f32.mxu1 %vm6563_vm5, %v6561_v3  ;;  %v5907_v60 = vpack.c.bf16 %v4547_v23, %v4546_v5  ;;  %v4643_v52 = vld [vmem:[%s8622_s13 + $0x30] sm:$0xff]  ;;  %v5237_v23 = vld [vmem:[%s8625_s14] ss:$0 sm:$0xff] }
 0x886   :  { %5882 = vmatprep.subr.bf16.mxu1 %v6562_v28  ;;  %v5928_v8 = vpack.c.bf16 %v4644_v54, %v4643_v52 }
 0x889   :  { %5884 = vmatpush3.bf16.msra.mxu1 %v5883_v19  ;;  %v4645_v19 = vld [vmem:[%s8622_s13 + $0x40] sm:$0xff] }
 0x88a   :  { %5885 = vmatprep.subr.bf16.mxu1 %v6562_v28  ;;  %v5931_v37 = vpack.c.bf16 %v4646_v27, %v4645_v19 }
 0x88d   :  { %5887 = vmatpush3.bf16.msra.mxu1 %v5886_v13  ;;  %v4647_v13 = vld [vmem:[%s8622_s13 + $0x50] sm:$0xff] }
 0x88e   :  { %5888 = vmatprep.subr.bf16.mxu1 %v6562_v28  ;;  %v5934_v16 = vpack.c.bf16 %v4648_v14, %v4647_v13 }
 0x891   :  { %5890 = vmatpush3.bf16.msra.mxu1 %v5889_v17  ;;  %v4649_v17 = vld [vmem:[%s8622_s13 + $0x60] sm:$0xff] }
 0x892   :  { %5891 = vmatprep.subr.bf16.mxu1 %v6562_v28  ;;  %v5937_v20 = vpack.c.bf16 %v4650_v18, %v4649_v17 }
 0x895   :  { %5893 = vmatpush3.bf16.msra.mxu1 %v5892_v21  ;;  %v4651_v21 = vld [vmem:[%s8622_s13 + $0x70] sm:$0xff] }
 0x896   :  { %5918 = vmatprep.subr.bf16.mxu1 %v6562_v28  ;;  %v5940_v24 = vpack.c.bf16 %v4652_v22, %v4651_v21 }
 0x898   :  { %5490 = vmatmul.mubr.msk.f32.vlgmr.msra.gmra.mrb[142].mxu1 %vm3996_vm6, %v8373_v31  ;;  %v4550_v31 = vld [vmem:[%s8621_s11 + $0x60] sm:$0xff] }
 0x899   :  { %5559 = vmatprep.mubr.msk.f32.mxu1 %vm6563_vm5, %v6561_v3  ;;  %v4543_v3 = vld [vmem:[%s8621_s11 + $0x28] sm:$0xff]  ;;  %v5913_v0 = vpack.c.bf16 %v4551_v32, %v4550_v31  ;;  %5920 = vmatpush3.bf16.msra.mxu1 %v5919_v36 }
 0x89a   :  { %v5901_v15 = vpack.c.bf16 %v4543_v3, %v4542_v26  ;;  %5921 = vmatprep.subr.bf16.mxu1 %v6562_v28 }
 0x89c   :  { %5902 = vmatpush3.bf16.msra.mxu0 %v5901_v15 }
 0x89d   :  { %5903 = vmatprep.subr.bf16.mxu0 %v6562_v28  ;;  %5923 = vmatpush3.bf16.msra.mxu1 %v5922_v38 }
 0x89e   :  { %5924 = vmatprep.subr.bf16.mxu1 %v6562_v28 }
 0x8a0   :  { %5905 = vmatpush3.bf16.msra.mxu0 %v5904_v4 }
 0x8a1   :  { %5906 = vmatprep.subr.bf16.mxu0 %v6562_v28  ;;  %5926 = vmatpush3.bf16.msra.mxu1 %v5925_v50 }
 0x8a2   :  { %5927 = vmatprep.subr.bf16.mxu1 %v6562_v28 }
 0x8a4   :  { %5908 = vmatpush3.bf16.msra.mxu0 %v5907_v60 }
 0x8a5   :  { %5909 = vmatprep.subr.bf16.mxu0 %v6562_v28  ;;  %5929 = vmatpush3.bf16.msra.mxu1 %v5928_v8 }
 0x8a6   :  { %5930 = vmatprep.subr.bf16.mxu1 %v6562_v28 }
 0x8a8   :  { %5911 = vmatpush3.bf16.msra.mxu0 %v5910_v62 }
 0x8a9   :  { %5912 = vmatprep.subr.bf16.mxu0 %v6562_v28  ;;  %5932 = vmatpush3.bf16.msra.mxu1 %v5931_v37 }
 0x8aa   :  { %5933 = vmatprep.subr.bf16.mxu1 %v6562_v28 }
 0x8ac   :  { %5914 = vmatpush3.bf16.msra.mxu0 %v5913_v0 }
 0x8ad   :  { %5915 = vmatprep.subr.bf16.mxu0 %v6562_v28  ;;  %5935 = vmatpush3.bf16.msra.mxu1 %v5934_v16 }
 0x8ae   :  { %5936 = vmatprep.subr.bf16.mxu1 %v6562_v28 }
 0x8b0   :  { %5917 = vmatpush3.bf16.msra.mxu0 %v5916_v55 }
 0x8b1   :  { %5938 = vmatpush3.bf16.msra.mxu1 %v5937_v20 }
 0x8b2   :  { %5939 = vmatprep.subr.bf16.mxu1 %v6562_v28 }
 0x8b5   :  { %5941 = vmatpush3.bf16.msra.mxu1 %v5940_v24 }
 0x91b   :  { %v4192_v63 = vpop.f32.mrb[134].mxu1 }
 0x91c   :  { %v5399_v39 = vpop.f32.mrb[135].mxu1 }
 0x92f   :  { %v4265_v40 = vpop.f32.mrb[136].mxu1 }
 0x930   :  { %v4266_v42 = vadd.f32 %v4265_v40, %v4192_v63  ;;  %v5422_v43 = vpop.f32.mrb[137].mxu1 }
 0x943   :  { %v4349_v44 = vpop.f32.mrb[138].mxu1 }
 0x944   :  { %v4353_v45 = vadd.f32 %v4349_v44, %v4266_v42  ;;  %v5445_v46 = vpop.f32.mrb[139].mxu1 }
 0x957   :  { %v4434_v47 = vpop.f32.mrb[140].mxu1 }
 0x958   :  { %v4438_v49 = vadd.f32 %v4434_v47, %v4353_v45  ;;  %v5468_v51 = vpop.f32.mrb[141].mxu1 }
 0x96b   :  { %v4519_v53 = vpop.f32.mrb[142].mxu1 }
 0x96c   :  { %v4523_v6 = vadd.f32 %v4519_v53, %v4438_v49  ;;  %v5491_v7 = vpop.f32.mrb[143].mxu1 }
 0x96e   :  { %v4531_v9 = vadd.f32 %v5233_v1, %v4523_v6 }
 0x970   :  { %v5234_v10 = vmul.f32 -1.442695, %v4531_v9 }
 0x972   :  { %6553 = vpow2.f32 %v5234_v10 }
 0x97c   :  { %v6554_v56 = vpop.eup %6553 }
 0x97d   :  { %v4535_v57 = vadd.f32 1.0, %v6554_v56 }
 0x97f   :  { %6555 = vrcp.f32 %v4535_v57 }
 0x989   :  { %v6556_v11 = vpop.eup %6555 }
 0x98a   :  { %5525 = vmatmul.mubr.f32.vlgmr.msra.gmra.mrb[56].mxu0 %v6556_v11 }
 0xa5d   :  { %v4627_v26 = vpop.f32.mrb[56].mxu0 }
 0xa5e   :  { %v4628_v3 = vadd.f32 %v5235_v25, %v4627_v26  ;;  %v5526_v15 = vpop.f32.mrb[57].mxu0 }
 0xa60   :  { %v5236_v29 = vmul.f32 -1.442695, %v4628_v3 }
 0xa62   :  { %6557 = vpow2.f32 %v5236_v29 }
 0xa6c   :  { %v6558_v30 = vpop.eup %6557 }
 0xa6d   :  { %v4634_v4 = vadd.f32 1.0, %v6558_v30 }
 0xa6f   :  { %6559 = vrcp.f32 %v4634_v4 }
 0xa79   :  { %v6560_v5 = vpop.eup %6559 }
 0xa7a   :  { %5560 = vmatmul.mubr.f32.vlgmr.msra.gmra.mrb[144].mxu1 %v6560_v5 }
 0xb4d   :  { %v4726_v28 = vpop.f32.mrb[144].mxu1 }
 0xb4e   :  { %v4727_v59 = vadd.f32 %v5237_v23, %v4726_v28  ;;  %v5561_v60 = vpop.f32.mrb[145].mxu1 }
 0xb50   :  { %4730 = vst [vmem:[%s8626_s15] sm:$0xff] %v4727_v59 }

</bundles_post_ra>
